<compile_context>
chip_gen: v7x
topology: tpu7x:2x2x1
jax: 0.10.0
libtpu: 0.0.40
codegen_flags: <defaults>
</compile_context>

<pallas_src>
import numpy as np
import jax
import jax.numpy as jnp
from jax import lax
from jax.experimental import pallas as pl
from jax.experimental.pallas import tpu as pltpu  # noqa: F401 (kept for parity)

HIDDEN = 50      # LSTM hidden size (nn.LSTM(1, 50, 2))
GATE_PAD = 128   # each gate padded to a full 128-lane vreg column


def lstm_fc_kernel(xw0_ref, w0_ref, w1_ref, b1_ref, wfc_ref, bfc_ref, out_ref):
    """2-layer LSTM over time + Linear on the last hidden state.

    xw0_ref : (T, B, 4G)  precomputed layer-0 input projection + bias (lane-dense)
    w0_ref  : (G, 4G)     layer-0 recurrent weights (rows/cols gate-padded)
    w1_ref  : (2G, 4G)    layer-1 fused [W_ih_l1 ; W_hh_l1] for concat(h1, h2)
    b1_ref  : (1, 4G)     layer-1 combined bias (b_ih + b_hh), gate-padded
    wfc_ref : (1, G)      fc weight row, padded to G lanes
    bfc_ref : (1, 1)      fc bias
    out_ref : (B, 1)
    """
    T, B, _ = xw0_ref.shape
    G = GATE_PAD

    # Hoisted (1,4G)->(B,4G) bias broadcast: done once, not per step/gate.
    b1 = jnp.broadcast_to(b1_ref[...], (B, 4 * G))

    def gates(pre):
        # PyTorch gate order i, f, g, o; each slice is a whole vreg column.
        i = jax.nn.sigmoid(pre[:, 0 * G:1 * G])
        f = jax.nn.sigmoid(pre[:, 1 * G:2 * G])
        g = jnp.tanh(pre[:, 2 * G:3 * G])
        o = jax.nn.sigmoid(pre[:, 3 * G:4 * G])
        return i, f, g, o

    def step(t, carry):
        h1, c1, h2, c2 = carry

        # ---- layer 0: input projection + bias already folded into xw0[t] ----
        pre0 = xw0_ref[t] + jnp.dot(h1, w0_ref[...],
                                    preferred_element_type=jnp.float32)
        i0, f0, g0, o0 = gates(pre0)
        c1n = f0 * c1 + i0 * g0
        h1n = o0 * jnp.tanh(c1n)

        # ---- layer 1: single fused matmul over K = concat(h1_new, h2_prev) ----
        pre1 = jnp.dot(jnp.concatenate([h1n, h2], axis=-1), w1_ref[...],
                       preferred_element_type=jnp.float32) + b1
        i1, f1, g1, o1 = gates(pre1)
        c2n = f1 * c2 + i1 * g1
        h2n = o1 * jnp.tanh(c2n)

        return h1n, c1n, h2n, c2n

    z = jnp.zeros((B, G), jnp.float32)
    _, _, h2, _ = lax.fori_loop(0, T, step, (z, z, z, z), unroll=True)

    # Final FC: (B,G)@(G,1) is MXU-degenerate (N=1); use VPU mul + lane reduce.
    out_ref[...] = (jnp.sum(h2 * wfc_ref[...], axis=-1, keepdims=True)
                    + bfc_ref[...])


def time_series_predictor(x, params):
    """x: (B, T, 1) float32  ->  (B, 1) float32"""
    B, T, _ = x.shape
    H, G = HIDDEN, GATE_PAD

    def split_pad_cols(w):
        # PyTorch (4H, D) -> (D, 4G): per-gate columns padded to G lanes and
        # transposed so that y = x @ W matches x @ w_gate.T per gate.
        D = w.shape[1]
        wg = jnp.transpose(w.reshape(4, H, D), (0, 2, 1))        # (4, D, H)
        wg = jnp.pad(wg, ((0, 0), (0, 0), (0, G - H)))           # (4, D, G)
        return jnp.transpose(wg, (1, 0, 2)).reshape(D, 4 * G)    # (D, 4G)

    def pad_bias(b):
        return jnp.pad(b.reshape(4, H), ((0, 0), (0, G - H))).reshape(4 * G)

    # Layer 0: hoist the K=1 input projection + bias out of the kernel loop.
    wih0_row = split_pad_cols(params["w_ih_l0"])                 # (1, 4G)
    b0 = pad_bias(params["b_ih_l0"] + params["b_hh_l0"])         # (4G,)
    x_tm = jnp.transpose(x[..., 0], (1, 0))                      # (T, B)
    xw0 = (x_tm[:, :, None] * wih0_row[None, :, :]
           + b0[None, None, :]).astype(jnp.float32)              # (T, B, 4G)

    # Layer-0 recurrent weights; rows padded to G so h1 is carried at width G.
    w0 = jnp.pad(split_pad_cols(params["w_hh_l0"]),
                 ((0, G - H), (0, 0)))                           # (G, 4G)

    # Layer-1 fused along K: rows 0:G consume h1_new, rows G:2G consume h2_prev.
    wih1 = jnp.pad(split_pad_cols(params["w_ih_l1"]), ((0, G - H), (0, 0)))
    whh1 = jnp.pad(split_pad_cols(params["w_hh_l1"]), ((0, G - H), (0, 0)))
    w1 = jnp.concatenate([wih1, whh1], axis=0)                   # (2G, 4G)
    b1 = pad_bias(params["b_ih_l1"] + params["b_hh_l1"]).reshape(1, 4 * G)

    wfc = jnp.pad(params["fc_w"], ((0, 0), (0, G - H)))          # (1, G)
    bfc = params["fc_b"].reshape(1, 1)                           # (1, 1)

    return pl.pallas_call(
        lstm_fc_kernel,
        out_shape=jax.ShapeDtypeStruct((B, 1), jnp.float32),
    )(xw0, w0, w1, b1, wfc, bfc)


def init_params(key):
    """Deterministic init mimicking PyTorch's U(-1/sqrt(H), 1/sqrt(H))."""
    H = HIDDEN
    bound = 1.0 / np.sqrt(H)
    keys = jax.random.split(key, 10)

    def u(k, shape):
        return jax.random.uniform(k, shape, jnp.float32, -bound, bound)

    return {
        "w_ih_l0": u(keys[0], (4 * H, 1)),
        "w_hh_l0": u(keys[1], (4 * H, H)),
        "b_ih_l0": u(keys[2], (4 * H,)),
        "b_hh_l0": u(keys[3], (4 * H,)),
        "w_ih_l1": u(keys[4], (4 * H, H)),
        "w_hh_l1": u(keys[5], (4 * H, H)),
        "b_ih_l1": u(keys[6], (4 * H,)),
        "b_hh_l1": u(keys[7], (4 * H,)),
        "fc_w":    u(keys[8], (1, H)),
        "fc_b":    u(keys[9], (1,)),
    }


def reference(x, params):
    """Pure-JAX reference matching torch.nn.LSTM semantics."""
    H = HIDDEN
    B = x.shape[0]

    def lstm_layer(inp, w_ih, w_hh, b_ih, b_hh):
        def cell(carry, x_t):
            h, c = carry
            gatevals = x_t @ w_ih.T + h @ w_hh.T + b_ih + b_hh
            i, f, g, o = jnp.split(gatevals, 4, axis=-1)
            i = jax.nn.sigmoid(i)
            f = jax.nn.sigmoid(f)
            g = jnp.tanh(g)
            o = jax.nn.sigmoid(o)
            c = f * c + i * g
            h = o * jnp.tanh(c)
            return (h, c), h

        init = (jnp.zeros((B, H), jnp.float32), jnp.zeros((B, H), jnp.float32))
        _, hs = lax.scan(cell, init, jnp.transpose(inp, (1, 0, 2)))
        return jnp.transpose(hs, (1, 0, 2))

    out1 = lstm_layer(x, params["w_ih_l0"], params["w_hh_l0"],
                      params["b_ih_l0"], params["b_hh_l0"])
    out2 = lstm_layer(out1, params["w_ih_l1"], params["w_hh_l1"],
                      params["b_ih_l1"], params["b_hh_l1"])
    last = out2[:, -1, :]
    return last @ params["fc_w"].T + params["fc_b"]


if __name__ == "__main__":
    key = jax.random.PRNGKey(0)
    k_param, k_x = jax.random.split(key)

    B, T = 2, 8                       # batch=2, seq=8, feature=1
    params = init_params(k_param)
    x = jax.random.normal(k_x, (B, T, 1), jnp.float32)

    out = time_series_predictor(x, params)
    out = jax.block_until_ready(out)

    ref = jax.block_until_ready(reference(x, params))
    np.testing.assert_allclose(np.asarray(out), np.asarray(ref),
                               rtol=1e-5, atol=1e-5)
    print("KERNEL_OK")
</pallas_src>

<mosaic_0001>
module attributes {stable_mosaic.version = 11 : i64} {
  func.func @lstm_fc_kernel(%arg0: memref<8x2x512xf32, #tpu.memory_space<vmem>>, %arg1: memref<128x512xf32, #tpu.memory_space<vmem>>, %arg2: memref<256x512xf32, #tpu.memory_space<vmem>>, %arg3: memref<1x512xf32, #tpu.memory_space<vmem>>, %arg4: memref<1x128xf32, #tpu.memory_space<vmem>>, %arg5: memref<1x1xf32, #tpu.memory_space<vmem>>, %arg6: memref<2x1xf32, #tpu.memory_space<vmem>>) attributes {dimension_semantics = [], scalar_prefetch = 0 : i64, scratch_operands = 0 : i64, tpu.core_type = #tpu.core_type<tc>} {
    %c0 = arith.constant 0 : index
    %c0_0 = arith.constant 0 : index
    %0 = vector.load %arg3[%c0, %c0_0] : memref<1x512xf32, #tpu.memory_space<vmem>>, vector<1x512xf32>
    %1 = vector.shape_cast %0 : vector<1x512xf32> to vector<1x512xf32>
    %2 = vector.broadcast %1 : vector<1x512xf32> to vector<2x512xf32>
    %cst = arith.constant 0.000000e+00 : f32
    %3 = vector.broadcast %cst : f32 to vector<2x128xf32>
    %c0_i32 = arith.constant 0 : i32
    %4 = arith.index_cast %c0_i32 : i32 to index
    %c0_1 = arith.constant 0 : index
    %c0_2 = arith.constant 0 : index
    %5 = vector.load %arg0[%4, %c0_1, %c0_2] : memref<8x2x512xf32, #tpu.memory_space<vmem>>, vector<1x2x512xf32>
    %6 = vector.shape_cast %5 : vector<1x2x512xf32> to vector<2x512xf32>
    %c0_3 = arith.constant 0 : index
    %c0_4 = arith.constant 0 : index
    %7 = vector.load %arg1[%c0_3, %c0_4] : memref<128x512xf32, #tpu.memory_space<vmem>>, vector<128x512xf32>
    %cst_5 = arith.constant dense<0.000000e+00> : vector<2x512xf32>
    %8 = tpu.matmul %3, %7, %cst_5 {dimension_numbers = #tpu.dot_dimension_numbers<[1], [0], [0], [1], [0, 0, 1, 1], [], []>} : vector<2x128xf32>, vector<128x512xf32>, vector<2x512xf32> -> vector<2x512xf32>
    %9 = arith.addf %6, %8 : vector<2x512xf32>
    %10 = vector.extract_strided_slice %9 {offsets = [0, 0], sizes = [2, 128], strides = [1, 1]} : vector<2x512xf32> to vector<2x128xf32>
    %11 = arith.negf %10 : vector<2x128xf32>
    %12 = math.exp %11 : vector<2x128xf32>
    %cst_6 = arith.constant 1.000000e+00 : f32
    %13 = vector.broadcast %cst_6 : f32 to vector<2x128xf32>
    %14 = arith.addf %13, %12 : vector<2x128xf32>
    %15 = arith.divf %13, %14 : vector<2x128xf32>
    %16 = vector.extract_strided_slice %9 {offsets = [0, 128], sizes = [2, 128], strides = [1, 1]} : vector<2x512xf32> to vector<2x128xf32>
    %17 = arith.negf %16 : vector<2x128xf32>
    %18 = math.exp %17 : vector<2x128xf32>
    %cst_7 = arith.constant 1.000000e+00 : f32
    %19 = vector.broadcast %cst_7 : f32 to vector<2x128xf32>
    %20 = arith.addf %19, %18 : vector<2x128xf32>
    %21 = arith.divf %19, %20 : vector<2x128xf32>
    %22 = vector.extract_strided_slice %9 {offsets = [0, 256], sizes = [2, 128], strides = [1, 1]} : vector<2x512xf32> to vector<2x128xf32>
    %23 = math.tanh %22 : vector<2x128xf32>
    %24 = vector.extract_strided_slice %9 {offsets = [0, 384], sizes = [2, 128], strides = [1, 1]} : vector<2x512xf32> to vector<2x128xf32>
    %25 = arith.negf %24 : vector<2x128xf32>
    %26 = math.exp %25 : vector<2x128xf32>
    %cst_8 = arith.constant 1.000000e+00 : f32
    %27 = vector.broadcast %cst_8 : f32 to vector<2x128xf32>
    %28 = arith.addf %27, %26 : vector<2x128xf32>
    %29 = arith.divf %27, %28 : vector<2x128xf32>
    %30 = arith.mulf %21, %3 : vector<2x128xf32>
    %31 = arith.mulf %15, %23 : vector<2x128xf32>
    %32 = arith.addf %30, %31 : vector<2x128xf32>
    %33 = math.tanh %32 : vector<2x128xf32>
    %34 = arith.mulf %29, %33 : vector<2x128xf32>
    %35 = tpu.concatenate %34, %3 in 1 : vector<2x128xf32>, vector<2x128xf32> -> vector<2x256xf32>
    %c0_9 = arith.constant 0 : index
    %c0_10 = arith.constant 0 : index
    %36 = vector.load %arg2[%c0_9, %c0_10] : memref<256x512xf32, #tpu.memory_space<vmem>>, vector<256x512xf32>
    %cst_11 = arith.constant dense<0.000000e+00> : vector<2x512xf32>
    %37 = tpu.matmul %35, %36, %cst_11 {dimension_numbers = #tpu.dot_dimension_numbers<[1], [0], [0], [1], [0, 0, 1, 1], [], []>} : vector<2x256xf32>, vector<256x512xf32>, vector<2x512xf32> -> vector<2x512xf32>
    %38 = arith.addf %37, %2 : vector<2x512xf32>
    %39 = vector.extract_strided_slice %38 {offsets = [0, 0], sizes = [2, 128], strides = [1, 1]} : vector<2x512xf32> to vector<2x128xf32>
    %40 = arith.negf %39 : vector<2x128xf32>
    %41 = math.exp %40 : vector<2x128xf32>
    %cst_12 = arith.constant 1.000000e+00 : f32
    %42 = vector.broadcast %cst_12 : f32 to vector<2x128xf32>
    %43 = arith.addf %42, %41 : vector<2x128xf32>
    %44 = arith.divf %42, %43 : vector<2x128xf32>
    %45 = vector.extract_strided_slice %38 {offsets = [0, 128], sizes = [2, 128], strides = [1, 1]} : vector<2x512xf32> to vector<2x128xf32>
    %46 = arith.negf %45 : vector<2x128xf32>
    %47 = math.exp %46 : vector<2x128xf32>
    %cst_13 = arith.constant 1.000000e+00 : f32
    %48 = vector.broadcast %cst_13 : f32 to vector<2x128xf32>
    %49 = arith.addf %48, %47 : vector<2x128xf32>
    %50 = arith.divf %48, %49 : vector<2x128xf32>
    %51 = vector.extract_strided_slice %38 {offsets = [0, 256], sizes = [2, 128], strides = [1, 1]} : vector<2x512xf32> to vector<2x128xf32>
    %52 = math.tanh %51 : vector<2x128xf32>
    %53 = vector.extract_strided_slice %38 {offsets = [0, 384], sizes = [2, 128], strides = [1, 1]} : vector<2x512xf32> to vector<2x128xf32>
    %54 = arith.negf %53 : vector<2x128xf32>
    %55 = math.exp %54 : vector<2x128xf32>
    %cst_14 = arith.constant 1.000000e+00 : f32
    %56 = vector.broadcast %cst_14 : f32 to vector<2x128xf32>
    %57 = arith.addf %56, %55 : vector<2x128xf32>
    %58 = arith.divf %56, %57 : vector<2x128xf32>
    %59 = arith.mulf %50, %3 : vector<2x128xf32>
    %60 = arith.mulf %44, %52 : vector<2x128xf32>
    %61 = arith.addf %59, %60 : vector<2x128xf32>
    %62 = math.tanh %61 : vector<2x128xf32>
    %63 = arith.mulf %58, %62 : vector<2x128xf32>
    %c1_i32 = arith.constant 1 : i32
    %64 = arith.index_cast %c1_i32 : i32 to index
    %c0_15 = arith.constant 0 : index
    %c0_16 = arith.constant 0 : index
    %65 = vector.load %arg0[%64, %c0_15, %c0_16] : memref<8x2x512xf32, #tpu.memory_space<vmem>>, vector<1x2x512xf32>
    %66 = vector.shape_cast %65 : vector<1x2x512xf32> to vector<2x512xf32>
    %c0_17 = arith.constant 0 : index
    %c0_18 = arith.constant 0 : index
    %67 = vector.load %arg1[%c0_17, %c0_18] : memref<128x512xf32, #tpu.memory_space<vmem>>, vector<128x512xf32>
    %cst_19 = arith.constant dense<0.000000e+00> : vector<2x512xf32>
    %68 = tpu.matmul %34, %67, %cst_19 {dimension_numbers = #tpu.dot_dimension_numbers<[1], [0], [0], [1], [0, 0, 1, 1], [], []>} : vector<2x128xf32>, vector<128x512xf32>, vector<2x512xf32> -> vector<2x512xf32>
    %69 = arith.addf %66, %68 : vector<2x512xf32>
    %70 = vector.extract_strided_slice %69 {offsets = [0, 0], sizes = [2, 128], strides = [1, 1]} : vector<2x512xf32> to vector<2x128xf32>
    %71 = arith.negf %70 : vector<2x128xf32>
    %72 = math.exp %71 : vector<2x128xf32>
    %cst_20 = arith.constant 1.000000e+00 : f32
    %73 = vector.broadcast %cst_20 : f32 to vector<2x128xf32>
    %74 = arith.addf %73, %72 : vector<2x128xf32>
    %75 = arith.divf %73, %74 : vector<2x128xf32>
    %76 = vector.extract_strided_slice %69 {offsets = [0, 128], sizes = [2, 128], strides = [1, 1]} : vector<2x512xf32> to vector<2x128xf32>
    %77 = arith.negf %76 : vector<2x128xf32>
    %78 = math.exp %77 : vector<2x128xf32>
    %cst_21 = arith.constant 1.000000e+00 : f32
    %79 = vector.broadcast %cst_21 : f32 to vector<2x128xf32>
    %80 = arith.addf %79, %78 : vector<2x128xf32>
    %81 = arith.divf %79, %80 : vector<2x128xf32>
    %82 = vector.extract_strided_slice %69 {offsets = [0, 256], sizes = [2, 128], strides = [1, 1]} : vector<2x512xf32> to vector<2x128xf32>
    %83 = math.tanh %82 : vector<2x128xf32>
    %84 = vector.extract_strided_slice %69 {offsets = [0, 384], sizes = [2, 128], strides = [1, 1]} : vector<2x512xf32> to vector<2x128xf32>
    %85 = arith.negf %84 : vector<2x128xf32>
    %86 = math.exp %85 : vector<2x128xf32>
    %cst_22 = arith.constant 1.000000e+00 : f32
    %87 = vector.broadcast %cst_22 : f32 to vector<2x128xf32>
    %88 = arith.addf %87, %86 : vector<2x128xf32>
    %89 = arith.divf %87, %88 : vector<2x128xf32>
    %90 = arith.mulf %81, %32 : vector<2x128xf32>
    %91 = arith.mulf %75, %83 : vector<2x128xf32>
    %92 = arith.addf %90, %91 : vector<2x128xf32>
    %93 = math.tanh %92 : vector<2x128xf32>
    %94 = arith.mulf %89, %93 : vector<2x128xf32>
    %95 = tpu.concatenate %94, %63 in 1 : vector<2x128xf32>, vector<2x128xf32> -> vector<2x256xf32>
    %c0_23 = arith.constant 0 : index
    %c0_24 = arith.constant 0 : index
    %96 = vector.load %arg2[%c0_23, %c0_24] : memref<256x512xf32, #tpu.memory_space<vmem>>, vector<256x512xf32>
    %cst_25 = arith.constant dense<0.000000e+00> : vector<2x512xf32>
    %97 = tpu.matmul %95, %96, %cst_25 {dimension_numbers = #tpu.dot_dimension_numbers<[1], [0], [0], [1], [0, 0, 1, 1], [], []>} : vector<2x256xf32>, vector<256x512xf32>, vector<2x512xf32> -> vector<2x512xf32>
    %98 = arith.addf %97, %2 : vector<2x512xf32>
    %99 = vector.extract_strided_slice %98 {offsets = [0, 0], sizes = [2, 128], strides = [1, 1]} : vector<2x512xf32> to vector<2x128xf32>
    %100 = arith.negf %99 : vector<2x128xf32>
    %101 = math.exp %100 : vector<2x128xf32>
    %cst_26 = arith.constant 1.000000e+00 : f32
    %102 = vector.broadcast %cst_26 : f32 to vector<2x128xf32>
    %103 = arith.addf %102, %101 : vector<2x128xf32>
    %104 = arith.divf %102, %103 : vector<2x128xf32>
    %105 = vector.extract_strided_slice %98 {offsets = [0, 128], sizes = [2, 128], strides = [1, 1]} : vector<2x512xf32> to vector<2x128xf32>
    %106 = arith.negf %105 : vector<2x128xf32>
    %107 = math.exp %106 : vector<2x128xf32>
    %cst_27 = arith.constant 1.000000e+00 : f32
    %108 = vector.broadcast %cst_27 : f32 to vector<2x128xf32>
    %109 = arith.addf %108, %107 : vector<2x128xf32>
    %110 = arith.divf %108, %109 : vector<2x128xf32>
    %111 = vector.extract_strided_slice %98 {offsets = [0, 256], sizes = [2, 128], strides = [1, 1]} : vector<2x512xf32> to vector<2x128xf32>
    %112 = math.tanh %111 : vector<2x128xf32>
    %113 = vector.extract_strided_slice %98 {offsets = [0, 384], sizes = [2, 128], strides = [1, 1]} : vector<2x512xf32> to vector<2x128xf32>
    %114 = arith.negf %113 : vector<2x128xf32>
    %115 = math.exp %114 : vector<2x128xf32>
    %cst_28 = arith.constant 1.000000e+00 : f32
    %116 = vector.broadcast %cst_28 : f32 to vector<2x128xf32>
    %117 = arith.addf %116, %115 : vector<2x128xf32>
    %118 = arith.divf %116, %117 : vector<2x128xf32>
    %119 = arith.mulf %110, %61 : vector<2x128xf32>
    %120 = arith.mulf %104, %112 : vector<2x128xf32>
    %121 = arith.addf %119, %120 : vector<2x128xf32>
    %122 = math.tanh %121 : vector<2x128xf32>
    %123 = arith.mulf %118, %122 : vector<2x128xf32>
    %c2_i32 = arith.constant 2 : i32
    %124 = arith.index_cast %c2_i32 : i32 to index
    %c0_29 = arith.constant 0 : index
    %c0_30 = arith.constant 0 : index
    %125 = vector.load %arg0[%124, %c0_29, %c0_30] : memref<8x2x512xf32, #tpu.memory_space<vmem>>, vector<1x2x512xf32>
    %126 = vector.shape_cast %125 : vector<1x2x512xf32> to vector<2x512xf32>
    %c0_31 = arith.constant 0 : index
    %c0_32 = arith.constant 0 : index
    %127 = vector.load %arg1[%c0_31, %c0_32] : memref<128x512xf32, #tpu.memory_space<vmem>>, vector<128x512xf32>
    %cst_33 = arith.constant dense<0.000000e+00> : vector<2x512xf32>
    %128 = tpu.matmul %94, %127, %cst_33 {dimension_numbers = #tpu.dot_dimension_numbers<[1], [0], [0], [1], [0, 0, 1, 1], [], []>} : vector<2x128xf32>, vector<128x512xf32>, vector<2x512xf32> -> vector<2x512xf32>
    %129 = arith.addf %126, %128 : vector<2x512xf32>
    %130 = vector.extract_strided_slice %129 {offsets = [0, 0], sizes = [2, 128], strides = [1, 1]} : vector<2x512xf32> to vector<2x128xf32>
    %131 = arith.negf %130 : vector<2x128xf32>
    %132 = math.exp %131 : vector<2x128xf32>
    %cst_34 = arith.constant 1.000000e+00 : f32
    %133 = vector.broadcast %cst_34 : f32 to vector<2x128xf32>
    %134 = arith.addf %133, %132 : vector<2x128xf32>
    %135 = arith.divf %133, %134 : vector<2x128xf32>
    %136 = vector.extract_strided_slice %129 {offsets = [0, 128], sizes = [2, 128], strides = [1, 1]} : vector<2x512xf32> to vector<2x128xf32>
    %137 = arith.negf %136 : vector<2x128xf32>
    %138 = math.exp %137 : vector<2x128xf32>
    %cst_35 = arith.constant 1.000000e+00 : f32
    %139 = vector.broadcast %cst_35 : f32 to vector<2x128xf32>
    %140 = arith.addf %139, %138 : vector<2x128xf32>
    %141 = arith.divf %139, %140 : vector<2x128xf32>
    %142 = vector.extract_strided_slice %129 {offsets = [0, 256], sizes = [2, 128], strides = [1, 1]} : vector<2x512xf32> to vector<2x128xf32>
    %143 = math.tanh %142 : vector<2x128xf32>
    %144 = vector.extract_strided_slice %129 {offsets = [0, 384], sizes = [2, 128], strides = [1, 1]} : vector<2x512xf32> to vector<2x128xf32>
    %145 = arith.negf %144 : vector<2x128xf32>
    %146 = math.exp %145 : vector<2x128xf32>
    %cst_36 = arith.constant 1.000000e+00 : f32
    %147 = vector.broadcast %cst_36 : f32 to vector<2x128xf32>
    %148 = arith.addf %147, %146 : vector<2x128xf32>
    %149 = arith.divf %147, %148 : vector<2x128xf32>
    %150 = arith.mulf %141, %92 : vector<2x128xf32>
    %151 = arith.mulf %135, %143 : vector<2x128xf32>
    %152 = arith.addf %150, %151 : vector<2x128xf32>
    %153 = math.tanh %152 : vector<2x128xf32>
    %154 = arith.mulf %149, %153 : vector<2x128xf32>
    %155 = tpu.concatenate %154, %123 in 1 : vector<2x128xf32>, vector<2x128xf32> -> vector<2x256xf32>
    %c0_37 = arith.constant 0 : index
    %c0_38 = arith.constant 0 : index
    %156 = vector.load %arg2[%c0_37, %c0_38] : memref<256x512xf32, #tpu.memory_space<vmem>>, vector<256x512xf32>
    %cst_39 = arith.constant dense<0.000000e+00> : vector<2x512xf32>
    %157 = tpu.matmul %155, %156, %cst_39 {dimension_numbers = #tpu.dot_dimension_numbers<[1], [0], [0], [1], [0, 0, 1, 1], [], []>} : vector<2x256xf32>, vector<256x512xf32>, vector<2x512xf32> -> vector<2x512xf32>
    %158 = arith.addf %157, %2 : vector<2x512xf32>
    %159 = vector.extract_strided_slice %158 {offsets = [0, 0], sizes = [2, 128], strides = [1, 1]} : vector<2x512xf32> to vector<2x128xf32>
    %160 = arith.negf %159 : vector<2x128xf32>
    %161 = math.exp %160 : vector<2x128xf32>
    %cst_40 = arith.constant 1.000000e+00 : f32
    %162 = vector.broadcast %cst_40 : f32 to vector<2x128xf32>
    %163 = arith.addf %162, %161 : vector<2x128xf32>
    %164 = arith.divf %162, %163 : vector<2x128xf32>
    %165 = vector.extract_strided_slice %158 {offsets = [0, 128], sizes = [2, 128], strides = [1, 1]} : vector<2x512xf32> to vector<2x128xf32>
    %166 = arith.negf %165 : vector<2x128xf32>
    %167 = math.exp %166 : vector<2x128xf32>
    %cst_41 = arith.constant 1.000000e+00 : f32
    %168 = vector.broadcast %cst_41 : f32 to vector<2x128xf32>
    %169 = arith.addf %168, %167 : vector<2x128xf32>
    %170 = arith.divf %168, %169 : vector<2x128xf32>
    %171 = vector.extract_strided_slice %158 {offsets = [0, 256], sizes = [2, 128], strides = [1, 1]} : vector<2x512xf32> to vector<2x128xf32>
    %172 = math.tanh %171 : vector<2x128xf32>
    %173 = vector.extract_strided_slice %158 {offsets = [0, 384], sizes = [2, 128], strides = [1, 1]} : vector<2x512xf32> to vector<2x128xf32>
    %174 = arith.negf %173 : vector<2x128xf32>
    %175 = math.exp %174 : vector<2x128xf32>
    %cst_42 = arith.constant 1.000000e+00 : f32
    %176 = vector.broadcast %cst_42 : f32 to vector<2x128xf32>
    %177 = arith.addf %176, %175 : vector<2x128xf32>
    %178 = arith.divf %176, %177 : vector<2x128xf32>
    %179 = arith.mulf %170, %121 : vector<2x128xf32>
    %180 = arith.mulf %164, %172 : vector<2x128xf32>
    %181 = arith.addf %179, %180 : vector<2x128xf32>
    %182 = math.tanh %181 : vector<2x128xf32>
    %183 = arith.mulf %178, %182 : vector<2x128xf32>
    %c3_i32 = arith.constant 3 : i32
    %184 = arith.index_cast %c3_i32 : i32 to index
    %c0_43 = arith.constant 0 : index
    %c0_44 = arith.constant 0 : index
    %185 = vector.load %arg0[%184, %c0_43, %c0_44] : memref<8x2x512xf32, #tpu.memory_space<vmem>>, vector<1x2x512xf32>
    %186 = vector.shape_cast %185 : vector<1x2x512xf32> to vector<2x512xf32>
    %c0_45 = arith.constant 0 : index
    %c0_46 = arith.constant 0 : index
    %187 = vector.load %arg1[%c0_45, %c0_46] : memref<128x512xf32, #tpu.memory_space<vmem>>, vector<128x512xf32>
    %cst_47 = arith.constant dense<0.000000e+00> : vector<2x512xf32>
    %188 = tpu.matmul %154, %187, %cst_47 {dimension_numbers = #tpu.dot_dimension_numbers<[1], [0], [0], [1], [0, 0, 1, 1], [], []>} : vector<2x128xf32>, vector<128x512xf32>, vector<2x512xf32> -> vector<2x512xf32>
    %189 = arith.addf %186, %188 : vector<2x512xf32>
    %190 = vector.extract_strided_slice %189 {offsets = [0, 0], sizes = [2, 128], strides = [1, 1]} : vector<2x512xf32> to vector<2x128xf32>
    %191 = arith.negf %190 : vector<2x128xf32>
    %192 = math.exp %191 : vector<2x128xf32>
    %cst_48 = arith.constant 1.000000e+00 : f32
    %193 = vector.broadcast %cst_48 : f32 to vector<2x128xf32>
    %194 = arith.addf %193, %192 : vector<2x128xf32>
    %195 = arith.divf %193, %194 : vector<2x128xf32>
    %196 = vector.extract_strided_slice %189 {offsets = [0, 128], sizes = [2, 128], strides = [1, 1]} : vector<2x512xf32> to vector<2x128xf32>
    %197 = arith.negf %196 : vector<2x128xf32>
    %198 = math.exp %197 : vector<2x128xf32>
    %cst_49 = arith.constant 1.000000e+00 : f32
    %199 = vector.broadcast %cst_49 : f32 to vector<2x128xf32>
    %200 = arith.addf %199, %198 : vector<2x128xf32>
    %201 = arith.divf %199, %200 : vector<2x128xf32>
    %202 = vector.extract_strided_slice %189 {offsets = [0, 256], sizes = [2, 128], strides = [1, 1]} : vector<2x512xf32> to vector<2x128xf32>
    %203 = math.tanh %202 : vector<2x128xf32>
    %204 = vector.extract_strided_slice %189 {offsets = [0, 384], sizes = [2, 128], strides = [1, 1]} : vector<2x512xf32> to vector<2x128xf32>
    %205 = arith.negf %204 : vector<2x128xf32>
    %206 = math.exp %205 : vector<2x128xf32>
    %cst_50 = arith.constant 1.000000e+00 : f32
    %207 = vector.broadcast %cst_50 : f32 to vector<2x128xf32>
    %208 = arith.addf %207, %206 : vector<2x128xf32>
    %209 = arith.divf %207, %208 : vector<2x128xf32>
    %210 = arith.mulf %201, %152 : vector<2x128xf32>
    %211 = arith.mulf %195, %203 : vector<2x128xf32>
    %212 = arith.addf %210, %211 : vector<2x128xf32>
    %213 = math.tanh %212 : vector<2x128xf32>
    %214 = arith.mulf %209, %213 : vector<2x128xf32>
    %215 = tpu.concatenate %214, %183 in 1 : vector<2x128xf32>, vector<2x128xf32> -> vector<2x256xf32>
    %c0_51 = arith.constant 0 : index
    %c0_52 = arith.constant 0 : index
    %216 = vector.load %arg2[%c0_51, %c0_52] : memref<256x512xf32, #tpu.memory_space<vmem>>, vector<256x512xf32>
    %cst_53 = arith.constant dense<0.000000e+00> : vector<2x512xf32>
    %217 = tpu.matmul %215, %216, %cst_53 {dimension_numbers = #tpu.dot_dimension_numbers<[1], [0], [0], [1], [0, 0, 1, 1], [], []>} : vector<2x256xf32>, vector<256x512xf32>, vector<2x512xf32> -> vector<2x512xf32>
    %218 = arith.addf %217, %2 : vector<2x512xf32>
    %219 = vector.extract_strided_slice %218 {offsets = [0, 0], sizes = [2, 128], strides = [1, 1]} : vector<2x512xf32> to vector<2x128xf32>
    %220 = arith.negf %219 : vector<2x128xf32>
    %221 = math.exp %220 : vector<2x128xf32>
    %cst_54 = arith.constant 1.000000e+00 : f32
    %222 = vector.broadcast %cst_54 : f32 to vector<2x128xf32>
    %223 = arith.addf %222, %221 : vector<2x128xf32>
    %224 = arith.divf %222, %223 : vector<2x128xf32>
    %225 = vector.extract_strided_slice %218 {offsets = [0, 128], sizes = [2, 128], strides = [1, 1]} : vector<2x512xf32> to vector<2x128xf32>
    %226 = arith.negf %225 : vector<2x128xf32>
    %227 = math.exp %226 : vector<2x128xf32>
    %cst_55 = arith.constant 1.000000e+00 : f32
    %228 = vector.broadcast %cst_55 : f32 to vector<2x128xf32>
    %229 = arith.addf %228, %227 : vector<2x128xf32>
    %230 = arith.divf %228, %229 : vector<2x128xf32>
    %231 = vector.extract_strided_slice %218 {offsets = [0, 256], sizes = [2, 128], strides = [1, 1]} : vector<2x512xf32> to vector<2x128xf32>
    %232 = math.tanh %231 : vector<2x128xf32>
    %233 = vector.extract_strided_slice %218 {offsets = [0, 384], sizes = [2, 128], strides = [1, 1]} : vector<2x512xf32> to vector<2x128xf32>
    %234 = arith.negf %233 : vector<2x128xf32>
    %235 = math.exp %234 : vector<2x128xf32>
    %cst_56 = arith.constant 1.000000e+00 : f32
    %236 = vector.broadcast %cst_56 : f32 to vector<2x128xf32>
    %237 = arith.addf %236, %235 : vector<2x128xf32>
    %238 = arith.divf %236, %237 : vector<2x128xf32>
    %239 = arith.mulf %230, %181 : vector<2x128xf32>
    %240 = arith.mulf %224, %232 : vector<2x128xf32>
    %241 = arith.addf %239, %240 : vector<2x128xf32>
    %242 = math.tanh %241 : vector<2x128xf32>
    %243 = arith.mulf %238, %242 : vector<2x128xf32>
    %c4_i32 = arith.constant 4 : i32
    %244 = arith.index_cast %c4_i32 : i32 to index
    %c0_57 = arith.constant 0 : index
    %c0_58 = arith.constant 0 : index
    %245 = vector.load %arg0[%244, %c0_57, %c0_58] : memref<8x2x512xf32, #tpu.memory_space<vmem>>, vector<1x2x512xf32>
    %246 = vector.shape_cast %245 : vector<1x2x512xf32> to vector<2x512xf32>
    %c0_59 = arith.constant 0 : index
    %c0_60 = arith.constant 0 : index
    %247 = vector.load %arg1[%c0_59, %c0_60] : memref<128x512xf32, #tpu.memory_space<vmem>>, vector<128x512xf32>
    %cst_61 = arith.constant dense<0.000000e+00> : vector<2x512xf32>
    %248 = tpu.matmul %214, %247, %cst_61 {dimension_numbers = #tpu.dot_dimension_numbers<[1], [0], [0], [1], [0, 0, 1, 1], [], []>} : vector<2x128xf32>, vector<128x512xf32>, vector<2x512xf32> -> vector<2x512xf32>
    %249 = arith.addf %246, %248 : vector<2x512xf32>
    %250 = vector.extract_strided_slice %249 {offsets = [0, 0], sizes = [2, 128], strides = [1, 1]} : vector<2x512xf32> to vector<2x128xf32>
    %251 = arith.negf %250 : vector<2x128xf32>
    %252 = math.exp %251 : vector<2x128xf32>
    %cst_62 = arith.constant 1.000000e+00 : f32
    %253 = vector.broadcast %cst_62 : f32 to vector<2x128xf32>
    %254 = arith.addf %253, %252 : vector<2x128xf32>
    %255 = arith.divf %253, %254 : vector<2x128xf32>
    %256 = vector.extract_strided_slice %249 {offsets = [0, 128], sizes = [2, 128], strides = [1, 1]} : vector<2x512xf32> to vector<2x128xf32>
    %257 = arith.negf %256 : vector<2x128xf32>
    %258 = math.exp %257 : vector<2x128xf32>
    %cst_63 = arith.constant 1.000000e+00 : f32
    %259 = vector.broadcast %cst_63 : f32 to vector<2x128xf32>
    %260 = arith.addf %259, %258 : vector<2x128xf32>
    %261 = arith.divf %259, %260 : vector<2x128xf32>
    %262 = vector.extract_strided_slice %249 {offsets = [0, 256], sizes = [2, 128], strides = [1, 1]} : vector<2x512xf32> to vector<2x128xf32>
    %263 = math.tanh %262 : vector<2x128xf32>
    %264 = vector.extract_strided_slice %249 {offsets = [0, 384], sizes = [2, 128], strides = [1, 1]} : vector<2x512xf32> to vector<2x128xf32>
    %265 = arith.negf %264 : vector<2x128xf32>
    %266 = math.exp %265 : vector<2x128xf32>
    %cst_64 = arith.constant 1.000000e+00 : f32
    %267 = vector.broadcast %cst_64 : f32 to vector<2x128xf32>
    %268 = arith.addf %267, %266 : vector<2x128xf32>
    %269 = arith.divf %267, %268 : vector<2x128xf32>
    %270 = arith.mulf %261, %212 : vector<2x128xf32>
    %271 = arith.mulf %255, %263 : vector<2x128xf32>
    %272 = arith.addf %270, %271 : vector<2x128xf32>
    %273 = math.tanh %272 : vector<2x128xf32>
    %274 = arith.mulf %269, %273 : vector<2x128xf32>
    %275 = tpu.concatenate %274, %243 in 1 : vector<2x128xf32>, vector<2x128xf32> -> vector<2x256xf32>
    %c0_65 = arith.constant 0 : index
    %c0_66 = arith.constant 0 : index
    %276 = vector.load %arg2[%c0_65, %c0_66] : memref<256x512xf32, #tpu.memory_space<vmem>>, vector<256x512xf32>
    %cst_67 = arith.constant dense<0.000000e+00> : vector<2x512xf32>
    %277 = tpu.matmul %275, %276, %cst_67 {dimension_numbers = #tpu.dot_dimension_numbers<[1], [0], [0], [1], [0, 0, 1, 1], [], []>} : vector<2x256xf32>, vector<256x512xf32>, vector<2x512xf32> -> vector<2x512xf32>
    %278 = arith.addf %277, %2 : vector<2x512xf32>
    %279 = vector.extract_strided_slice %278 {offsets = [0, 0], sizes = [2, 128], strides = [1, 1]} : vector<2x512xf32> to vector<2x128xf32>
    %280 = arith.negf %279 : vector<2x128xf32>
    %281 = math.exp %280 : vector<2x128xf32>
    %cst_68 = arith.constant 1.000000e+00 : f32
    %282 = vector.broadcast %cst_68 : f32 to vector<2x128xf32>
    %283 = arith.addf %282, %281 : vector<2x128xf32>
    %284 = arith.divf %282, %283 : vector<2x128xf32>
    %285 = vector.extract_strided_slice %278 {offsets = [0, 128], sizes = [2, 128], strides = [1, 1]} : vector<2x512xf32> to vector<2x128xf32>
    %286 = arith.negf %285 : vector<2x128xf32>
    %287 = math.exp %286 : vector<2x128xf32>
    %cst_69 = arith.constant 1.000000e+00 : f32
    %288 = vector.broadcast %cst_69 : f32 to vector<2x128xf32>
    %289 = arith.addf %288, %287 : vector<2x128xf32>
    %290 = arith.divf %288, %289 : vector<2x128xf32>
    %291 = vector.extract_strided_slice %278 {offsets = [0, 256], sizes = [2, 128], strides = [1, 1]} : vector<2x512xf32> to vector<2x128xf32>
    %292 = math.tanh %291 : vector<2x128xf32>
    %293 = vector.extract_strided_slice %278 {offsets = [0, 384], sizes = [2, 128], strides = [1, 1]} : vector<2x512xf32> to vector<2x128xf32>
    %294 = arith.negf %293 : vector<2x128xf32>
    %295 = math.exp %294 : vector<2x128xf32>
    %cst_70 = arith.constant 1.000000e+00 : f32
    %296 = vector.broadcast %cst_70 : f32 to vector<2x128xf32>
    %297 = arith.addf %296, %295 : vector<2x128xf32>
    %298 = arith.divf %296, %297 : vector<2x128xf32>
    %299 = arith.mulf %290, %241 : vector<2x128xf32>
    %300 = arith.mulf %284, %292 : vector<2x128xf32>
    %301 = arith.addf %299, %300 : vector<2x128xf32>
    %302 = math.tanh %301 : vector<2x128xf32>
    %303 = arith.mulf %298, %302 : vector<2x128xf32>
    %c5_i32 = arith.constant 5 : i32
    %304 = arith.index_cast %c5_i32 : i32 to index
    %c0_71 = arith.constant 0 : index
    %c0_72 = arith.constant 0 : index
    %305 = vector.load %arg0[%304, %c0_71, %c0_72] : memref<8x2x512xf32, #tpu.memory_space<vmem>>, vector<1x2x512xf32>
    %306 = vector.shape_cast %305 : vector<1x2x512xf32> to vector<2x512xf32>
    %c0_73 = arith.constant 0 : index
    %c0_74 = arith.constant 0 : index
    %307 = vector.load %arg1[%c0_73, %c0_74] : memref<128x512xf32, #tpu.memory_space<vmem>>, vector<128x512xf32>
    %cst_75 = arith.constant dense<0.000000e+00> : vector<2x512xf32>
    %308 = tpu.matmul %274, %307, %cst_75 {dimension_numbers = #tpu.dot_dimension_numbers<[1], [0], [0], [1], [0, 0, 1, 1], [], []>} : vector<2x128xf32>, vector<128x512xf32>, vector<2x512xf32> -> vector<2x512xf32>
    %309 = arith.addf %306, %308 : vector<2x512xf32>
    %310 = vector.extract_strided_slice %309 {offsets = [0, 0], sizes = [2, 128], strides = [1, 1]} : vector<2x512xf32> to vector<2x128xf32>
    %311 = arith.negf %310 : vector<2x128xf32>
    %312 = math.exp %311 : vector<2x128xf32>
    %cst_76 = arith.constant 1.000000e+00 : f32
    %313 = vector.broadcast %cst_76 : f32 to vector<2x128xf32>
    %314 = arith.addf %313, %312 : vector<2x128xf32>
    %315 = arith.divf %313, %314 : vector<2x128xf32>
    %316 = vector.extract_strided_slice %309 {offsets = [0, 128], sizes = [2, 128], strides = [1, 1]} : vector<2x512xf32> to vector<2x128xf32>
    %317 = arith.negf %316 : vector<2x128xf32>
    %318 = math.exp %317 : vector<2x128xf32>
    %cst_77 = arith.constant 1.000000e+00 : f32
    %319 = vector.broadcast %cst_77 : f32 to vector<2x128xf32>
    %320 = arith.addf %319, %318 : vector<2x128xf32>
    %321 = arith.divf %319, %320 : vector<2x128xf32>
    %322 = vector.extract_strided_slice %309 {offsets = [0, 256], sizes = [2, 128], strides = [1, 1]} : vector<2x512xf32> to vector<2x128xf32>
    %323 = math.tanh %322 : vector<2x128xf32>
    %324 = vector.extract_strided_slice %309 {offsets = [0, 384], sizes = [2, 128], strides = [1, 1]} : vector<2x512xf32> to vector<2x128xf32>
    %325 = arith.negf %324 : vector<2x128xf32>
    %326 = math.exp %325 : vector<2x128xf32>
    %cst_78 = arith.constant 1.000000e+00 : f32
    %327 = vector.broadcast %cst_78 : f32 to vector<2x128xf32>
    %328 = arith.addf %327, %326 : vector<2x128xf32>
    %329 = arith.divf %327, %328 : vector<2x128xf32>
    %330 = arith.mulf %321, %272 : vector<2x128xf32>
    %331 = arith.mulf %315, %323 : vector<2x128xf32>
    %332 = arith.addf %330, %331 : vector<2x128xf32>
    %333 = math.tanh %332 : vector<2x128xf32>
    %334 = arith.mulf %329, %333 : vector<2x128xf32>
    %335 = tpu.concatenate %334, %303 in 1 : vector<2x128xf32>, vector<2x128xf32> -> vector<2x256xf32>
    %c0_79 = arith.constant 0 : index
    %c0_80 = arith.constant 0 : index
    %336 = vector.load %arg2[%c0_79, %c0_80] : memref<256x512xf32, #tpu.memory_space<vmem>>, vector<256x512xf32>
    %cst_81 = arith.constant dense<0.000000e+00> : vector<2x512xf32>
    %337 = tpu.matmul %335, %336, %cst_81 {dimension_numbers = #tpu.dot_dimension_numbers<[1], [0], [0], [1], [0, 0, 1, 1], [], []>} : vector<2x256xf32>, vector<256x512xf32>, vector<2x512xf32> -> vector<2x512xf32>
    %338 = arith.addf %337, %2 : vector<2x512xf32>
    %339 = vector.extract_strided_slice %338 {offsets = [0, 0], sizes = [2, 128], strides = [1, 1]} : vector<2x512xf32> to vector<2x128xf32>
    %340 = arith.negf %339 : vector<2x128xf32>
    %341 = math.exp %340 : vector<2x128xf32>
    %cst_82 = arith.constant 1.000000e+00 : f32
    %342 = vector.broadcast %cst_82 : f32 to vector<2x128xf32>
    %343 = arith.addf %342, %341 : vector<2x128xf32>
    %344 = arith.divf %342, %343 : vector<2x128xf32>
    %345 = vector.extract_strided_slice %338 {offsets = [0, 128], sizes = [2, 128], strides = [1, 1]} : vector<2x512xf32> to vector<2x128xf32>
    %346 = arith.negf %345 : vector<2x128xf32>
    %347 = math.exp %346 : vector<2x128xf32>
    %cst_83 = arith.constant 1.000000e+00 : f32
    %348 = vector.broadcast %cst_83 : f32 to vector<2x128xf32>
    %349 = arith.addf %348, %347 : vector<2x128xf32>
    %350 = arith.divf %348, %349 : vector<2x128xf32>
    %351 = vector.extract_strided_slice %338 {offsets = [0, 256], sizes = [2, 128], strides = [1, 1]} : vector<2x512xf32> to vector<2x128xf32>
    %352 = math.tanh %351 : vector<2x128xf32>
    %353 = vector.extract_strided_slice %338 {offsets = [0, 384], sizes = [2, 128], strides = [1, 1]} : vector<2x512xf32> to vector<2x128xf32>
    %354 = arith.negf %353 : vector<2x128xf32>
    %355 = math.exp %354 : vector<2x128xf32>
    %cst_84 = arith.constant 1.000000e+00 : f32
    %356 = vector.broadcast %cst_84 : f32 to vector<2x128xf32>
    %357 = arith.addf %356, %355 : vector<2x128xf32>
    %358 = arith.divf %356, %357 : vector<2x128xf32>
    %359 = arith.mulf %350, %301 : vector<2x128xf32>
    %360 = arith.mulf %344, %352 : vector<2x128xf32>
    %361 = arith.addf %359, %360 : vector<2x128xf32>
    %362 = math.tanh %361 : vector<2x128xf32>
    %363 = arith.mulf %358, %362 : vector<2x128xf32>
    %c6_i32 = arith.constant 6 : i32
    %364 = arith.index_cast %c6_i32 : i32 to index
    %c0_85 = arith.constant 0 : index
    %c0_86 = arith.constant 0 : index
    %365 = vector.load %arg0[%364, %c0_85, %c0_86] : memref<8x2x512xf32, #tpu.memory_space<vmem>>, vector<1x2x512xf32>
    %366 = vector.shape_cast %365 : vector<1x2x512xf32> to vector<2x512xf32>
    %c0_87 = arith.constant 0 : index
    %c0_88 = arith.constant 0 : index
    %367 = vector.load %arg1[%c0_87, %c0_88] : memref<128x512xf32, #tpu.memory_space<vmem>>, vector<128x512xf32>
    %cst_89 = arith.constant dense<0.000000e+00> : vector<2x512xf32>
    %368 = tpu.matmul %334, %367, %cst_89 {dimension_numbers = #tpu.dot_dimension_numbers<[1], [0], [0], [1], [0, 0, 1, 1], [], []>} : vector<2x128xf32>, vector<128x512xf32>, vector<2x512xf32> -> vector<2x512xf32>
    %369 = arith.addf %366, %368 : vector<2x512xf32>
    %370 = vector.extract_strided_slice %369 {offsets = [0, 0], sizes = [2, 128], strides = [1, 1]} : vector<2x512xf32> to vector<2x128xf32>
    %371 = arith.negf %370 : vector<2x128xf32>
    %372 = math.exp %371 : vector<2x128xf32>
    %cst_90 = arith.constant 1.000000e+00 : f32
    %373 = vector.broadcast %cst_90 : f32 to vector<2x128xf32>
    %374 = arith.addf %373, %372 : vector<2x128xf32>
    %375 = arith.divf %373, %374 : vector<2x128xf32>
    %376 = vector.extract_strided_slice %369 {offsets = [0, 128], sizes = [2, 128], strides = [1, 1]} : vector<2x512xf32> to vector<2x128xf32>
    %377 = arith.negf %376 : vector<2x128xf32>
    %378 = math.exp %377 : vector<2x128xf32>
    %cst_91 = arith.constant 1.000000e+00 : f32
    %379 = vector.broadcast %cst_91 : f32 to vector<2x128xf32>
    %380 = arith.addf %379, %378 : vector<2x128xf32>
    %381 = arith.divf %379, %380 : vector<2x128xf32>
    %382 = vector.extract_strided_slice %369 {offsets = [0, 256], sizes = [2, 128], strides = [1, 1]} : vector<2x512xf32> to vector<2x128xf32>
    %383 = math.tanh %382 : vector<2x128xf32>
    %384 = vector.extract_strided_slice %369 {offsets = [0, 384], sizes = [2, 128], strides = [1, 1]} : vector<2x512xf32> to vector<2x128xf32>
    %385 = arith.negf %384 : vector<2x128xf32>
    %386 = math.exp %385 : vector<2x128xf32>
    %cst_92 = arith.constant 1.000000e+00 : f32
    %387 = vector.broadcast %cst_92 : f32 to vector<2x128xf32>
    %388 = arith.addf %387, %386 : vector<2x128xf32>
    %389 = arith.divf %387, %388 : vector<2x128xf32>
    %390 = arith.mulf %381, %332 : vector<2x128xf32>
    %391 = arith.mulf %375, %383 : vector<2x128xf32>
    %392 = arith.addf %390, %391 : vector<2x128xf32>
    %393 = math.tanh %392 : vector<2x128xf32>
    %394 = arith.mulf %389, %393 : vector<2x128xf32>
    %395 = tpu.concatenate %394, %363 in 1 : vector<2x128xf32>, vector<2x128xf32> -> vector<2x256xf32>
    %c0_93 = arith.constant 0 : index
    %c0_94 = arith.constant 0 : index
    %396 = vector.load %arg2[%c0_93, %c0_94] : memref<256x512xf32, #tpu.memory_space<vmem>>, vector<256x512xf32>
    %cst_95 = arith.constant dense<0.000000e+00> : vector<2x512xf32>
    %397 = tpu.matmul %395, %396, %cst_95 {dimension_numbers = #tpu.dot_dimension_numbers<[1], [0], [0], [1], [0, 0, 1, 1], [], []>} : vector<2x256xf32>, vector<256x512xf32>, vector<2x512xf32> -> vector<2x512xf32>
    %398 = arith.addf %397, %2 : vector<2x512xf32>
    %399 = vector.extract_strided_slice %398 {offsets = [0, 0], sizes = [2, 128], strides = [1, 1]} : vector<2x512xf32> to vector<2x128xf32>
    %400 = arith.negf %399 : vector<2x128xf32>
    %401 = math.exp %400 : vector<2x128xf32>
    %cst_96 = arith.constant 1.000000e+00 : f32
    %402 = vector.broadcast %cst_96 : f32 to vector<2x128xf32>
    %403 = arith.addf %402, %401 : vector<2x128xf32>
    %404 = arith.divf %402, %403 : vector<2x128xf32>
    %405 = vector.extract_strided_slice %398 {offsets = [0, 128], sizes = [2, 128], strides = [1, 1]} : vector<2x512xf32> to vector<2x128xf32>
    %406 = arith.negf %405 : vector<2x128xf32>
    %407 = math.exp %406 : vector<2x128xf32>
    %cst_97 = arith.constant 1.000000e+00 : f32
    %408 = vector.broadcast %cst_97 : f32 to vector<2x128xf32>
    %409 = arith.addf %408, %407 : vector<2x128xf32>
    %410 = arith.divf %408, %409 : vector<2x128xf32>
    %411 = vector.extract_strided_slice %398 {offsets = [0, 256], sizes = [2, 128], strides = [1, 1]} : vector<2x512xf32> to vector<2x128xf32>
    %412 = math.tanh %411 : vector<2x128xf32>
    %413 = vector.extract_strided_slice %398 {offsets = [0, 384], sizes = [2, 128], strides = [1, 1]} : vector<2x512xf32> to vector<2x128xf32>
    %414 = arith.negf %413 : vector<2x128xf32>
    %415 = math.exp %414 : vector<2x128xf32>
    %cst_98 = arith.constant 1.000000e+00 : f32
    %416 = vector.broadcast %cst_98 : f32 to vector<2x128xf32>
    %417 = arith.addf %416, %415 : vector<2x128xf32>
    %418 = arith.divf %416, %417 : vector<2x128xf32>
    %419 = arith.mulf %410, %361 : vector<2x128xf32>
    %420 = arith.mulf %404, %412 : vector<2x128xf32>
    %421 = arith.addf %419, %420 : vector<2x128xf32>
    %422 = math.tanh %421 : vector<2x128xf32>
    %423 = arith.mulf %418, %422 : vector<2x128xf32>
    %c7_i32 = arith.constant 7 : i32
    %424 = arith.index_cast %c7_i32 : i32 to index
    %c0_99 = arith.constant 0 : index
    %c0_100 = arith.constant 0 : index
    %425 = vector.load %arg0[%424, %c0_99, %c0_100] : memref<8x2x512xf32, #tpu.memory_space<vmem>>, vector<1x2x512xf32>
    %426 = vector.shape_cast %425 : vector<1x2x512xf32> to vector<2x512xf32>
    %c0_101 = arith.constant 0 : index
    %c0_102 = arith.constant 0 : index
    %427 = vector.load %arg1[%c0_101, %c0_102] : memref<128x512xf32, #tpu.memory_space<vmem>>, vector<128x512xf32>
    %cst_103 = arith.constant dense<0.000000e+00> : vector<2x512xf32>
    %428 = tpu.matmul %394, %427, %cst_103 {dimension_numbers = #tpu.dot_dimension_numbers<[1], [0], [0], [1], [0, 0, 1, 1], [], []>} : vector<2x128xf32>, vector<128x512xf32>, vector<2x512xf32> -> vector<2x512xf32>
    %429 = arith.addf %426, %428 : vector<2x512xf32>
    %430 = vector.extract_strided_slice %429 {offsets = [0, 0], sizes = [2, 128], strides = [1, 1]} : vector<2x512xf32> to vector<2x128xf32>
    %431 = arith.negf %430 : vector<2x128xf32>
    %432 = math.exp %431 : vector<2x128xf32>
    %cst_104 = arith.constant 1.000000e+00 : f32
    %433 = vector.broadcast %cst_104 : f32 to vector<2x128xf32>
    %434 = arith.addf %433, %432 : vector<2x128xf32>
    %435 = arith.divf %433, %434 : vector<2x128xf32>
    %436 = vector.extract_strided_slice %429 {offsets = [0, 128], sizes = [2, 128], strides = [1, 1]} : vector<2x512xf32> to vector<2x128xf32>
    %437 = arith.negf %436 : vector<2x128xf32>
    %438 = math.exp %437 : vector<2x128xf32>
    %cst_105 = arith.constant 1.000000e+00 : f32
    %439 = vector.broadcast %cst_105 : f32 to vector<2x128xf32>
    %440 = arith.addf %439, %438 : vector<2x128xf32>
    %441 = arith.divf %439, %440 : vector<2x128xf32>
    %442 = vector.extract_strided_slice %429 {offsets = [0, 256], sizes = [2, 128], strides = [1, 1]} : vector<2x512xf32> to vector<2x128xf32>
    %443 = math.tanh %442 : vector<2x128xf32>
    %444 = vector.extract_strided_slice %429 {offsets = [0, 384], sizes = [2, 128], strides = [1, 1]} : vector<2x512xf32> to vector<2x128xf32>
    %445 = arith.negf %444 : vector<2x128xf32>
    %446 = math.exp %445 : vector<2x128xf32>
    %cst_106 = arith.constant 1.000000e+00 : f32
    %447 = vector.broadcast %cst_106 : f32 to vector<2x128xf32>
    %448 = arith.addf %447, %446 : vector<2x128xf32>
    %449 = arith.divf %447, %448 : vector<2x128xf32>
    %450 = arith.mulf %441, %392 : vector<2x128xf32>
    %451 = arith.mulf %435, %443 : vector<2x128xf32>
    %452 = arith.addf %450, %451 : vector<2x128xf32>
    %453 = math.tanh %452 : vector<2x128xf32>
    %454 = arith.mulf %449, %453 : vector<2x128xf32>
    %455 = tpu.concatenate %454, %423 in 1 : vector<2x128xf32>, vector<2x128xf32> -> vector<2x256xf32>
    %c0_107 = arith.constant 0 : index
    %c0_108 = arith.constant 0 : index
    %456 = vector.load %arg2[%c0_107, %c0_108] : memref<256x512xf32, #tpu.memory_space<vmem>>, vector<256x512xf32>
    %cst_109 = arith.constant dense<0.000000e+00> : vector<2x512xf32>
    %457 = tpu.matmul %455, %456, %cst_109 {dimension_numbers = #tpu.dot_dimension_numbers<[1], [0], [0], [1], [0, 0, 1, 1], [], []>} : vector<2x256xf32>, vector<256x512xf32>, vector<2x512xf32> -> vector<2x512xf32>
    %458 = arith.addf %457, %2 : vector<2x512xf32>
    %459 = vector.extract_strided_slice %458 {offsets = [0, 0], sizes = [2, 128], strides = [1, 1]} : vector<2x512xf32> to vector<2x128xf32>
    %460 = arith.negf %459 : vector<2x128xf32>
    %461 = math.exp %460 : vector<2x128xf32>
    %cst_110 = arith.constant 1.000000e+00 : f32
    %462 = vector.broadcast %cst_110 : f32 to vector<2x128xf32>
    %463 = arith.addf %462, %461 : vector<2x128xf32>
    %464 = arith.divf %462, %463 : vector<2x128xf32>
    %465 = vector.extract_strided_slice %458 {offsets = [0, 128], sizes = [2, 128], strides = [1, 1]} : vector<2x512xf32> to vector<2x128xf32>
    %466 = arith.negf %465 : vector<2x128xf32>
    %467 = math.exp %466 : vector<2x128xf32>
    %cst_111 = arith.constant 1.000000e+00 : f32
    %468 = vector.broadcast %cst_111 : f32 to vector<2x128xf32>
    %469 = arith.addf %468, %467 : vector<2x128xf32>
    %470 = arith.divf %468, %469 : vector<2x128xf32>
    %471 = vector.extract_strided_slice %458 {offsets = [0, 256], sizes = [2, 128], strides = [1, 1]} : vector<2x512xf32> to vector<2x128xf32>
    %472 = math.tanh %471 : vector<2x128xf32>
    %473 = vector.extract_strided_slice %458 {offsets = [0, 384], sizes = [2, 128], strides = [1, 1]} : vector<2x512xf32> to vector<2x128xf32>
    %474 = arith.negf %473 : vector<2x128xf32>
    %475 = math.exp %474 : vector<2x128xf32>
    %cst_112 = arith.constant 1.000000e+00 : f32
    %476 = vector.broadcast %cst_112 : f32 to vector<2x128xf32>
    %477 = arith.addf %476, %475 : vector<2x128xf32>
    %478 = arith.divf %476, %477 : vector<2x128xf32>
    %479 = arith.mulf %470, %421 : vector<2x128xf32>
    %480 = arith.mulf %464, %472 : vector<2x128xf32>
    %481 = arith.addf %479, %480 : vector<2x128xf32>
    %482 = math.tanh %481 : vector<2x128xf32>
    %483 = arith.mulf %478, %482 : vector<2x128xf32>
    %c8_i32 = arith.constant 8 : i32
    %c0_113 = arith.constant 0 : index
    %c0_114 = arith.constant 0 : index
    %484 = vector.load %arg4[%c0_113, %c0_114] : memref<1x128xf32, #tpu.memory_space<vmem>>, vector<1x128xf32>
    %485 = vector.broadcast %484 : vector<1x128xf32> to vector<2x128xf32>
    %486 = arith.mulf %483, %485 : vector<2x128xf32>
    %cst_115 = arith.constant dense<0.000000e+00> : vector<2xf32>
    %487 = vector.multi_reduction <add>, %486, %cst_115 [1] : vector<2x128xf32> to vector<2xf32>
    %488 = vector.shape_cast %487 : vector<2xf32> to vector<2x1xf32>
    %c0_116 = arith.constant 0 : index
    %c0_117 = arith.constant 0 : index
    %489 = vector.load %arg5[%c0_116, %c0_117] : memref<1x1xf32, #tpu.memory_space<vmem>>, vector<1x1xf32>
    %490 = vector.broadcast %489 : vector<1x1xf32> to vector<2x1xf32>
    %491 = arith.addf %488, %490 : vector<2x1xf32>
    %c0_118 = arith.constant 0 : index
    %c0_119 = arith.constant 0 : index
    %492 = vector.load %arg6[%c0_118, %c0_119] : memref<2x1xf32, #tpu.memory_space<vmem>>, vector<2x1xf32>
    tpu.vector_store %arg6[%c0_118, %c0_119], %491 {strides = array<i32>} : memref<2x1xf32, #tpu.memory_space<vmem>>, vector<2x1xf32>,
    return
  }
}

</mosaic_0001>

<bundles_post_ra>
// kernel: tpu_custom_call.1
= control target key start
LH: loop header
LB: loop body
LE: loop exit
PB: predicated region body
PF: predicated region fallthrough
CT: control target
= control target key end

     0   :  { %s6339_s0 = inlined_call_operand.hbm [shape: f32[8,2,512], index: 0, kind: input, shape index: {}]   ;;  %s6340_s1 = inlined_call_operand.hbm [shape: f32[128,512], index: 1, kind: input, shape index: {}]   ;;  %s6341_s2 = inlined_call_operand.hbm [shape: f32[256,512], index: 2, kind: input, shape index: {}]   ;;  %s6342_s3 = inlined_call_operand.vmem [shape: f32[1,512], index: 3, kind: input, shape index: {}]   ;;  %s6343_s4 = inlined_call_operand.vmem [shape: f32[1,128], index: 4, kind: input, shape index: {}]   ;;  %s6344_s5 = inlined_call_operand.<no memory space> [shape: f32[1,1], index: 5, kind: input, shape index: {}]   ;;  %s6345_s6 = inlined_call_operand.vmem [shape: f32[2,1], index: 6, kind: output, shape index: {}]  }
   0x1   :  { %v11_v0 = vstv %s6344_s5 }
   0x2   :  { %12 = vst [vmem:[#allocation2] sm:$0x1] %v11_v0 }
   0x3   :  { %13 = vsyncpa [#allocation4], 0 }
   0x4   :  { %14 = vsyncpa [#allocation6], 0  ;;  %s5140_s23 = smov [#allocation5]   ;;  %s5070_s27 = scalar_lea.hbm %s6340_s1, 8192 }
   0x5   :  { %s32_s24 = sshll.u32 %s5140_s23, 4  ;;  %p5071_p0 = scmp.ne.s32.totalorder %s6340_s1, %s5070_s27  ;;  %s33_s24 = int_to_ptr.vmem [resolvable:$true] %s32_s24 }
   0x6   :  { %p5074_p1 = scmp.lt.u32.totalorder %s5070_s27, %s6340_s1 }
   0x8   :  { %p5076_p2 = pnand %p5074_p1, %p5071_p0 }
   0xa   :  { %5079 = shalt.err (!%p5076_p2)
}
   0xb   :  { %s5080_s5 = scalar_lea.vmem %s33_s24, 8192  ;;  %p5085_p4 = scmp.lt.s32.totalorder %s33_s24, %s33_s24 }
   0xc   :  { %p5081_p3 = scmp.ne.s32.totalorder %s33_s24, %s5080_s5  ;;  %p5086_p5 = scmp.lt.s32.totalorder %s5080_s5, %s5080_s5 }
   0xe   :  { %p5087_p6 = por %p5086_p5, %p5085_p4 }
  0x10   :  { %p5088_p7 = pnand %p5087_p6, %p5081_p3 }
  0x12   :  { %5091 = shalt.err (!%p5088_p7)
}
  0x13   :  { %s5141_s8 = smov 512   ;;  %s5142_s9 = smov 32  }
  0x14   :  { %38 = dma.hbm_to_vmem [thread:$0]  %s6340_s1, 8192, %s33_s24, [#allocation6], %s5141_s8, %s5141_s8, %s5142_s9  }
  0x15   :  { %s5143_s12 = smov [#allocation3]   ;;  %s5092_s16 = scalar_lea.hbm %s6339_s0, 1024 }
  0x16   :  { %s20_s13 = sshll.u32 %s5143_s12, 4  ;;  %p5093_p8 = scmp.ne.s32.totalorder %s6339_s0, %s5092_s16  ;;  %s21_s13 = int_to_ptr.vmem [resolvable:$true] %s20_s13 }
  0x17   :  { %p5096_p9 = scmp.lt.u32.totalorder %s5092_s16, %s6339_s0 }
  0x19   :  { %p5098_p10 = pnand %p5096_p9, %p5093_p8 }
  0x1b   :  { %5101 = shalt.err (!%p5098_p10)
}
  0x1c   :  { %s5102_s21 = scalar_lea.vmem %s21_s13, 1024  ;;  %p5107_p12 = scmp.lt.s32.totalorder %s21_s13, %s21_s13 }
  0x1d   :  { %p5103_p11 = scmp.ne.s32.totalorder %s21_s13, %s5102_s21  ;;  %p5108_p13 = scmp.lt.s32.totalorder %s5102_s21, %s5102_s21 }
  0x1f   :  { %p5109_p0 = por %p5108_p13, %p5107_p12 }
  0x21   :  { %p5110_p1 = pnand %p5109_p0, %p5103_p11 }
  0x23   :  { %5113 = shalt.err (!%p5110_p1)
}
  0x24   :  { %s5144_s1 = smov 128   ;;  %s5145_s22 = smov 8  }
  0x25   :  { %26 = dma.hbm_to_vmem [thread:$0]  %s6339_s0, 1024, %s21_s13, [#allocation4], %s5144_s1, %s5144_s1, %s5145_s22  }
  0x26   :  { %s5146_s25 = smov [#allocation7]   ;;  %s5114_s29 = scalar_lea.hbm %s6341_s2, 16384 }
  0x27   :  { %s44_s26 = sshll.u32 %s5146_s25, 4  ;;  %p5115_p2 = scmp.ne.s32.totalorder %s6341_s2, %s5114_s29  ;;  %s45_s26 = int_to_ptr.vmem [resolvable:$true] %s44_s26 }
  0x28   :  { %p5118_p3 = scmp.lt.u32.totalorder %s5114_s29, %s6341_s2 }
  0x2a   :  { %p5120_p4 = pnand %p5118_p3, %p5115_p2 }
  0x2c   :  { %5123 = shalt.err (!%p5120_p4)
}
  0x2d   :  { %s5124_s11 = scalar_lea.vmem %s45_s26, 16384  ;;  %p5129_p6 = scmp.lt.s32.totalorder %s45_s26, %s45_s26 }
  0x2e   :  { %p5125_p5 = scmp.ne.s32.totalorder %s45_s26, %s5124_s11  ;;  %p5130_p7 = scmp.lt.s32.totalorder %s5124_s11, %s5124_s11 }
  0x30   :  { %p5131_p8 = por %p5130_p7, %p5129_p6 }
  0x32   :  { %p5132_p9 = pnand %p5131_p8, %p5125_p5 }
  0x34   :  { %5135 = shalt.err (!%p5132_p9)
}
  0x35   :  { %50 = dma.hbm_to_vmem [thread:$0]  %s6341_s2, 16384, %s45_s26, [#allocation6], %s5141_s8, %s5141_s8, %s5142_s9  }
  0x36   :  { %5136 = dma.done.wait [#allocation4], 1024  }
  0x37   :  { %5137 = vsyncadd [#allocation4], 4294966272 }
  0x38   :  { %5138 = dma.done.wait [#allocation6], 24576  }
  0x39   :  { %5139 = vsyncadd [#allocation6], 4294942720  ;;  %v6346_v1 = vmov 0.0   ;;  %v90_v2 = vld [vmem:[#allocation5 + $0x8] sm:$0xff]  ;;  %v92_v4 = vld [vmem:[#allocation5 + $0x18] sm:$0xff]  ;;  %vm3199_vm0 = vcmask 1041408  }
  0x3a   :  { %217 = vmatprep.mubr.f32.mxu0 %v6346_v1  ;;  %288 = vmatprep.mubr.f32.mxu1 %v6346_v1  ;;  %v94_v3 = vld [vmem:[#allocation5 + $0x28] sm:$0xff]  ;;  %v96_v6 = vld [vmem:[#allocation5 + $0x38] sm:$0xff]  ;;  %v89_v7 = vld [vmem:[#allocation5] sm:$0xff]  ;;  %vm3211_vm1 = vcmask 1024  }
  0x3b   :  { %v5231_v5 = vpack.c.bf16 %v94_v3, %v90_v2  ;;  %v93_v8 = vld [vmem:[#allocation5 + $0x20] sm:$0xff]  ;;  %v5233_v9 = vpack.c.bf16 %v96_v6, %v92_v4  ;;  %v91_v11 = vld [vmem:[#allocation5 + $0x10] sm:$0xff]  ;;  %v98_v13 = vld [vmem:[#allocation5 + $0x48] sm:$0xff] }
  0x3c   :  { %v5235_v10 = vpack.c.bf16 %v93_v8, %v89_v7  ;;  %v95_v12 = vld [vmem:[#allocation5 + $0x30] sm:$0xff]  ;;  %v102_v15 = vld [vmem:[#allocation5 + $0x68] sm:$0xff]  ;;  %v100_v16 = vld [vmem:[#allocation5 + $0x58] sm:$0xff] }
  0x3d   :  { %6470 = vst [vmem:[#allocation10_spill] sm:$0xff] %v5231_v5  ;;  %6471 = vst [vmem:[#allocation11_spill] sm:$0xff] %v5233_v9  ;;  %3270 = vmatprep.subr.bf16.mxu0 %v5231_v5  ;;  %v5238_v14 = vpack.c.bf16 %v95_v12, %v91_v11  ;;  %v104_v17 = vld [vmem:[#allocation5 + $0x78] sm:$0xff]  ;;  %3302 = vmatprep.subr.bf16.mxu1 %v5233_v9  ;;  %v5242_v18 = vpack.c.bf16 %v102_v15, %v98_v13  ;;  %v97_v20 = vld [vmem:[#allocation5 + $0x40] sm:$0xff] }
  0x3e   :  { %3272 = vmatpush1.bf16.msra.mxu0 %v5235_v10  ;;  %v5244_v19 = vpack.c.bf16 %v104_v17, %v100_v16  ;;  %v101_v21 = vld [vmem:[#allocation5 + $0x60] sm:$0xff]  ;;  %v99_v22 = vld [vmem:[#allocation5 + $0x50] sm:$0xff]  ;;  %v106_v25 = vld [vmem:[#allocation5 + $0x88] sm:$0xff] }
  0x3f   :  { %3304 = vmatpush1.bf16.msra.mxu1 %v5238_v14  ;;  %v5247_v23 = vpack.c.bf16 %v101_v21, %v97_v20  ;;  %v103_v24 = vld [vmem:[#allocation5 + $0x70] sm:$0xff]  ;;  %v110_v26 = vld [vmem:[#allocation5 + $0xa8] sm:$0xff]  ;;  %3274 = vmatprep.subr.bf16.mxu0 %v5242_v18  ;;  %v108_v29 = vld [vmem:[#allocation5 + $0x98] sm:$0xff] }
  0x40   :  { %3306 = vmatprep.subr.bf16.mxu1 %v5244_v19  ;;  %v5251_v27 = vpack.c.bf16 %v103_v24, %v99_v22  ;;  %v5253_v28 = vpack.c.bf16 %v110_v26, %v106_v25  ;;  %v112_v30 = vld [vmem:[#allocation5 + $0xb8] sm:$0xff]  ;;  %v105_v31 = vld [vmem:[#allocation5 + $0x80] sm:$0xff]  ;;  %v107_v34 = vld [vmem:[#allocation5 + $0x90] sm:$0xff] }
  0x41   :  { %v5255_v32 = vpack.c.bf16 %v112_v30, %v108_v29  ;;  %v109_v33 = vld [vmem:[#allocation5 + $0xa0] sm:$0xff]  ;;  %v111_v35 = vld [vmem:[#allocation5 + $0xb0] sm:$0xff]  ;;  %v114_v37 = vld [vmem:[#allocation5 + $0xc8] sm:$0xff] }
  0x42   :  { %3276 = vmatpush1.bf16.msra.mxu0 %v5247_v23  ;;  %v5258_v36 = vpack.c.bf16 %v109_v33, %v105_v31  ;;  %v118_v38 = vld [vmem:[#allocation5 + $0xe8] sm:$0xff]  ;;  %v116_v39 = vld [vmem:[#allocation5 + $0xd8] sm:$0xff]  ;;  %v5262_v40 = vpack.c.bf16 %v111_v35, %v107_v34  ;;  %v113_v43 = vld [vmem:[#allocation5 + $0xc0] sm:$0xff] }
  0x43   :  { %3308 = vmatpush1.bf16.msra.mxu1 %v5251_v27  ;;  %3278 = vmatprep.subr.bf16.mxu0 %v5253_v28  ;;  %v5264_v41 = vpack.c.bf16 %v118_v38, %v114_v37  ;;  %v120_v42 = vld [vmem:[#allocation5 + $0xf8] sm:$0xff]  ;;  %v117_v44 = vld [vmem:[#allocation5 + $0xe0] sm:$0xff]  ;;  %v115_v46 = vld [vmem:[#allocation5 + $0xd0] sm:$0xff] }
  0x44   :  { %3310 = vmatprep.subr.bf16.mxu1 %v5255_v32  ;;  %v5267_v45 = vpack.c.bf16 %v120_v42, %v116_v39  ;;  %v119_v47 = vld [vmem:[#allocation5 + $0xf0] sm:$0xff]  ;;  %v122_v48 = vld [vmem:[#allocation5 + $0x108] sm:$0xff]  ;;  %v124_v50 = vld [vmem:[#allocation5 + $0x118] sm:$0xff]  ;;  %v5270_v52 = vpack.c.bf16 %v117_v44, %v113_v43 }
  0x45   :  { %v126_v49 = vld [vmem:[#allocation5 + $0x128] sm:$0xff]  ;;  %v128_v51 = vld [vmem:[#allocation5 + $0x138] sm:$0xff]  ;;  %v5274_v53 = vpack.c.bf16 %v119_v47, %v115_v46  ;;  %v121_v55 = vld [vmem:[#allocation5 + $0x100] sm:$0xff] }
  0x46   :  { %3280 = vmatpush1.bf16.msra.mxu0 %v5258_v36  ;;  %v5276_v54 = vpack.c.bf16 %v126_v49, %v122_v48  ;;  %v125_v56 = vld [vmem:[#allocation5 + $0x120] sm:$0xff]  ;;  %v123_v57 = vld [vmem:[#allocation5 + $0x110] sm:$0xff]  ;;  %v5279_v58 = vpack.c.bf16 %v128_v51, %v124_v50  ;;  %v130_v60 = vld [vmem:[#allocation5 + $0x148] sm:$0xff] }
  0x47   :  { %3312 = vmatpush1.bf16.msra.mxu1 %v5262_v40  ;;  %3282 = vmatprep.subr.bf16.mxu0 %v5264_v41  ;;  %v127_v59 = vld [vmem:[#allocation5 + $0x130] sm:$0xff]  ;;  %v134_v61 = vld [vmem:[#allocation5 + $0x168] sm:$0xff]  ;;  %v132_v62 = vld [vmem:[#allocation5 + $0x158] sm:$0xff]  ;;  %v5282_v0 = vpack.c.bf16 %v125_v56, %v121_v55 }
  0x48   :  { %3314 = vmatprep.subr.bf16.mxu1 %v5267_v45  ;;  %v136_v63 = vld [vmem:[#allocation5 + $0x178] sm:$0xff]  ;;  %v5286_v2 = vpack.c.bf16 %v127_v59, %v123_v57  ;;  %v5288_v3 = vpack.c.bf16 %v134_v61, %v130_v60  ;;  %v129_v4 = vld [vmem:[#allocation5 + $0x140] sm:$0xff]  ;;  %v131_v7 = vld [vmem:[#allocation5 + $0x150] sm:$0xff] }
  0x49   :  { %v133_v6 = vld [vmem:[#allocation5 + $0x160] sm:$0xff]  ;;  %v5291_v8 = vpack.c.bf16 %v136_v63, %v132_v62  ;;  %v135_v11 = vld [vmem:[#allocation5 + $0x170] sm:$0xff]  ;;  %v138_v12 = vld [vmem:[#allocation5 + $0x188] sm:$0xff] }
  0x4a   :  { %3284 = vmatpush1.bf16.msra.mxu0 %v5270_v52  ;;  %v142_v13 = vld [vmem:[#allocation5 + $0x1a8] sm:$0xff]  ;;  %v140_v15 = vld [vmem:[#allocation5 + $0x198] sm:$0xff]  ;;  %v5294_v17 = vpack.c.bf16 %v133_v6, %v129_v4  ;;  %v5298_v20 = vpack.c.bf16 %v135_v11, %v131_v7  ;;  %v137_v22 = vld [vmem:[#allocation5 + $0x180] sm:$0xff] }
  0x4b   :  { %3316 = vmatpush1.bf16.msra.mxu1 %v5274_v53  ;;  %3286 = vmatprep.subr.bf16.mxu0 %v5276_v54  ;;  %v144_v16 = vld [vmem:[#allocation5 + $0x1b8] sm:$0xff]  ;;  %v5300_v21 = vpack.c.bf16 %v142_v13, %v138_v12  ;;  %v141_v24 = vld [vmem:[#allocation5 + $0x1a0] sm:$0xff]  ;;  %v139_v25 = vld [vmem:[#allocation5 + $0x190] sm:$0xff] }
  0x4c   :  { %3318 = vmatprep.subr.bf16.mxu1 %v5279_v58  ;;  %v5303_v26 = vpack.c.bf16 %v144_v16, %v140_v15  ;;  %v143_v29 = vld [vmem:[#allocation5 + $0x1b0] sm:$0xff]  ;;  %v146_v30 = vld [vmem:[#allocation5 + $0x1c8] sm:$0xff]  ;;  %v148_v33 = vld [vmem:[#allocation5 + $0x1d8] sm:$0xff]  ;;  %v5306_v35 = vpack.c.bf16 %v141_v24, %v137_v22 }
  0x4d   :  { %v150_v31 = vld [vmem:[#allocation5 + $0x1e8] sm:$0xff]  ;;  %v152_v34 = vld [vmem:[#allocation5 + $0x1f8] sm:$0xff]  ;;  %v5310_v37 = vpack.c.bf16 %v143_v29, %v139_v25  ;;  %v145_v39 = vld [vmem:[#allocation5 + $0x1c0] sm:$0xff] }
  0x4e   :  { %3288 = vmatpush1.bf16.msra.mxu0 %v5282_v0  ;;  %v5312_v38 = vpack.c.bf16 %v150_v31, %v146_v30  ;;  %v149_v42 = vld [vmem:[#allocation5 + $0x1e0] sm:$0xff]  ;;  %v147_v43 = vld [vmem:[#allocation5 + $0x1d0] sm:$0xff]  ;;  %v5315_v44 = vpack.c.bf16 %v152_v34, %v148_v33  ;;  %v350_v47 = vld [vmem:[#allocation7 + $0x8] sm:$0xff] }
  0x4f   :  { %3320 = vmatpush1.bf16.msra.mxu1 %v5286_v2  ;;  %3290 = vmatprep.subr.bf16.mxu0 %v5288_v3  ;;  %v151_v46 = vld [vmem:[#allocation5 + $0x1f0] sm:$0xff]  ;;  %v354_v48 = vld [vmem:[#allocation7 + $0x28] sm:$0xff]  ;;  %v352_v49 = vld [vmem:[#allocation7 + $0x18] sm:$0xff]  ;;  %v5318_v51 = vpack.c.bf16 %v149_v42, %v145_v39 }
  0x50   :  { %3322 = vmatprep.subr.bf16.mxu1 %v5291_v8  ;;  %v356_v50 = vld [vmem:[#allocation7 + $0x38] sm:$0xff]  ;;  %v5322_v55 = vpack.c.bf16 %v151_v46, %v147_v43  ;;  %v5324_v56 = vpack.c.bf16 %v354_v48, %v350_v47  ;;  %v349_v57 = vld [vmem:[#allocation7] sm:$0xff]  ;;  %v351_v60 = vld [vmem:[#allocation7 + $0x10] sm:$0xff] }
  0x51   :  { %v353_v59 = vld [vmem:[#allocation7 + $0x20] sm:$0xff]  ;;  %v5327_v61 = vpack.c.bf16 %v356_v50, %v352_v49  ;;  %v355_v62 = vld [vmem:[#allocation7 + $0x30] sm:$0xff]  ;;  %v358_v63 = vld [vmem:[#allocation7 + $0x48] sm:$0xff] }
  0x52   :  { %3292 = vmatpush1.bf16.msra.mxu0 %v5294_v17  ;;  %v362_v4 = vld [vmem:[#allocation7 + $0x68] sm:$0xff]  ;;  %v360_v6 = vld [vmem:[#allocation7 + $0x58] sm:$0xff]  ;;  %v5330_v11 = vpack.c.bf16 %v353_v59, %v349_v57  ;;  %v5334_v12 = vpack.c.bf16 %v355_v62, %v351_v60  ;;  %v357_v15 = vld [vmem:[#allocation7 + $0x40] sm:$0xff] }
  0x53   :  { %3324 = vmatpush1.bf16.msra.mxu1 %v5298_v20  ;;  %3294 = vmatprep.subr.bf16.mxu0 %v5300_v21  ;;  %v364_v7 = vld [vmem:[#allocation7 + $0x78] sm:$0xff]  ;;  %v5336_v13 = vpack.c.bf16 %v362_v4, %v358_v63  ;;  %v361_v16 = vld [vmem:[#allocation7 + $0x60] sm:$0xff]  ;;  %v359_v22 = vld [vmem:[#allocation7 + $0x50] sm:$0xff] }
  0x54   :  { %3326 = vmatprep.subr.bf16.mxu1 %v5303_v26  ;;  %v5339_v24 = vpack.c.bf16 %v364_v7, %v360_v6  ;;  %v363_v25 = vld [vmem:[#allocation7 + $0x70] sm:$0xff]  ;;  %v366_v29 = vld [vmem:[#allocation7 + $0x88] sm:$0xff]  ;;  %v368_v31 = vld [vmem:[#allocation7 + $0x98] sm:$0xff]  ;;  %v5344_v34 = vpack.c.bf16 %v361_v16, %v357_v15 }
  0x55   :  { %v370_v30 = vld [vmem:[#allocation7 + $0xa8] sm:$0xff]  ;;  %v372_v33 = vld [vmem:[#allocation7 + $0xb8] sm:$0xff]  ;;  %v5348_v39 = vpack.c.bf16 %v363_v25, %v359_v22  ;;  %v365_v43 = vld [vmem:[#allocation7 + $0x80] sm:$0xff] }
  0x56   :  { %3296 = vmatpush1.bf16.msra.mxu0 %v5306_v35  ;;  %v5350_v42 = vpack.c.bf16 %v370_v30, %v366_v29  ;;  %v369_v46 = vld [vmem:[#allocation7 + $0xa0] sm:$0xff]  ;;  %v5353_v47 = vpack.c.bf16 %v372_v33, %v368_v31  ;;  %v367_v48 = vld [vmem:[#allocation7 + $0x90] sm:$0xff]  ;;  %v374_v59 = vld [vmem:[#allocation7 + $0xc8] sm:$0xff] }
  0x57   :  { %3328 = vmatpush1.bf16.msra.mxu1 %v5310_v37  ;;  %3298 = vmatprep.subr.bf16.mxu0 %v5312_v38  ;;  %v371_v49 = vld [vmem:[#allocation7 + $0xb0] sm:$0xff]  ;;  %v5358_v50 = vpack.c.bf16 %v369_v46, %v365_v43  ;;  %v378_v60 = vld [vmem:[#allocation7 + $0xe8] sm:$0xff]  ;;  %v376_v62 = vld [vmem:[#allocation7 + $0xd8] sm:$0xff] }
  0x58   :  { %3330 = vmatprep.subr.bf16.mxu1 %v5315_v44  ;;  %v5362_v57 = vpack.c.bf16 %v371_v49, %v367_v48  ;;  %v5367_v63 = vpack.c.bf16 %v378_v60, %v374_v59  ;;  %v380_v4 = vld [vmem:[#allocation7 + $0xf8] sm:$0xff]  ;;  %v373_v6 = vld [vmem:[#allocation7 + $0xc0] sm:$0xff]  ;;  %v375_v22 = vld [vmem:[#allocation7 + $0xd0] sm:$0xff] }
  0x59   :  { %v377_v7 = vld [vmem:[#allocation7 + $0xe0] sm:$0xff]  ;;  %v5369_v15 = vpack.c.bf16 %v380_v4, %v376_v62  ;;  %v379_v25 = vld [vmem:[#allocation7 + $0xf0] sm:$0xff]  ;;  %v382_v30 = vld [vmem:[#allocation7 + $0x108] sm:$0xff] }
  0x5a   :  { %3300 = vmatpush1.bf16.msra.mxu0 %v5318_v51  ;;  %6472 = vst [vmem:[#allocation12_spill] sm:$0xff] %v5362_v57  ;;  %6473 = vst [vmem:[#allocation13_spill] sm:$0xff] %v5367_v63  ;;  %v5371_v16 = vpack.c.bf16 %v377_v7, %v373_v6  ;;  %v5374_v29 = vpack.c.bf16 %v379_v25, %v375_v22  ;;  %v386_v31 = vld [vmem:[#allocation7 + $0x128] sm:$0xff]  ;;  %v384_v33 = vld [vmem:[#allocation7 + $0x118] sm:$0xff] }
  0x5b   :  { %3332 = vmatpush1.bf16.msra.mxu1 %v5322_v55  ;;  %3334 = vmatprep.subr.bf16.mxu0 %v5324_v56  ;;  %6474 = vst [vmem:[#allocation14_spill] sm:$0xff] %v5369_v15  ;;  %v5379_v43 = vpack.c.bf16 %v386_v31, %v382_v30  ;;  %v388_v46 = vld [vmem:[#allocation7 + $0x138] sm:$0xff]  ;;  %v381_v48 = vld [vmem:[#allocation7 + $0x100] sm:$0xff]  ;;  %v383_v62 = vld [vmem:[#allocation7 + $0x110] sm:$0xff] }
  0x5c   :  { %3398 = vmatprep.subr.bf16.mxu1 %v5327_v61  ;;  %6475 = vst [vmem:[#allocation15_spill] sm:$0xff] %v5371_v16  ;;  %6476 = vst [vmem:[#allocation16_spill] sm:$0xff] %v5374_v29  ;;  %v385_v49 = vld [vmem:[#allocation7 + $0x120] sm:$0xff]  ;;  %v5381_v59 = vpack.c.bf16 %v388_v46, %v384_v33  ;;  %v387_v4 = vld [vmem:[#allocation7 + $0x130] sm:$0xff] }
  0x5d   :  { %218 = vmatmul.mubr.f32.vlgmr.msra.gmra.mrb[0].mxu0 %v6346_v1  ;;  %6477 = vst [vmem:[#allocation17_spill] sm:$0xff] %v5379_v43  ;;  %v5383_v60 = vpack.c.bf16 %v385_v49, %v381_v48  ;;  %v5386_v6 = vpack.c.bf16 %v387_v4, %v383_v62  ;;  %v390_v7 = vld [vmem:[#allocation7 + $0x148] sm:$0xff]  ;;  %v392_v25 = vld [vmem:[#allocation7 + $0x158] sm:$0xff]  ;;  %v389_v33 = vld [vmem:[#allocation7 + $0x140] sm:$0xff] }
  0x5e   :  { %289 = vmatmul.mubr.f32.vlgmr.msra.gmra.mrb[0].mxu1 %v6346_v1  ;;  %3336 = vmatpush1.bf16.msra.mxu0 %v5330_v11  ;;  %6478 = vst [vmem:[#allocation18_spill] sm:$0xff] %v5381_v59  ;;  %v394_v22 = vld [vmem:[#allocation7 + $0x168] sm:$0xff]  ;;  %v396_v31 = vld [vmem:[#allocation7 + $0x178] sm:$0xff]  ;;  %v393_v46 = vld [vmem:[#allocation7 + $0x160] sm:$0xff] }
  0x5f   :  { %3400 = vmatpush1.bf16.msra.mxu1 %v5334_v12  ;;  %3338 = vmatprep.subr.bf16.mxu0 %v5336_v13  ;;  %6479 = vst [vmem:[#allocation19_spill] sm:$0xff] %v5383_v60  ;;  %6480 = vst [vmem:[#allocation20_spill] sm:$0xff] %v5386_v6  ;;  %v5391_v30 = vpack.c.bf16 %v394_v22, %v390_v7  ;;  %v5393_v48 = vpack.c.bf16 %v396_v31, %v392_v25  ;;  %v391_v62 = vld [vmem:[#allocation7 + $0x150] sm:$0xff]  ;;  %v402_v7 = vld [vmem:[#allocation7 + $0x1a8] sm:$0xff] }
  0x60   :  { %3402 = vmatprep.subr.bf16.mxu1 %v5339_v24  ;;  %541 = vmatprep.mubr.f32.mxu0 %v6346_v1  ;;  %v5395_v49 = vpack.c.bf16 %v393_v46, %v389_v33  ;;  %v395_v4 = vld [vmem:[#allocation7 + $0x170] sm:$0xff]  ;;  %v400_v22 = vld [vmem:[#allocation7 + $0x198] sm:$0xff]  ;;  %v397_v31 = vld [vmem:[#allocation7 + $0x180] sm:$0xff] }
  0x61   :  { %612 = vmatprep.mubr.f32.mxu1 %v6346_v1  ;;  %6481 = vst [vmem:[#allocation21_spill] sm:$0xff] %v5391_v30  ;;  %6482 = vst [vmem:[#allocation22_spill] sm:$0xff] %v5393_v48  ;;  %v5398_v1 = vpack.c.bf16 %v395_v4, %v391_v62  ;;  %v404_v25 = vld [vmem:[#allocation7 + $0x1b8] sm:$0xff]  ;;  %v401_v33 = vld [vmem:[#allocation7 + $0x1a0] sm:$0xff] }
  0x62   :  { %3340 = vmatpush1.bf16.msra.mxu0 %v5344_v34  ;;  %6483 = vst [vmem:[#allocation23_spill] sm:$0xff] %v5395_v49  ;;  %v5405_v46 = vpack.c.bf16 %v404_v25, %v400_v22  ;;  %v399_v62 = vld [vmem:[#allocation7 + $0x190] sm:$0xff]  ;;  %v412_v22 = vld [vmem:[#allocation7 + $0x1f8] sm:$0xff]  ;;  %v405_v25 = vld [vmem:[#allocation7 + $0x1c0] sm:$0xff] }
  0x63   :  { %3404 = vmatpush1.bf16.msra.mxu1 %v5348_v39  ;;  %3342 = vmatprep.subr.bf16.mxu0 %v5350_v42  ;;  %6484 = vst [vmem:[#allocation24_spill] sm:$0xff] %v5398_v1  ;;  %v403_v4 = vld [vmem:[#allocation7 + $0x1b0] sm:$0xff] }
  0x64   :  { %3406 = vmatprep.subr.bf16.mxu1 %v5353_v47  ;;  %6486 = vst [vmem:[#allocation26_spill] sm:$0xff] %v5405_v46 }
  0x66   :  { %3344 = vmatpush1.bf16.msra.mxu0 %v5358_v50 }
  0x67   :  { %3408 = vmatpush1.bf16.msra.mxu1 %v5362_v57  ;;  %3346 = vmatprep.subr.bf16.mxu0 %v5367_v63 }
  0x68   :  { %3410 = vmatprep.subr.bf16.mxu1 %v5369_v15  ;;  %v472_v15 = vld [vmem:[#allocation7 + $0x3d8] sm:$0xff] }
  0x6a   :  { %3348 = vmatpush1.bf16.msra.mxu0 %v5371_v16  ;;  %v470_v16 = vld [vmem:[#allocation7 + $0x3c8] sm:$0xff] }
  0x6b   :  { %3412 = vmatpush1.bf16.msra.mxu1 %v5374_v29  ;;  %3350 = vmatprep.subr.bf16.mxu0 %v5379_v43  ;;  %v456_v43 = vld [vmem:[#allocation7 + $0x358] sm:$0xff] }
  0x6c   :  { %3414 = vmatprep.subr.bf16.mxu1 %v5381_v59  ;;  %v5407_v59 = vpack.c.bf16 %v401_v33, %v397_v31  ;;  %v409_v31 = vld [vmem:[#allocation7 + $0x1e0] sm:$0xff]  ;;  %v460_v29 = vld [vmem:[#allocation7 + $0x378] sm:$0xff] }
  0x6e   :  { %3352 = vmatpush1.bf16.msra.mxu0 %v5383_v60  ;;  %6487 = vst [vmem:[#allocation27_spill] sm:$0xff] %v5407_v59 }
  0x6f   :  { %3416 = vmatpush1.bf16.msra.mxu1 %v5386_v6  ;;  %3354 = vmatprep.subr.bf16.mxu0 %v5391_v30  ;;  %v398_v6 = vld [vmem:[#allocation7 + $0x188] sm:$0xff]  ;;  %v5419_v30 = vpack.c.bf16 %v409_v31, %v405_v25  ;;  %v417_v25 = vld [vmem:[#allocation7 + $0x220] sm:$0xff] }
  0x70   :  { %3418 = vmatprep.subr.bf16.mxu1 %v5393_v48  ;;  %v5403_v60 = vpack.c.bf16 %v402_v7, %v398_v6  ;;  %v5410_v48 = vpack.c.bf16 %v403_v4, %v399_v62  ;;  %v410_v6 = vld [vmem:[#allocation7 + $0x1e8] sm:$0xff]  ;;  %v408_v7 = vld [vmem:[#allocation7 + $0x1d8] sm:$0xff]  ;;  %v407_v62 = vld [vmem:[#allocation7 + $0x1d0] sm:$0xff] }
  0x71   :  { %v5417_v33 = vpack.c.bf16 %v412_v22, %v408_v7  ;;  %6491 = vst [vmem:[#allocation31_spill] sm:$0xff] %v5419_v30  ;;  %v411_v4 = vld [vmem:[#allocation7 + $0x1f0] sm:$0xff]  ;;  %v420_v7 = vld [vmem:[#allocation7 + $0x238] sm:$0xff]  ;;  %v413_v22 = vld [vmem:[#allocation7 + $0x200] sm:$0xff] }
  0x72   :  { %3356 = vmatpush1.bf16.msra.mxu0 %v5395_v49  ;;  %6485 = vst [vmem:[#allocation25_spill] sm:$0xff] %v5403_v60  ;;  %6488 = vst [vmem:[#allocation28_spill] sm:$0xff] %v5410_v48 }
  0x73   :  { %3420 = vmatpush1.bf16.msra.mxu1 %v5398_v1  ;;  %3358 = vmatprep.subr.bf16.mxu0 %v5403_v60  ;;  %v406_v1 = vld [vmem:[#allocation7 + $0x1c8] sm:$0xff]  ;;  %6490 = vst [vmem:[#allocation30_spill] sm:$0xff] %v5417_v33  ;;  %v5431_v60 = vpack.c.bf16 %v417_v25, %v413_v22  ;;  %v425_v22 = vld [vmem:[#allocation7 + $0x260] sm:$0xff] }
  0x74   :  { %3422 = vmatprep.subr.bf16.mxu1 %v5405_v46  ;;  %v5415_v49 = vpack.c.bf16 %v410_v6, %v406_v1  ;;  %v5422_v46 = vpack.c.bf16 %v411_v4, %v407_v62  ;;  %v418_v1 = vld [vmem:[#allocation7 + $0x228] sm:$0xff]  ;;  %v416_v6 = vld [vmem:[#allocation7 + $0x218] sm:$0xff]  ;;  %v415_v62 = vld [vmem:[#allocation7 + $0x210] sm:$0xff] }
  0x75   :  { %v5429_v31 = vpack.c.bf16 %v420_v7, %v416_v6  ;;  %6495 = vst [vmem:[#allocation35_spill] sm:$0xff] %v5431_v60  ;;  %v419_v4 = vld [vmem:[#allocation7 + $0x230] sm:$0xff]  ;;  %v428_v6 = vld [vmem:[#allocation7 + $0x278] sm:$0xff]  ;;  %v421_v7 = vld [vmem:[#allocation7 + $0x240] sm:$0xff] }
  0x76   :  { %3360 = vmatpush1.bf16.msra.mxu0 %v5407_v59  ;;  %6489 = vst [vmem:[#allocation29_spill] sm:$0xff] %v5415_v49  ;;  %6492 = vst [vmem:[#allocation32_spill] sm:$0xff] %v5422_v46 }
  0x77   :  { %3424 = vmatpush1.bf16.msra.mxu1 %v5410_v48  ;;  %3362 = vmatprep.subr.bf16.mxu0 %v5415_v49  ;;  %v414_v48 = vld [vmem:[#allocation7 + $0x208] sm:$0xff]  ;;  %6494 = vst [vmem:[#allocation34_spill] sm:$0xff] %v5429_v31  ;;  %v5443_v49 = vpack.c.bf16 %v425_v22, %v421_v7  ;;  %v433_v7 = vld [vmem:[#allocation7 + $0x2a0] sm:$0xff] }
  0x78   :  { %3426 = vmatprep.subr.bf16.mxu1 %v5417_v33  ;;  %v5427_v59 = vpack.c.bf16 %v418_v1, %v414_v48  ;;  %v5434_v33 = vpack.c.bf16 %v419_v4, %v415_v62  ;;  %v426_v48 = vld [vmem:[#allocation7 + $0x268] sm:$0xff]  ;;  %v424_v1 = vld [vmem:[#allocation7 + $0x258] sm:$0xff]  ;;  %v423_v62 = vld [vmem:[#allocation7 + $0x250] sm:$0xff] }
  0x79   :  { %v5441_v25 = vpack.c.bf16 %v428_v6, %v424_v1  ;;  %6499 = vst [vmem:[#allocation39_spill] sm:$0xff] %v5443_v49  ;;  %v427_v4 = vld [vmem:[#allocation7 + $0x270] sm:$0xff]  ;;  %v436_v1 = vld [vmem:[#allocation7 + $0x2b8] sm:$0xff]  ;;  %v429_v6 = vld [vmem:[#allocation7 + $0x280] sm:$0xff] }
  0x7a   :  { %3364 = vmatpush1.bf16.msra.mxu0 %v5419_v30  ;;  %6493 = vst [vmem:[#allocation33_spill] sm:$0xff] %v5427_v59  ;;  %6496 = vst [vmem:[#allocation36_spill] sm:$0xff] %v5434_v33 }
  0x7b   :  { %3428 = vmatpush1.bf16.msra.mxu1 %v5422_v46  ;;  %3366 = vmatprep.subr.bf16.mxu0 %v5427_v59  ;;  %v422_v46 = vld [vmem:[#allocation7 + $0x248] sm:$0xff]  ;;  %6498 = vst [vmem:[#allocation38_spill] sm:$0xff] %v5441_v25  ;;  %v5455_v59 = vpack.c.bf16 %v433_v7, %v429_v6  ;;  %v441_v6 = vld [vmem:[#allocation7 + $0x2e0] sm:$0xff] }
  0x7c   :  { %3430 = vmatprep.subr.bf16.mxu1 %v5429_v31  ;;  %v5439_v30 = vpack.c.bf16 %v426_v48, %v422_v46  ;;  %v5446_v31 = vpack.c.bf16 %v427_v4, %v423_v62  ;;  %v434_v46 = vld [vmem:[#allocation7 + $0x2a8] sm:$0xff]  ;;  %v432_v48 = vld [vmem:[#allocation7 + $0x298] sm:$0xff]  ;;  %v431_v62 = vld [vmem:[#allocation7 + $0x290] sm:$0xff] }
  0x7d   :  { %v5453_v22 = vpack.c.bf16 %v436_v1, %v432_v48  ;;  %6503 = vst [vmem:[#allocation43_spill] sm:$0xff] %v5455_v59  ;;  %v435_v4 = vld [vmem:[#allocation7 + $0x2b0] sm:$0xff]  ;;  %v444_v48 = vld [vmem:[#allocation7 + $0x2f8] sm:$0xff]  ;;  %v437_v1 = vld [vmem:[#allocation7 + $0x2c0] sm:$0xff] }
  0x7e   :  { %3368 = vmatpush1.bf16.msra.mxu0 %v5431_v60  ;;  %6497 = vst [vmem:[#allocation37_spill] sm:$0xff] %v5439_v30  ;;  %6500 = vst [vmem:[#allocation40_spill] sm:$0xff] %v5446_v31 }
  0x7f   :  { %3432 = vmatpush1.bf16.msra.mxu1 %v5434_v33  ;;  %3370 = vmatprep.subr.bf16.mxu0 %v5439_v30  ;;  %v430_v33 = vld [vmem:[#allocation7 + $0x288] sm:$0xff]  ;;  %6502 = vst [vmem:[#allocation42_spill] sm:$0xff] %v5453_v22  ;;  %v5467_v30 = vpack.c.bf16 %v441_v6, %v437_v1  ;;  %v449_v1 = vld [vmem:[#allocation7 + $0x320] sm:$0xff] }
  0x80   :  { %3434 = vmatprep.subr.bf16.mxu1 %v5441_v25  ;;  %v5451_v60 = vpack.c.bf16 %v434_v46, %v430_v33  ;;  %v5458_v25 = vpack.c.bf16 %v435_v4, %v431_v62  ;;  %v442_v33 = vld [vmem:[#allocation7 + $0x2e8] sm:$0xff]  ;;  %v440_v46 = vld [vmem:[#allocation7 + $0x2d8] sm:$0xff]  ;;  %v439_v62 = vld [vmem:[#allocation7 + $0x2d0] sm:$0xff] }
  0x81   :  { %v5465_v7 = vpack.c.bf16 %v444_v48, %v440_v46  ;;  %6507 = vst [vmem:[#allocation47_spill] sm:$0xff] %v5467_v30  ;;  %v443_v4 = vld [vmem:[#allocation7 + $0x2f0] sm:$0xff]  ;;  %v452_v46 = vld [vmem:[#allocation7 + $0x338] sm:$0xff]  ;;  %v445_v48 = vld [vmem:[#allocation7 + $0x300] sm:$0xff] }
  0x82   :  { %3372 = vmatpush1.bf16.msra.mxu0 %v5443_v49  ;;  %6501 = vst [vmem:[#allocation41_spill] sm:$0xff] %v5451_v60  ;;  %6504 = vst [vmem:[#allocation44_spill] sm:$0xff] %v5458_v25 }
  0x83   :  { %3436 = vmatpush1.bf16.msra.mxu1 %v5446_v31  ;;  %3374 = vmatprep.subr.bf16.mxu0 %v5451_v60  ;;  %v438_v31 = vld [vmem:[#allocation7 + $0x2c8] sm:$0xff]  ;;  %6506 = vst [vmem:[#allocation46_spill] sm:$0xff] %v5465_v7  ;;  %v5479_v60 = vpack.c.bf16 %v449_v1, %v445_v48  ;;  %v455_v48 = vld [vmem:[#allocation7 + $0x350] sm:$0xff] }
  0x84   :  { %3438 = vmatprep.subr.bf16.mxu1 %v5453_v22  ;;  %v5463_v49 = vpack.c.bf16 %v442_v33, %v438_v31  ;;  %v5470_v22 = vpack.c.bf16 %v443_v4, %v439_v62  ;;  %v450_v31 = vld [vmem:[#allocation7 + $0x328] sm:$0xff]  ;;  %v448_v33 = vld [vmem:[#allocation7 + $0x318] sm:$0xff]  ;;  %v447_v62 = vld [vmem:[#allocation7 + $0x310] sm:$0xff] }
  0x85   :  { %v5477_v6 = vpack.c.bf16 %v452_v46, %v448_v33  ;;  %6511 = vst [vmem:[#allocation51_spill] sm:$0xff] %v5479_v60  ;;  %v451_v4 = vld [vmem:[#allocation7 + $0x330] sm:$0xff]  ;;  %v453_v33 = vld [vmem:[#allocation7 + $0x340] sm:$0xff] }
  0x86   :  { %3376 = vmatpush1.bf16.msra.mxu0 %v5455_v59  ;;  %6505 = vst [vmem:[#allocation45_spill] sm:$0xff] %v5463_v49  ;;  %6508 = vst [vmem:[#allocation48_spill] sm:$0xff] %v5470_v22  ;;  %v457_v46 = vld [vmem:[#allocation7 + $0x360] sm:$0xff] }
  0x87   :  { %3440 = vmatpush1.bf16.msra.mxu1 %v5458_v25  ;;  %3378 = vmatprep.subr.bf16.mxu0 %v5463_v49  ;;  %v446_v25 = vld [vmem:[#allocation7 + $0x308] sm:$0xff]  ;;  %6510 = vst [vmem:[#allocation50_spill] sm:$0xff] %v5477_v6  ;;  %v5491_v1 = vpack.c.bf16 %v457_v46, %v453_v33  ;;  %v467_v33 = vld [vmem:[#allocation7 + $0x3b0] sm:$0xff] }
  0x88   :  { %3442 = vmatprep.subr.bf16.mxu1 %v5465_v7  ;;  %v5475_v59 = vpack.c.bf16 %v450_v31, %v446_v25  ;;  %v454_v49 = vld [vmem:[#allocation7 + $0x348] sm:$0xff]  ;;  %v5488_v31 = vpack.c.bf16 %v460_v29, %v456_v43  ;;  %v464_v29 = vld [vmem:[#allocation7 + $0x398] sm:$0xff] }
  0x89   :  { %v458_v7 = vld [vmem:[#allocation7 + $0x368] sm:$0xff]  ;;  %6515 = vst [vmem:[#allocation55_spill] sm:$0xff] %v5491_v1  ;;  %v468_v43 = vld [vmem:[#allocation7 + $0x3b8] sm:$0xff] }
  0x8a   :  { %3380 = vmatpush1.bf16.msra.mxu0 %v5467_v30  ;;  %6509 = vst [vmem:[#allocation49_spill] sm:$0xff] %v5475_v59  ;;  %v5482_v30 = vpack.c.bf16 %v451_v4, %v447_v62  ;;  %v5486_v25 = vpack.c.bf16 %v458_v7, %v454_v49  ;;  %6514 = vst [vmem:[#allocation54_spill] sm:$0xff] %v5488_v31  ;;  %v459_v62 = vld [vmem:[#allocation7 + $0x370] sm:$0xff]  ;;  %v462_v4 = vld [vmem:[#allocation7 + $0x388] sm:$0xff] }
  0x8b   :  { %3444 = vmatpush1.bf16.msra.mxu1 %v5470_v22  ;;  %3382 = vmatprep.subr.bf16.mxu0 %v5475_v59  ;;  %v466_v59 = vld [vmem:[#allocation7 + $0x3a8] sm:$0xff]  ;;  %v461_v7 = vld [vmem:[#allocation7 + $0x380] sm:$0xff] }
  0x8c   :  { %6512 = vst [vmem:[#allocation52_spill] sm:$0xff] %v5482_v30  ;;  %3446 = vmatprep.subr.bf16.mxu1 %v5477_v6  ;;  %6513 = vst [vmem:[#allocation53_spill] sm:$0xff] %v5486_v25  ;;  %v5495_v6 = vpack.c.bf16 %v459_v62, %v455_v48  ;;  %v5497_v49 = vpack.c.bf16 %v466_v59, %v462_v4  ;;  %v465_v22 = vld [vmem:[#allocation7 + $0x3a0] sm:$0xff]  ;;  %v476_v62 = vld [vmem:[#allocation7 + $0x3f8] sm:$0xff] }
  0x8d   :  { %v5502_v46 = vpack.c.bf16 %v465_v22, %v461_v7  ;;  %v469_v4 = vld [vmem:[#allocation7 + $0x3c0] sm:$0xff]  ;;  %v471_v22 = vld [vmem:[#allocation7 + $0x3d0] sm:$0xff] }
  0x8e   :  { %3384 = vmatpush1.bf16.msra.mxu0 %v5479_v60  ;;  %6516 = vst [vmem:[#allocation56_spill] sm:$0xff] %v5495_v6  ;;  %6517 = vst [vmem:[#allocation57_spill] sm:$0xff] %v5497_v49  ;;  %v5499_v60 = vpack.c.bf16 %v468_v43, %v464_v29  ;;  %v473_v29 = vld [vmem:[#allocation7 + $0x3e0] sm:$0xff]  ;;  %v5511_v43 = vpack.c.bf16 %v476_v62, %v472_v15  ;;  %v475_v7 = vld [vmem:[#allocation7 + $0x3f0] sm:$0xff]  ;;  %v68_v15 = vlaneseq }
  0x8f   :  { %3448 = vmatpush1.bf16.msra.mxu1 %v5482_v30  ;;  %3386 = vmatprep.subr.bf16.mxu0 %v5486_v25  ;;  %v463_v30 = vld [vmem:[#allocation7 + $0x390] sm:$0xff]  ;;  %6519 = vst [vmem:[#allocation59_spill] sm:$0xff] %v5502_v46  ;;  %v474_v25 = vld [vmem:[#allocation7 + $0x3e8] sm:$0xff] }
  0x90   :  { %3450 = vmatprep.subr.bf16.mxu1 %v5488_v31  ;;  %6518 = vst [vmem:[#allocation58_spill] sm:$0xff] %v5499_v60  ;;  %v5506_v59 = vpack.c.bf16 %v467_v33, %v463_v30  ;;  %v5508_v48 = vpack.c.bf16 %v474_v25, %v470_v16  ;;  %6522 = vst [vmem:[#allocation62_spill] sm:$0xff] %v5511_v43  ;;  %v5518_v30 = vpack.c.bf16 %v475_v7, %v471_v22  ;;  %v5148_v16 = vmov 1983009808  }
  0x91   :  { %v302_v25 = vunpack.c.l.s4 %v5148_v16  ;;  %v5525_v33 = vshrl.u32 %v68_v15, 7 }
  0x92   :  { %3388 = vmatpush1.bf16.msra.mxu0 %v5491_v1  ;;  %6520 = vst [vmem:[#allocation60_spill] sm:$0xff] %v5506_v59  ;;  %6521 = vst [vmem:[#allocation61_spill] sm:$0xff] %v5508_v48  ;;  %v5514_v1 = vpack.c.bf16 %v473_v29, %v469_v4 }
  0x93   :  { %3452 = vmatpush1.bf16.msra.mxu1 %v5495_v6  ;;  %3390 = vmatprep.subr.bf16.mxu0 %v5497_v49  ;;  %6524 = vst [vmem:[#allocation64_spill] sm:$0xff] %v5518_v30  ;;  %6525 = vst [vmem:[#allocation65_spill] sm:$0xff] %v5525_v33  ;;  %v303_v62 = vunpack.c.0.s8 %v302_v25 }
  0x94   :  { %3454 = vmatprep.subr.bf16.mxu1 %v5499_v60  ;;  %6523 = vst [vmem:[#allocation63_spill] sm:$0xff] %v5514_v1 }
  0x95   :  { %v5528_v29 = vsub.s32 %v303_v62, %v5525_v33 }
  0x96   :  { %3392 = vmatpush1.bf16.msra.mxu0 %v5502_v46 }
  0x97   :  { %3456 = vmatpush1.bf16.msra.mxu1 %v5506_v59  ;;  %3394 = vmatprep.subr.bf16.mxu0 %v5508_v48 }
  0x98   :  { %3458 = vmatprep.subr.bf16.mxu1 %v5511_v43 }
  0x9a   :  { %3396 = vmatpush1.bf16.msra.mxu0 %v5514_v1 }
  0x9b   :  { %3460 = vmatpush1.bf16.msra.mxu1 %v5518_v30  ;;  %3462 = vmatprep.subr.bf16.mxu0 %v5231_v5 }
  0x9c   :  { %3494 = vmatprep.subr.bf16.mxu1 %v5233_v9  ;;  %v88_v9 = vld [vmem:[#allocation3] sm:$0xff] }
 0x130   :  { %v219_v4 = vpop.f32.mrb[0].mxu0 }
 0x131   :  { %v290_v22 = vpop.f32.mrb[0].mxu1  ;;  %v221_v7 = vpop.f32.mrb[1].mxu0 }
 0x132   :  { %v299_v43 = vcombine.low %v219_v4, %v221_v7  ;;  %v292_v1 = vpop.f32.mrb[1].mxu1 }
 0x133   :  { %v300_v48 = vcombine.low %v290_v22, %v292_v1 }
 0x134   :  { %v307_v30 = vrot.slane %v299_v43, %v5528_v29 }
 0x135   :  { %v314_v5 = vrot.slane %v300_v48, %v5528_v29 }
 0x137   :  { %v315_v59 = vcombine.low %v307_v30, %v314_v5 }
 0x139   :  { %v317_v46 = vadd.f32 %v315_v59, %v88_v9 }
 0x13b   :  { %v3219_v16 = vmul.f32 -1.442695, %v317_v46  ;;  %v325_v15 = vrot.slane %v317_v46, 2  ;;  %v336_v60 = vrot.slane %v317_v46, 6  ;;  %v333_v49 = vrot.slane %v317_v46, 4 }
 0x13d   :  { %4814 = vpow2.f32 %v3219_v16  ;;  %v3220_v25 = vmul.f32 -1.442695, %v325_v15  ;;  %v3221_v62 = vmul.f32 -1.442695, %v336_v60  ;;  %v6528_v16 = vld [vmem:[#allocation15_spill] sm:$0xff]  ;;  %v6529_v15 = vld [vmem:[#allocation16_spill] sm:$0xff] }
 0x13f   :  { %4816 = vpow2.f32 %v3220_v25  ;;  %v6530_v25 = vld [vmem:[#allocation17_spill] sm:$0xff] }
 0x140   :  { %4818 = vpow2.f32 %v3221_v62  ;;  %v6531_v62 = vld [vmem:[#allocation18_spill] sm:$0xff] }
 0x147   :  { %v4815_v33 = vpop.eup %4814 }
 0x148   :  { %v321_v6 = vadd.f32 1.0, %v4815_v33 }
 0x149   :  { %v4817_v4 = vpop.eup %4816 }
 0x14a   :  { %4820 = vrcp.f32 %v321_v6  ;;  %v330_v1 = vadd.f32 1.0, %v4817_v4  ;;  %v4819_v48 = vpop.eup %4818  ;;  %v6526_v6 = vmov 0.0   ;;  %v6532_v4 = vld [vmem:[#allocation19_spill] sm:$0xff] }
 0x14b   :  { %4822 = vtanh.f32 %v333_v49  ;;  %v341_v59 = vadd.f32 1.0, %v4819_v48  ;;  %v6527_v49 = vld [vmem:[#allocation14_spill] sm:$0xff]  ;;  %v6534_v48 = vld [vmem:[#allocation21_spill] sm:$0xff] }
 0x14c   :  { %4824 = vrcp.f32 %v330_v1  ;;  %v6533_v1 = vld [vmem:[#allocation20_spill] sm:$0xff] }
 0x14d   :  { %4826 = vrcp.f32 %v341_v59  ;;  %v6538_v59 = vld [vmem:[#allocation25_spill] sm:$0xff] }
 0x154   :  { %v4821_v43 = vpop.eup %4820 }
 0x155   :  { %v4823_v5 = vpop.eup %4822 }
 0x156   :  { %v4825_v9 = vpop.eup %4824  ;;  %v345_v22 = vmul.f32 %v4823_v5, %v4821_v43  ;;  %v6535_v43 = vld [vmem:[#allocation22_spill] sm:$0xff]  ;;  %v6536_v5 = vld [vmem:[#allocation23_spill] sm:$0xff] }
 0x157   :  { %v344_v30 = vmul.f32 0.0, %v4825_v9  ;;  %v4827_v60 = vpop.eup %4826  ;;  %v6537_v9 = vld [vmem:[#allocation24_spill] sm:$0xff] }
 0x159   :  { %v5532_v7 = vadd.f32 %v345_v22, %v344_v30  ;;  %v6539_v30 = vld [vmem:[#allocation26_spill] sm:$0xff]  ;;  %v6540_v22 = vld [vmem:[#allocation27_spill] sm:$0xff] }
 0x15b   :  { %4828 = vtanh.f32 %v5532_v7 }
 0x165   :  { %v4829_v46 = vpop.eup %4828 }
 0x166   :  { %v348_v33 = vmul.f32 %v4829_v46, %v4827_v60  ;;  %v6541_v60 = vld [vmem:[#allocation28_spill] sm:$0xff]  ;;  %v6542_v46 = vld [vmem:[#allocation29_spill] sm:$0xff] }
 0x168   :  { %542 = vmatmul.mubr.f32.vlgmr.msra.gmra.mrb[2].mxu0 %v348_v33  ;;  %613 = vmatmul.mubr.f32.vlgmr.msra.gmra.mrb[2].mxu1 %v348_v33 }
 0x169   :  { %3464 = vmatpush1.bf16.msra.mxu0 %v5235_v10  ;;  %3496 = vmatpush1.bf16.msra.mxu1 %v5238_v14 }
 0x16a   :  { %3466 = vmatprep.subr.bf16.mxu0 %v5242_v18  ;;  %3498 = vmatprep.subr.bf16.mxu1 %v5244_v19 }
 0x16b   :  { %709 = vmatprep.mubr.f32.mxu0 %v6526_v6  ;;  %780 = vmatprep.mubr.f32.mxu1 %v6526_v6 }
 0x16d   :  { %3468 = vmatpush1.bf16.msra.mxu0 %v5247_v23  ;;  %3500 = vmatpush1.bf16.msra.mxu1 %v5251_v27 }
 0x16e   :  { %3470 = vmatprep.subr.bf16.mxu0 %v5253_v28  ;;  %3502 = vmatprep.subr.bf16.mxu1 %v5255_v32 }
 0x171   :  { %3472 = vmatpush1.bf16.msra.mxu0 %v5258_v36  ;;  %3504 = vmatpush1.bf16.msra.mxu1 %v5262_v40 }
 0x172   :  { %3474 = vmatprep.subr.bf16.mxu0 %v5264_v41  ;;  %3506 = vmatprep.subr.bf16.mxu1 %v5267_v45 }
 0x175   :  { %3476 = vmatpush1.bf16.msra.mxu0 %v5270_v52  ;;  %3508 = vmatpush1.bf16.msra.mxu1 %v5274_v53 }
 0x176   :  { %3478 = vmatprep.subr.bf16.mxu0 %v5276_v54  ;;  %3510 = vmatprep.subr.bf16.mxu1 %v5279_v58 }
 0x179   :  { %3480 = vmatpush1.bf16.msra.mxu0 %v5282_v0  ;;  %3512 = vmatpush1.bf16.msra.mxu1 %v5286_v2 }
 0x17a   :  { %3482 = vmatprep.subr.bf16.mxu0 %v5288_v3  ;;  %3514 = vmatprep.subr.bf16.mxu1 %v5291_v8 }
 0x17d   :  { %3484 = vmatpush1.bf16.msra.mxu0 %v5294_v17  ;;  %3516 = vmatpush1.bf16.msra.mxu1 %v5298_v20 }
 0x17e   :  { %3486 = vmatprep.subr.bf16.mxu0 %v5300_v21  ;;  %3518 = vmatprep.subr.bf16.mxu1 %v5303_v26 }
 0x181   :  { %3488 = vmatpush1.bf16.msra.mxu0 %v5306_v35  ;;  %3520 = vmatpush1.bf16.msra.mxu1 %v5310_v37 }
 0x182   :  { %3490 = vmatprep.subr.bf16.mxu0 %v5312_v38  ;;  %3522 = vmatprep.subr.bf16.mxu1 %v5315_v44 }
 0x185   :  { %3492 = vmatpush1.bf16.msra.mxu0 %v5318_v51  ;;  %3524 = vmatpush1.bf16.msra.mxu1 %v5322_v55 }
 0x186   :  { %3526 = vmatprep.subr.bf16.mxu0 %v5324_v56  ;;  %3590 = vmatprep.subr.bf16.mxu1 %v5327_v61 }
 0x188   :  { %710 = vmatmul.mubr.f32.vlgmr.msra.gmra.mrb[4].mxu0 %v348_v33  ;;  %781 = vmatmul.mubr.f32.vlgmr.msra.gmra.mrb[4].mxu1 %v348_v33  ;;  %v6543_v33 = vld [vmem:[#allocation30_spill] sm:$0xff] }
 0x189   :  { %3528 = vmatpush1.bf16.msra.mxu0 %v5330_v11  ;;  %3592 = vmatpush1.bf16.msra.mxu1 %v5334_v12 }
 0x18a   :  { %3530 = vmatprep.subr.bf16.mxu0 %v5336_v13  ;;  %3594 = vmatprep.subr.bf16.mxu1 %v5339_v24 }
 0x18d   :  { %3532 = vmatpush1.bf16.msra.mxu0 %v5344_v34  ;;  %3596 = vmatpush1.bf16.msra.mxu1 %v5348_v39 }
 0x18e   :  { %3534 = vmatprep.subr.bf16.mxu0 %v5350_v42  ;;  %3598 = vmatprep.subr.bf16.mxu1 %v5353_v47 }
 0x191   :  { %3536 = vmatpush1.bf16.msra.mxu0 %v5358_v50  ;;  %3600 = vmatpush1.bf16.msra.mxu1 %v5362_v57 }
 0x192   :  { %3538 = vmatprep.subr.bf16.mxu0 %v5367_v63  ;;  %3602 = vmatprep.subr.bf16.mxu1 %v6527_v49 }
 0x195   :  { %3540 = vmatpush1.bf16.msra.mxu0 %v6528_v16  ;;  %3604 = vmatpush1.bf16.msra.mxu1 %v6529_v15 }
 0x196   :  { %3542 = vmatprep.subr.bf16.mxu0 %v6530_v25  ;;  %3606 = vmatprep.subr.bf16.mxu1 %v6531_v62 }
 0x199   :  { %3544 = vmatpush1.bf16.msra.mxu0 %v6532_v4  ;;  %3608 = vmatpush1.bf16.msra.mxu1 %v6533_v1  ;;  %v6544_v1 = vld [vmem:[#allocation31_spill] sm:$0xff] }
 0x19a   :  { %3546 = vmatprep.subr.bf16.mxu0 %v6534_v48  ;;  %3610 = vmatprep.subr.bf16.mxu1 %v6535_v43  ;;  %v6545_v48 = vld [vmem:[#allocation32_spill] sm:$0xff]  ;;  %v6546_v43 = vld [vmem:[#allocation33_spill] sm:$0xff] }
 0x19d   :  { %3548 = vmatpush1.bf16.msra.mxu0 %v6536_v5  ;;  %3612 = vmatpush1.bf16.msra.mxu1 %v6537_v9  ;;  %v6547_v5 = vld [vmem:[#allocation34_spill] sm:$0xff]  ;;  %v6548_v9 = vld [vmem:[#allocation35_spill] sm:$0xff] }
 0x19e   :  { %3550 = vmatprep.subr.bf16.mxu0 %v6538_v59  ;;  %3614 = vmatprep.subr.bf16.mxu1 %v6539_v30  ;;  %v6549_v59 = vld [vmem:[#allocation36_spill] sm:$0xff]  ;;  %v6550_v30 = vld [vmem:[#allocation37_spill] sm:$0xff] }
 0x1a1   :  { %3552 = vmatpush1.bf16.msra.mxu0 %v6540_v22  ;;  %3616 = vmatpush1.bf16.msra.mxu1 %v6541_v60  ;;  %v6551_v22 = vld [vmem:[#allocation38_spill] sm:$0xff]  ;;  %v6552_v60 = vld [vmem:[#allocation39_spill] sm:$0xff] }
 0x1a2   :  { %3554 = vmatprep.subr.bf16.mxu0 %v6542_v46  ;;  %3618 = vmatprep.subr.bf16.mxu1 %v6543_v33  ;;  %v6553_v46 = vld [vmem:[#allocation40_spill] sm:$0xff]  ;;  %v6554_v33 = vld [vmem:[#allocation41_spill] sm:$0xff] }
 0x1a5   :  { %3556 = vmatpush1.bf16.msra.mxu0 %v6544_v1  ;;  %3620 = vmatpush1.bf16.msra.mxu1 %v6545_v48  ;;  %v6555_v1 = vld [vmem:[#allocation42_spill] sm:$0xff]  ;;  %v6556_v48 = vld [vmem:[#allocation43_spill] sm:$0xff] }
 0x1a6   :  { %3558 = vmatprep.subr.bf16.mxu0 %v6546_v43  ;;  %3622 = vmatprep.subr.bf16.mxu1 %v6547_v5  ;;  %v6557_v43 = vld [vmem:[#allocation44_spill] sm:$0xff]  ;;  %v6558_v5 = vld [vmem:[#allocation45_spill] sm:$0xff] }
 0x1a9   :  { %3560 = vmatpush1.bf16.msra.mxu0 %v6548_v9  ;;  %3624 = vmatpush1.bf16.msra.mxu1 %v6549_v59  ;;  %v6559_v9 = vld [vmem:[#allocation46_spill] sm:$0xff]  ;;  %v6560_v59 = vld [vmem:[#allocation47_spill] sm:$0xff] }
 0x1aa   :  { %3562 = vmatprep.subr.bf16.mxu0 %v6550_v30  ;;  %3626 = vmatprep.subr.bf16.mxu1 %v6551_v22  ;;  %v6561_v30 = vld [vmem:[#allocation48_spill] sm:$0xff]  ;;  %v6562_v22 = vld [vmem:[#allocation49_spill] sm:$0xff] }
 0x1ad   :  { %3564 = vmatpush1.bf16.msra.mxu0 %v6552_v60  ;;  %3628 = vmatpush1.bf16.msra.mxu1 %v6553_v46  ;;  %v6563_v60 = vld [vmem:[#allocation50_spill] sm:$0xff]  ;;  %v6564_v46 = vld [vmem:[#allocation51_spill] sm:$0xff] }
 0x1ae   :  { %3566 = vmatprep.subr.bf16.mxu0 %v6554_v33  ;;  %3630 = vmatprep.subr.bf16.mxu1 %v6555_v1  ;;  %v6565_v33 = vld [vmem:[#allocation52_spill] sm:$0xff]  ;;  %v6566_v1 = vld [vmem:[#allocation53_spill] sm:$0xff] }
 0x1b1   :  { %3568 = vmatpush1.bf16.msra.mxu0 %v6556_v48  ;;  %3632 = vmatpush1.bf16.msra.mxu1 %v6557_v43  ;;  %v6567_v43 = vld [vmem:[#allocation55_spill] sm:$0xff] }
 0x1b2   :  { %3570 = vmatprep.subr.bf16.mxu0 %v6558_v5  ;;  %3634 = vmatprep.subr.bf16.mxu1 %v6559_v9  ;;  %v6568_v5 = vld [vmem:[#allocation56_spill] sm:$0xff]  ;;  %v6569_v9 = vld [vmem:[#allocation57_spill] sm:$0xff] }
 0x1b5   :  { %3572 = vmatpush1.bf16.msra.mxu0 %v6560_v59  ;;  %3636 = vmatpush1.bf16.msra.mxu1 %v6561_v30  ;;  %v6570_v59 = vld [vmem:[#allocation58_spill] sm:$0xff]  ;;  %v6571_v30 = vld [vmem:[#allocation59_spill] sm:$0xff] }
 0x1b6   :  { %3574 = vmatprep.subr.bf16.mxu0 %v6562_v22  ;;  %3638 = vmatprep.subr.bf16.mxu1 %v6563_v60  ;;  %v6572_v22 = vld [vmem:[#allocation60_spill] sm:$0xff]  ;;  %v6573_v60 = vld [vmem:[#allocation61_spill] sm:$0xff] }
 0x1b9   :  { %3576 = vmatpush1.bf16.msra.mxu0 %v6564_v46  ;;  %3640 = vmatpush1.bf16.msra.mxu1 %v6565_v33  ;;  %v6574_v46 = vld [vmem:[#allocation62_spill] sm:$0xff]  ;;  %v6575_v33 = vld [vmem:[#allocation63_spill] sm:$0xff] }
 0x1ba   :  { %3578 = vmatprep.subr.bf16.mxu0 %v6566_v1  ;;  %3642 = vmatprep.subr.bf16.mxu1 %v5488_v31  ;;  %v6576_v1 = vld [vmem:[#allocation64_spill] sm:$0xff]  ;;  %v6577_v31 = vld [vmem:[#allocation10_spill] sm:$0xff] }
 0x1bd   :  { %3580 = vmatpush1.bf16.msra.mxu0 %v6567_v43  ;;  %3644 = vmatpush1.bf16.msra.mxu1 %v6568_v5  ;;  %v6578_v43 = vld [vmem:[#allocation11_spill] sm:$0xff]  ;;  %v6579_v5 = vld [vmem:[#allocation65_spill] sm:$0xff] }
 0x1be   :  { %3582 = vmatprep.subr.bf16.mxu0 %v6569_v9  ;;  %3646 = vmatprep.subr.bf16.mxu1 %v6570_v59  ;;  %v70_v9 = vsub.s32 0, %v6579_v5 }
 0x1c1   :  { %3584 = vmatpush1.bf16.msra.mxu0 %v6571_v30  ;;  %3648 = vmatpush1.bf16.msra.mxu1 %v6572_v22  ;;  %v66_v30 = vld [vmem:[%s6342_s3] sm:$0xf]  ;;  %v74_v22 = vsub.s32 1, %v6579_v5 }
 0x1c2   :  { %3586 = vmatprep.subr.bf16.mxu0 %v6573_v60  ;;  %3650 = vmatprep.subr.bf16.mxu1 %v6574_v46  ;;  %v5638_v59 = vrot.slane %v66_v30, %v70_v9  ;;  %v78_v9 = vsub.s32 2, %v6579_v5 }
 0x1c3   :  { %v5640_v60 = vrot.slane %v66_v30, %v74_v22 }
 0x1c4   :  { %6580 = vst [vmem:[#allocation65_spill] sm:$0xff] %v5638_v59  ;;  %v5649_v16 = vrot.slane %v66_v30, %v78_v9 }
 0x1c5   :  { %3588 = vmatpush1.bf16.msra.mxu0 %v6575_v33  ;;  %3652 = vmatpush1.bf16.msra.mxu1 %v6576_v1  ;;  %6581 = vst [vmem:[#allocation66_spill] sm:$0xff] %v5640_v60  ;;  %v82_v1 = vsub.s32 3, %v6579_v5 }
 0x1c6   :  { %3654 = vmatprep.subr.bf16.mxu0 %v6577_v31  ;;  %3686 = vmatprep.subr.bf16.mxu1 %v6578_v43  ;;  %6583 = vst [vmem:[#allocation68_spill] sm:$0xff] %v5649_v16 }
 0x1c7   :  { %v5645_v15 = vrot.slane %v66_v30, %v82_v1 }
 0x1c9   :  { %6582 = vst [vmem:[#allocation67_spill] sm:$0xff] %v5645_v15 }
 0x23b   :  { %v543_v46 = vpop.f32.mrb[2].mxu0  ;;  %v614_v33 = vpop.f32.mrb[2].mxu1 }
 0x23c   :  { %v544_v31 = vadd.f32 %v543_v46, %v5638_v59  ;;  %v545_v48 = vpop.f32.mrb[3].mxu0  ;;  %v616_v43 = vpop.f32.mrb[3].mxu1  ;;  %v615_v63 = vadd.f32 %v614_v33, %v5649_v16 }
 0x23d   :  { %v546_v4 = vadd.f32 %v545_v48, %v5640_v60  ;;  %v617_v22 = vadd.f32 %v616_v43, %v5645_v15 }
 0x23e   :  { %v3222_v62 = vmul.f32 -1.442695, %v544_v31 }
 0x23f   :  { %v3223_v25 = vmul.f32 -1.442695, %v546_v4  ;;  %v3224_v49 = vmul.f32 -1.442695, %v617_v22 }
 0x240   :  { %4830 = vpow2.f32 %v3222_v62 }
 0x241   :  { %4832 = vpow2.f32 %v3223_v25 }
 0x242   :  { %4834 = vpow2.f32 %v3224_v49 }
 0x243   :  { %4836 = vtanh.f32 %v615_v63 }
 0x24a   :  { %v4831_v46 = vpop.eup %4830 }
 0x24b   :  { %v4833_v59 = vpop.eup %4832  ;;  %v622_v57 = vadd.f32 1.0, %v4831_v46  ;;  %v644_v46 = vld [vmem:[#allocation3 + $0x8] sm:$0xff] }
 0x24c   :  { %v628_v31 = vadd.f32 1.0, %v4833_v59  ;;  %v4835_v4 = vpop.eup %4834 }
 0x24d   :  { %4838 = vrcp.f32 %v622_v57  ;;  %v4837_v62 = vpop.eup %4836  ;;  %v635_v5 = vadd.f32 1.0, %v4835_v4 }
 0x24e   :  { %4840 = vrcp.f32 %v628_v31 }
 0x24f   :  { %4842 = vrcp.f32 %v635_v5 }
 0x257   :  { %v4839_v1 = vpop.eup %4838 }
 0x258   :  { %v4841_v48 = vpop.eup %4840  ;;  %v639_v25 = vmul.f32 %v4839_v1, %v4837_v62 }
 0x259   :  { %v638_v43 = vmul.f32 0.0, %v4841_v48  ;;  %v4843_v48 = vpop.eup %4842 }
 0x25b   :  { %v5652_v30 = vadd.f32 %v639_v25, %v638_v43  ;;  %v711_v9 = vpop.f32.mrb[4].mxu0  ;;  %v782_v22 = vpop.f32.mrb[4].mxu1 }
 0x25c   :  { %v713_v33 = vpop.f32.mrb[5].mxu0  ;;  %v784_v16 = vpop.f32.mrb[5].mxu1 }
 0x25d   :  { %6584 = vst [vmem:[#allocation69_spill] sm:$0xff] %v5652_v30  ;;  %4844 = vtanh.f32 %v5652_v30  ;;  %v791_v63 = vcombine.low %v711_v9, %v713_v33  ;;  %v792_v49 = vcombine.low %v782_v22, %v784_v16 }
 0x25f   :  { %v799_v57 = vrot.slane %v791_v63, %v5528_v29  ;;  %v806_v59 = vrot.slane %v792_v49, %v5528_v29 }
 0x261   :  { %v807_v31 = vcombine.low %v799_v57, %v806_v59 }
 0x263   :  { %v809_v62 = vadd.f32 %v807_v31, %v644_v46 }
 0x265   :  { %v3225_v4 = vmul.f32 -1.442695, %v809_v62  ;;  %v817_v1 = vrot.slane %v809_v62, 2  ;;  %v828_v30 = vrot.slane %v809_v62, 6  ;;  %v825_v22 = vrot.slane %v809_v62, 4 }
 0x267   :  { %v4845_v25 = vpop.eup %4844  ;;  %4846 = vpow2.f32 %v3225_v4  ;;  %v3226_v43 = vmul.f32 -1.442695, %v817_v1  ;;  %v3227_v9 = vmul.f32 -1.442695, %v828_v30 }
 0x268   :  { %v642_v5 = vmul.f32 %v4845_v25, %v4843_v48 }
 0x269   :  { %4848 = vpow2.f32 %v3226_v43 }
 0x26a   :  { %905 = vmatprep.mubr.f32.mxu0 %v642_v5  ;;  %976 = vmatprep.mubr.f32.mxu1 %v642_v5  ;;  %4850 = vpow2.f32 %v3227_v9  ;;  %v6586_v5 = vld [vmem:[#allocation13_spill] sm:$0xff]  ;;  %v6587_v9 = vld [vmem:[#allocation14_spill] sm:$0xff] }
 0x271   :  { %v4847_v16 = vpop.eup %4846 }
 0x272   :  { %v813_v33 = vadd.f32 1.0, %v4847_v16  ;;  %v6588_v16 = vld [vmem:[#allocation15_spill] sm:$0xff] }
 0x273   :  { %v4849_v63 = vpop.eup %4848 }
 0x274   :  { %4852 = vrcp.f32 %v813_v33  ;;  %v822_v49 = vadd.f32 1.0, %v4849_v63  ;;  %v4851_v57 = vpop.eup %4850  ;;  %v6590_v33 = vld [vmem:[#allocation17_spill] sm:$0xff]  ;;  %v6591_v63 = vld [vmem:[#allocation18_spill] sm:$0xff] }
 0x275   :  { %4854 = vtanh.f32 %v825_v22  ;;  %v833_v4 = vadd.f32 1.0, %v4851_v57  ;;  %v6589_v22 = vld [vmem:[#allocation16_spill] sm:$0xff] }
 0x276   :  { %4856 = vrcp.f32 %v822_v49  ;;  %v6592_v49 = vld [vmem:[#allocation19_spill] sm:$0xff]  ;;  %v6593_v57 = vld [vmem:[#allocation20_spill] sm:$0xff] }
 0x277   :  { %4858 = vrcp.f32 %v833_v4  ;;  %v6597_v4 = vld [vmem:[#allocation24_spill] sm:$0xff] }
 0x27e   :  { %v4853_v59 = vpop.eup %4852 }
 0x27f   :  { %v4855_v46 = vpop.eup %4854 }
 0x280   :  { %v4857_v31 = vpop.eup %4856  ;;  %v837_v48 = vmul.f32 %v4855_v46, %v4853_v59  ;;  %v6594_v59 = vld [vmem:[#allocation21_spill] sm:$0xff]  ;;  %v6595_v46 = vld [vmem:[#allocation22_spill] sm:$0xff] }
 0x281   :  { %v836_v1 = vmul.f32 %v4857_v31, %v5532_v7  ;;  %v4859_v30 = vpop.eup %4858  ;;  %v6585_v7 = vld [vmem:[#allocation12_spill] sm:$0xff]  ;;  %v6596_v31 = vld [vmem:[#allocation23_spill] sm:$0xff] }
 0x283   :  { %v5658_v25 = vadd.f32 %v837_v48, %v836_v1  ;;  %v6598_v1 = vld [vmem:[#allocation25_spill] sm:$0xff]  ;;  %v6599_v48 = vld [vmem:[#allocation26_spill] sm:$0xff] }
 0x285   :  { %4860 = vtanh.f32 %v5658_v25 }
 0x28f   :  { %v4861_v62 = vpop.eup %4860 }
 0x290   :  { %v840_v43 = vmul.f32 %v4861_v62, %v4859_v30  ;;  %v6600_v30 = vld [vmem:[#allocation27_spill] sm:$0xff]  ;;  %v6601_v62 = vld [vmem:[#allocation28_spill] sm:$0xff] }
 0x292   :  { %906 = vmatmul.mubr.f32.vlgmr.msra.gmra.mrb[6].mxu0 %v840_v43  ;;  %977 = vmatmul.mubr.f32.vlgmr.msra.gmra.mrb[6].mxu1 %v840_v43 }
 0x293   :  { %3656 = vmatpush1.bf16.msra.mxu0 %v5235_v10  ;;  %3688 = vmatpush1.bf16.msra.mxu1 %v5238_v14 }
 0x294   :  { %3658 = vmatprep.subr.bf16.mxu0 %v5242_v18  ;;  %3690 = vmatprep.subr.bf16.mxu1 %v5244_v19 }
 0x295   :  { %1073 = vmatprep.mubr.f32.mxu0 %v6526_v6  ;;  %1144 = vmatprep.mubr.f32.mxu1 %v6526_v6 }
 0x297   :  { %3660 = vmatpush1.bf16.msra.mxu0 %v5247_v23  ;;  %3692 = vmatpush1.bf16.msra.mxu1 %v5251_v27 }
 0x298   :  { %3662 = vmatprep.subr.bf16.mxu0 %v5253_v28  ;;  %3694 = vmatprep.subr.bf16.mxu1 %v5255_v32 }
 0x29b   :  { %3664 = vmatpush1.bf16.msra.mxu0 %v5258_v36  ;;  %3696 = vmatpush1.bf16.msra.mxu1 %v5262_v40 }
 0x29c   :  { %3666 = vmatprep.subr.bf16.mxu0 %v5264_v41  ;;  %3698 = vmatprep.subr.bf16.mxu1 %v5267_v45 }
 0x29f   :  { %3668 = vmatpush1.bf16.msra.mxu0 %v5270_v52  ;;  %3700 = vmatpush1.bf16.msra.mxu1 %v5274_v53 }
 0x2a0   :  { %3670 = vmatprep.subr.bf16.mxu0 %v5276_v54  ;;  %3702 = vmatprep.subr.bf16.mxu1 %v5279_v58 }
 0x2a3   :  { %3672 = vmatpush1.bf16.msra.mxu0 %v5282_v0  ;;  %3704 = vmatpush1.bf16.msra.mxu1 %v5286_v2 }
 0x2a4   :  { %3674 = vmatprep.subr.bf16.mxu0 %v5288_v3  ;;  %3706 = vmatprep.subr.bf16.mxu1 %v5291_v8 }
 0x2a7   :  { %3676 = vmatpush1.bf16.msra.mxu0 %v5294_v17  ;;  %3708 = vmatpush1.bf16.msra.mxu1 %v5298_v20 }
 0x2a8   :  { %3678 = vmatprep.subr.bf16.mxu0 %v5300_v21  ;;  %3710 = vmatprep.subr.bf16.mxu1 %v5303_v26 }
 0x2ab   :  { %3680 = vmatpush1.bf16.msra.mxu0 %v5306_v35  ;;  %3712 = vmatpush1.bf16.msra.mxu1 %v5310_v37 }
 0x2ac   :  { %3682 = vmatprep.subr.bf16.mxu0 %v5312_v38  ;;  %3714 = vmatprep.subr.bf16.mxu1 %v5315_v44 }
 0x2af   :  { %3684 = vmatpush1.bf16.msra.mxu0 %v5318_v51  ;;  %3716 = vmatpush1.bf16.msra.mxu1 %v5322_v55 }
 0x2b0   :  { %3718 = vmatprep.subr.bf16.mxu0 %v5324_v56  ;;  %3782 = vmatprep.subr.bf16.mxu1 %v5327_v61 }
 0x2b2   :  { %1074 = vmatmul.mubr.f32.vlgmr.msra.gmra.mrb[8].mxu0 %v840_v43  ;;  %1145 = vmatmul.mubr.f32.vlgmr.msra.gmra.mrb[8].mxu1 %v840_v43  ;;  %v6602_v43 = vld [vmem:[#allocation29_spill] sm:$0xff] }
 0x2b3   :  { %3720 = vmatpush1.bf16.msra.mxu0 %v5330_v11  ;;  %3784 = vmatpush1.bf16.msra.mxu1 %v5334_v12 }
 0x2b4   :  { %3722 = vmatprep.subr.bf16.mxu0 %v5336_v13  ;;  %3786 = vmatprep.subr.bf16.mxu1 %v5339_v24 }
 0x2b7   :  { %3724 = vmatpush1.bf16.msra.mxu0 %v5344_v34  ;;  %3788 = vmatpush1.bf16.msra.mxu1 %v5348_v39 }
 0x2b8   :  { %3726 = vmatprep.subr.bf16.mxu0 %v5350_v42  ;;  %3790 = vmatprep.subr.bf16.mxu1 %v5353_v47 }
 0x2bb   :  { %3728 = vmatpush1.bf16.msra.mxu0 %v5358_v50  ;;  %3792 = vmatpush1.bf16.msra.mxu1 %v6585_v7 }
 0x2bc   :  { %3730 = vmatprep.subr.bf16.mxu0 %v6586_v5  ;;  %3794 = vmatprep.subr.bf16.mxu1 %v6587_v9 }
 0x2bf   :  { %3732 = vmatpush1.bf16.msra.mxu0 %v6588_v16  ;;  %3796 = vmatpush1.bf16.msra.mxu1 %v6589_v22 }
 0x2c0   :  { %3734 = vmatprep.subr.bf16.mxu0 %v6590_v33  ;;  %3798 = vmatprep.subr.bf16.mxu1 %v6591_v63  ;;  %v6640_v63 = vld [vmem:[#allocation65_spill] sm:$0xff] }
 0x2c3   :  { %3736 = vmatpush1.bf16.msra.mxu0 %v6592_v49  ;;  %3800 = vmatpush1.bf16.msra.mxu1 %v6593_v57  ;;  %v6603_v49 = vld [vmem:[#allocation30_spill] sm:$0xff]  ;;  %v6604_v57 = vld [vmem:[#allocation31_spill] sm:$0xff] }
 0x2c4   :  { %3738 = vmatprep.subr.bf16.mxu0 %v6594_v59  ;;  %3802 = vmatprep.subr.bf16.mxu1 %v6595_v46  ;;  %v6605_v59 = vld [vmem:[#allocation32_spill] sm:$0xff]  ;;  %v6606_v46 = vld [vmem:[#allocation33_spill] sm:$0xff] }
 0x2c7   :  { %3740 = vmatpush1.bf16.msra.mxu0 %v6596_v31  ;;  %3804 = vmatpush1.bf16.msra.mxu1 %v6597_v4  ;;  %v6607_v31 = vld [vmem:[#allocation34_spill] sm:$0xff]  ;;  %v6608_v4 = vld [vmem:[#allocation35_spill] sm:$0xff] }
 0x2c8   :  { %3742 = vmatprep.subr.bf16.mxu0 %v6598_v1  ;;  %3806 = vmatprep.subr.bf16.mxu1 %v6599_v48  ;;  %v6609_v1 = vld [vmem:[#allocation36_spill] sm:$0xff]  ;;  %v6610_v48 = vld [vmem:[#allocation37_spill] sm:$0xff] }
 0x2cb   :  { %3744 = vmatpush1.bf16.msra.mxu0 %v6600_v30  ;;  %3808 = vmatpush1.bf16.msra.mxu1 %v6601_v62  ;;  %v6611_v30 = vld [vmem:[#allocation38_spill] sm:$0xff]  ;;  %v6612_v62 = vld [vmem:[#allocation39_spill] sm:$0xff] }
 0x2cc   :  { %3746 = vmatprep.subr.bf16.mxu0 %v6602_v43  ;;  %3810 = vmatprep.subr.bf16.mxu1 %v6603_v49  ;;  %v6613_v43 = vld [vmem:[#allocation40_spill] sm:$0xff]  ;;  %v6614_v49 = vld [vmem:[#allocation41_spill] sm:$0xff] }
 0x2cf   :  { %3748 = vmatpush1.bf16.msra.mxu0 %v6604_v57  ;;  %3812 = vmatpush1.bf16.msra.mxu1 %v6605_v59  ;;  %v6615_v57 = vld [vmem:[#allocation42_spill] sm:$0xff]  ;;  %v6616_v59 = vld [vmem:[#allocation43_spill] sm:$0xff] }
 0x2d0   :  { %3750 = vmatprep.subr.bf16.mxu0 %v6606_v46  ;;  %3814 = vmatprep.subr.bf16.mxu1 %v6607_v31  ;;  %v6617_v46 = vld [vmem:[#allocation44_spill] sm:$0xff]  ;;  %v6618_v31 = vld [vmem:[#allocation45_spill] sm:$0xff] }
 0x2d3   :  { %3752 = vmatpush1.bf16.msra.mxu0 %v6608_v4  ;;  %3816 = vmatpush1.bf16.msra.mxu1 %v6609_v1  ;;  %v6619_v4 = vld [vmem:[#allocation46_spill] sm:$0xff]  ;;  %v6620_v1 = vld [vmem:[#allocation47_spill] sm:$0xff] }
 0x2d4   :  { %3754 = vmatprep.subr.bf16.mxu0 %v6610_v48  ;;  %3818 = vmatprep.subr.bf16.mxu1 %v6611_v30  ;;  %v6621_v48 = vld [vmem:[#allocation48_spill] sm:$0xff]  ;;  %v6622_v30 = vld [vmem:[#allocation49_spill] sm:$0xff] }
 0x2d7   :  { %3756 = vmatpush1.bf16.msra.mxu0 %v6612_v62  ;;  %3820 = vmatpush1.bf16.msra.mxu1 %v6613_v43  ;;  %v6623_v62 = vld [vmem:[#allocation50_spill] sm:$0xff]  ;;  %v6624_v43 = vld [vmem:[#allocation51_spill] sm:$0xff] }
 0x2d8   :  { %3758 = vmatprep.subr.bf16.mxu0 %v6614_v49  ;;  %3822 = vmatprep.subr.bf16.mxu1 %v6615_v57  ;;  %v6625_v49 = vld [vmem:[#allocation52_spill] sm:$0xff]  ;;  %v6626_v57 = vld [vmem:[#allocation53_spill] sm:$0xff] }
 0x2db   :  { %3760 = vmatpush1.bf16.msra.mxu0 %v6616_v59  ;;  %3824 = vmatpush1.bf16.msra.mxu1 %v6617_v46  ;;  %v6627_v59 = vld [vmem:[#allocation54_spill] sm:$0xff]  ;;  %v6628_v46 = vld [vmem:[#allocation55_spill] sm:$0xff] }
 0x2dc   :  { %3762 = vmatprep.subr.bf16.mxu0 %v6618_v31  ;;  %3826 = vmatprep.subr.bf16.mxu1 %v6619_v4  ;;  %v6629_v31 = vld [vmem:[#allocation56_spill] sm:$0xff]  ;;  %v6630_v4 = vld [vmem:[#allocation57_spill] sm:$0xff] }
 0x2df   :  { %3764 = vmatpush1.bf16.msra.mxu0 %v6620_v1  ;;  %3828 = vmatpush1.bf16.msra.mxu1 %v6621_v48  ;;  %v6631_v1 = vld [vmem:[#allocation58_spill] sm:$0xff]  ;;  %v6632_v48 = vld [vmem:[#allocation59_spill] sm:$0xff] }
 0x2e0   :  { %3766 = vmatprep.subr.bf16.mxu0 %v6622_v30  ;;  %3830 = vmatprep.subr.bf16.mxu1 %v6623_v62  ;;  %v6633_v30 = vld [vmem:[#allocation60_spill] sm:$0xff]  ;;  %v6634_v62 = vld [vmem:[#allocation61_spill] sm:$0xff] }
 0x2e3   :  { %3768 = vmatpush1.bf16.msra.mxu0 %v6624_v43  ;;  %3832 = vmatpush1.bf16.msra.mxu1 %v6625_v49  ;;  %v6635_v43 = vld [vmem:[#allocation62_spill] sm:$0xff]  ;;  %v6636_v49 = vld [vmem:[#allocation63_spill] sm:$0xff] }
 0x2e4   :  { %3770 = vmatprep.subr.bf16.mxu0 %v6626_v57  ;;  %3834 = vmatprep.subr.bf16.mxu1 %v6627_v59  ;;  %v6637_v57 = vld [vmem:[#allocation64_spill] sm:$0xff]  ;;  %v6638_v59 = vld [vmem:[#allocation10_spill] sm:$0xff] }
 0x2e7   :  { %3772 = vmatpush1.bf16.msra.mxu0 %v6628_v46  ;;  %3836 = vmatpush1.bf16.msra.mxu1 %v6629_v31  ;;  %v6639_v46 = vld [vmem:[#allocation11_spill] sm:$0xff] }
 0x2e8   :  { %3774 = vmatprep.subr.bf16.mxu0 %v6630_v4  ;;  %3838 = vmatprep.subr.bf16.mxu1 %v6631_v1 }
 0x2eb   :  { %3776 = vmatpush1.bf16.msra.mxu0 %v6632_v48  ;;  %3840 = vmatpush1.bf16.msra.mxu1 %v6633_v30 }
 0x2ec   :  { %3778 = vmatprep.subr.bf16.mxu0 %v6634_v62  ;;  %3842 = vmatprep.subr.bf16.mxu1 %v6635_v43 }
 0x2ef   :  { %3780 = vmatpush1.bf16.msra.mxu0 %v6636_v49  ;;  %3844 = vmatpush1.bf16.msra.mxu1 %v6637_v57  ;;  %v6641_v57 = vld [vmem:[#allocation68_spill] sm:$0xff] }
 0x2f0   :  { %3846 = vmatprep.subr.bf16.mxu0 %v6638_v59  ;;  %3878 = vmatprep.subr.bf16.mxu1 %v6639_v46 }
 0x365   :  { %v907_v31 = vpop.f32.mrb[6].mxu0  ;;  %v978_v4 = vpop.f32.mrb[6].mxu1 }
 0x366   :  { %v908_v1 = vadd.f32 %v907_v31, %v6640_v63  ;;  %v909_v33 = vpop.f32.mrb[7].mxu0  ;;  %v980_v48 = vpop.f32.mrb[7].mxu1  ;;  %v979_v16 = vadd.f32 %v978_v4, %v6641_v57 }
 0x367   :  { %v910_v30 = vadd.f32 %v909_v33, %v5640_v60  ;;  %v981_v49 = vadd.f32 %v980_v48, %v5645_v15 }
 0x368   :  { %v3228_v22 = vmul.f32 -1.442695, %v908_v1 }
 0x369   :  { %v3229_v62 = vmul.f32 -1.442695, %v910_v30  ;;  %v3230_v43 = vmul.f32 -1.442695, %v981_v49 }
 0x36a   :  { %4862 = vpow2.f32 %v3228_v22 }
 0x36b   :  { %4864 = vpow2.f32 %v3229_v62  ;;  %v6642_v62 = vld [vmem:[#allocation69_spill] sm:$0xff] }
 0x36c   :  { %4866 = vpow2.f32 %v3230_v43 }
 0x36d   :  { %4868 = vtanh.f32 %v979_v16 }
 0x374   :  { %v4863_v59 = vpop.eup %4862 }
 0x375   :  { %v4865_v9 = vpop.eup %4864  ;;  %v986_v46 = vadd.f32 1.0, %v4863_v59 }
 0x376   :  { %v992_v5 = vadd.f32 1.0, %v4865_v9  ;;  %v4867_v31 = vpop.eup %4866 }
 0x377   :  { %4870 = vrcp.f32 %v986_v46  ;;  %v4869_v63 = vpop.eup %4868  ;;  %v999_v22 = vadd.f32 1.0, %v4867_v31  ;;  %v1008_v46 = vld [vmem:[#allocation3 + $0x10] sm:$0xff] }
 0x378   :  { %4872 = vrcp.f32 %v992_v5 }
 0x379   :  { %4874 = vrcp.f32 %v999_v22 }
 0x381   :  { %v4871_v33 = vpop.eup %4870 }
 0x382   :  { %v4873_v1 = vpop.eup %4872  ;;  %v1003_v30 = vmul.f32 %v4871_v33, %v4869_v63 }
 0x383   :  { %v1002_v60 = vmul.f32 %v4873_v1, %v6642_v62  ;;  %v4875_v62 = vpop.eup %4874 }
 0x385   :  { %v1075_v48 = vpop.f32.mrb[8].mxu0  ;;  %v1146_v49 = vpop.f32.mrb[8].mxu1  ;;  %v5764_v15 = vadd.f32 %v1003_v30, %v1002_v60 }
 0x386   :  { %v1077_v4 = vpop.f32.mrb[9].mxu0  ;;  %v1148_v59 = vpop.f32.mrb[9].mxu1 }
 0x387   :  { %v1155_v43 = vcombine.low %v1075_v48, %v1077_v4  ;;  %v1156_v16 = vcombine.low %v1146_v49, %v1148_v59  ;;  %4876 = vtanh.f32 %v5764_v15 }
 0x389   :  { %v1163_v5 = vrot.slane %v1155_v43, %v5528_v29  ;;  %v1170_v9 = vrot.slane %v1156_v16, %v5528_v29 }
 0x38b   :  { %v1171_v63 = vcombine.low %v1163_v5, %v1170_v9 }
 0x38d   :  { %v1173_v31 = vadd.f32 %v1171_v63, %v1008_v46 }
 0x38f   :  { %v3231_v33 = vmul.f32 -1.442695, %v1173_v31  ;;  %v1181_v1 = vrot.slane %v1173_v31, 2  ;;  %v1192_v22 = vrot.slane %v1173_v31, 6  ;;  %v1189_v4 = vrot.slane %v1173_v31, 4 }
 0x391   :  { %v4877_v57 = vpop.eup %4876  ;;  %4878 = vpow2.f32 %v3231_v33  ;;  %v3232_v60 = vmul.f32 -1.442695, %v1181_v1  ;;  %v3233_v48 = vmul.f32 -1.442695, %v1192_v22  ;;  %v6644_v22 = vld [vmem:[#allocation14_spill] sm:$0xff] }
 0x392   :  { %v1006_v30 = vmul.f32 %v4877_v57, %v4875_v62 }
 0x393   :  { %4880 = vpow2.f32 %v3232_v60 }
 0x394   :  { %1269 = vmatprep.mubr.f32.mxu0 %v1006_v30  ;;  %1340 = vmatprep.mubr.f32.mxu1 %v1006_v30  ;;  %4882 = vpow2.f32 %v3233_v48  ;;  %v6645_v48 = vld [vmem:[#allocation15_spill] sm:$0xff] }
 0x39b   :  { %v4879_v49 = vpop.eup %4878 }
 0x39c   :  { %v1177_v59 = vadd.f32 1.0, %v4879_v49  ;;  %v6646_v49 = vld [vmem:[#allocation16_spill] sm:$0xff] }
 0x39d   :  { %v4881_v43 = vpop.eup %4880 }
 0x39e   :  { %4884 = vrcp.f32 %v1177_v59  ;;  %v1186_v16 = vadd.f32 1.0, %v4881_v43  ;;  %v4883_v5 = vpop.eup %4882  ;;  %v6648_v59 = vld [vmem:[#allocation18_spill] sm:$0xff]  ;;  %v6649_v43 = vld [vmem:[#allocation19_spill] sm:$0xff] }
 0x39f   :  { %4886 = vtanh.f32 %v1189_v4  ;;  %v1197_v33 = vadd.f32 1.0, %v4883_v5  ;;  %v6647_v4 = vld [vmem:[#allocation17_spill] sm:$0xff] }
 0x3a0   :  { %4888 = vrcp.f32 %v1186_v16  ;;  %v6650_v16 = vld [vmem:[#allocation20_spill] sm:$0xff]  ;;  %v6651_v5 = vld [vmem:[#allocation21_spill] sm:$0xff] }
 0x3a1   :  { %4890 = vrcp.f32 %v1197_v33  ;;  %v6655_v33 = vld [vmem:[#allocation25_spill] sm:$0xff] }
 0x3a8   :  { %v4885_v9 = vpop.eup %4884 }
 0x3a9   :  { %v4887_v46 = vpop.eup %4886 }
 0x3aa   :  { %v4889_v63 = vpop.eup %4888  ;;  %v1201_v1 = vmul.f32 %v4887_v46, %v4885_v9  ;;  %v6652_v9 = vld [vmem:[#allocation22_spill] sm:$0xff]  ;;  %v6653_v46 = vld [vmem:[#allocation23_spill] sm:$0xff] }
 0x3ab   :  { %v1200_v57 = vmul.f32 %v4889_v63, %v5658_v25  ;;  %v4891_v31 = vpop.eup %4890  ;;  %v6643_v25 = vld [vmem:[#allocation13_spill] sm:$0xff]  ;;  %v6654_v63 = vld [vmem:[#allocation24_spill] sm:$0xff] }
 0x3ad   :  { %v5770_v62 = vadd.f32 %v1201_v1, %v1200_v57  ;;  %v6656_v57 = vld [vmem:[#allocation26_spill] sm:$0xff]  ;;  %v6657_v1 = vld [vmem:[#allocation27_spill] sm:$0xff] }
 0x3af   :  { %4892 = vtanh.f32 %v5770_v62 }
 0x3b9   :  { %v4893_v60 = vpop.eup %4892 }
 0x3ba   :  { %v1204_v30 = vmul.f32 %v4893_v60, %v4891_v31  ;;  %v6658_v31 = vld [vmem:[#allocation28_spill] sm:$0xff]  ;;  %v6659_v60 = vld [vmem:[#allocation29_spill] sm:$0xff] }
 0x3bc   :  { %1270 = vmatmul.mubr.f32.vlgmr.msra.gmra.mrb[10].mxu0 %v1204_v30  ;;  %1341 = vmatmul.mubr.f32.vlgmr.msra.gmra.mrb[10].mxu1 %v1204_v30 }
 0x3bd   :  { %3848 = vmatpush1.bf16.msra.mxu0 %v5235_v10  ;;  %3880 = vmatpush1.bf16.msra.mxu1 %v5238_v14 }
 0x3be   :  { %3850 = vmatprep.subr.bf16.mxu0 %v5242_v18  ;;  %3882 = vmatprep.subr.bf16.mxu1 %v5244_v19 }
 0x3bf   :  { %1437 = vmatprep.mubr.f32.mxu0 %v6526_v6  ;;  %1508 = vmatprep.mubr.f32.mxu1 %v6526_v6 }
 0x3c1   :  { %3852 = vmatpush1.bf16.msra.mxu0 %v5247_v23  ;;  %3884 = vmatpush1.bf16.msra.mxu1 %v5251_v27 }
 0x3c2   :  { %3854 = vmatprep.subr.bf16.mxu0 %v5253_v28  ;;  %3886 = vmatprep.subr.bf16.mxu1 %v5255_v32 }
 0x3c5   :  { %3856 = vmatpush1.bf16.msra.mxu0 %v5258_v36  ;;  %3888 = vmatpush1.bf16.msra.mxu1 %v5262_v40 }
 0x3c6   :  { %3858 = vmatprep.subr.bf16.mxu0 %v5264_v41  ;;  %3890 = vmatprep.subr.bf16.mxu1 %v5267_v45 }
 0x3c9   :  { %3860 = vmatpush1.bf16.msra.mxu0 %v5270_v52  ;;  %3892 = vmatpush1.bf16.msra.mxu1 %v5274_v53 }
 0x3ca   :  { %3862 = vmatprep.subr.bf16.mxu0 %v5276_v54  ;;  %3894 = vmatprep.subr.bf16.mxu1 %v5279_v58 }
 0x3cd   :  { %3864 = vmatpush1.bf16.msra.mxu0 %v5282_v0  ;;  %3896 = vmatpush1.bf16.msra.mxu1 %v5286_v2 }
 0x3ce   :  { %3866 = vmatprep.subr.bf16.mxu0 %v5288_v3  ;;  %3898 = vmatprep.subr.bf16.mxu1 %v5291_v8 }
 0x3d1   :  { %3868 = vmatpush1.bf16.msra.mxu0 %v5294_v17  ;;  %3900 = vmatpush1.bf16.msra.mxu1 %v5298_v20 }
 0x3d2   :  { %3870 = vmatprep.subr.bf16.mxu0 %v5300_v21  ;;  %3902 = vmatprep.subr.bf16.mxu1 %v5303_v26 }
 0x3d5   :  { %3872 = vmatpush1.bf16.msra.mxu0 %v5306_v35  ;;  %3904 = vmatpush1.bf16.msra.mxu1 %v5310_v37 }
 0x3d6   :  { %3874 = vmatprep.subr.bf16.mxu0 %v5312_v38  ;;  %3906 = vmatprep.subr.bf16.mxu1 %v5315_v44 }
 0x3d9   :  { %3876 = vmatpush1.bf16.msra.mxu0 %v5318_v51  ;;  %3908 = vmatpush1.bf16.msra.mxu1 %v5322_v55 }
 0x3da   :  { %3910 = vmatprep.subr.bf16.mxu0 %v5324_v56  ;;  %3974 = vmatprep.subr.bf16.mxu1 %v5327_v61 }
 0x3dc   :  { %1438 = vmatmul.mubr.f32.vlgmr.msra.gmra.mrb[12].mxu0 %v1204_v30  ;;  %1509 = vmatmul.mubr.f32.vlgmr.msra.gmra.mrb[12].mxu1 %v1204_v30  ;;  %v6660_v30 = vld [vmem:[#allocation30_spill] sm:$0xff] }
 0x3dd   :  { %3912 = vmatpush1.bf16.msra.mxu0 %v5330_v11  ;;  %3976 = vmatpush1.bf16.msra.mxu1 %v5334_v12 }
 0x3de   :  { %3914 = vmatprep.subr.bf16.mxu0 %v5336_v13  ;;  %3978 = vmatprep.subr.bf16.mxu1 %v5339_v24 }
 0x3e1   :  { %3916 = vmatpush1.bf16.msra.mxu0 %v5344_v34  ;;  %3980 = vmatpush1.bf16.msra.mxu1 %v5348_v39 }
 0x3e2   :  { %3918 = vmatprep.subr.bf16.mxu0 %v5350_v42  ;;  %3982 = vmatprep.subr.bf16.mxu1 %v5353_v47 }
 0x3e5   :  { %3920 = vmatpush1.bf16.msra.mxu0 %v5358_v50  ;;  %3984 = vmatpush1.bf16.msra.mxu1 %v6585_v7 }
 0x3e6   :  { %3922 = vmatprep.subr.bf16.mxu0 %v6643_v25  ;;  %3986 = vmatprep.subr.bf16.mxu1 %v6644_v22 }
 0x3e9   :  { %3924 = vmatpush1.bf16.msra.mxu0 %v6645_v48  ;;  %3988 = vmatpush1.bf16.msra.mxu1 %v6646_v49 }
 0x3ea   :  { %3926 = vmatprep.subr.bf16.mxu0 %v6647_v4  ;;  %3990 = vmatprep.subr.bf16.mxu1 %v6648_v59  ;;  %v6698_v4 = vld [vmem:[#allocation66_spill] sm:$0xff] }
 0x3ed   :  { %3928 = vmatpush1.bf16.msra.mxu0 %v6649_v43  ;;  %3992 = vmatpush1.bf16.msra.mxu1 %v6650_v16  ;;  %v6661_v16 = vld [vmem:[#allocation31_spill] sm:$0xff]  ;;  %v6697_v43 = vld [vmem:[#allocation65_spill] sm:$0xff] }
 0x3ee   :  { %3930 = vmatprep.subr.bf16.mxu0 %v6651_v5  ;;  %3994 = vmatprep.subr.bf16.mxu1 %v6652_v9  ;;  %v6662_v5 = vld [vmem:[#allocation32_spill] sm:$0xff]  ;;  %v6663_v9 = vld [vmem:[#allocation33_spill] sm:$0xff] }
 0x3f1   :  { %3932 = vmatpush1.bf16.msra.mxu0 %v6653_v46  ;;  %3996 = vmatpush1.bf16.msra.mxu1 %v6654_v63  ;;  %v6664_v46 = vld [vmem:[#allocation34_spill] sm:$0xff]  ;;  %v6665_v63 = vld [vmem:[#allocation35_spill] sm:$0xff] }
 0x3f2   :  { %3934 = vmatprep.subr.bf16.mxu0 %v6655_v33  ;;  %3998 = vmatprep.subr.bf16.mxu1 %v6656_v57  ;;  %v6666_v33 = vld [vmem:[#allocation36_spill] sm:$0xff]  ;;  %v6667_v57 = vld [vmem:[#allocation37_spill] sm:$0xff] }
 0x3f5   :  { %3936 = vmatpush1.bf16.msra.mxu0 %v6657_v1  ;;  %4000 = vmatpush1.bf16.msra.mxu1 %v6658_v31  ;;  %v6668_v1 = vld [vmem:[#allocation38_spill] sm:$0xff]  ;;  %v6669_v31 = vld [vmem:[#allocation39_spill] sm:$0xff] }
 0x3f6   :  { %3938 = vmatprep.subr.bf16.mxu0 %v6659_v60  ;;  %4002 = vmatprep.subr.bf16.mxu1 %v6660_v30  ;;  %v6670_v60 = vld [vmem:[#allocation40_spill] sm:$0xff]  ;;  %v6671_v30 = vld [vmem:[#allocation41_spill] sm:$0xff] }
 0x3f9   :  { %3940 = vmatpush1.bf16.msra.mxu0 %v6661_v16  ;;  %4004 = vmatpush1.bf16.msra.mxu1 %v6662_v5  ;;  %v6672_v16 = vld [vmem:[#allocation42_spill] sm:$0xff]  ;;  %v6673_v5 = vld [vmem:[#allocation43_spill] sm:$0xff] }
 0x3fa   :  { %3942 = vmatprep.subr.bf16.mxu0 %v6663_v9  ;;  %4006 = vmatprep.subr.bf16.mxu1 %v6664_v46  ;;  %v6674_v9 = vld [vmem:[#allocation44_spill] sm:$0xff]  ;;  %v6675_v46 = vld [vmem:[#allocation45_spill] sm:$0xff] }
 0x3fd   :  { %3944 = vmatpush1.bf16.msra.mxu0 %v6665_v63  ;;  %4008 = vmatpush1.bf16.msra.mxu1 %v6666_v33  ;;  %v6676_v63 = vld [vmem:[#allocation46_spill] sm:$0xff]  ;;  %v6677_v33 = vld [vmem:[#allocation47_spill] sm:$0xff] }
 0x3fe   :  { %3946 = vmatprep.subr.bf16.mxu0 %v6667_v57  ;;  %4010 = vmatprep.subr.bf16.mxu1 %v6668_v1  ;;  %v6678_v57 = vld [vmem:[#allocation48_spill] sm:$0xff]  ;;  %v6679_v1 = vld [vmem:[#allocation49_spill] sm:$0xff] }
 0x401   :  { %3948 = vmatpush1.bf16.msra.mxu0 %v6669_v31  ;;  %4012 = vmatpush1.bf16.msra.mxu1 %v6670_v60  ;;  %v6680_v31 = vld [vmem:[#allocation50_spill] sm:$0xff]  ;;  %v6681_v60 = vld [vmem:[#allocation51_spill] sm:$0xff] }
 0x402   :  { %3950 = vmatprep.subr.bf16.mxu0 %v6671_v30  ;;  %4014 = vmatprep.subr.bf16.mxu1 %v6672_v16  ;;  %v6682_v30 = vld [vmem:[#allocation52_spill] sm:$0xff]  ;;  %v6683_v16 = vld [vmem:[#allocation53_spill] sm:$0xff] }
 0x405   :  { %3952 = vmatpush1.bf16.msra.mxu0 %v6673_v5  ;;  %4016 = vmatpush1.bf16.msra.mxu1 %v6674_v9  ;;  %v6684_v5 = vld [vmem:[#allocation54_spill] sm:$0xff]  ;;  %v6685_v9 = vld [vmem:[#allocation55_spill] sm:$0xff] }
 0x406   :  { %3954 = vmatprep.subr.bf16.mxu0 %v6675_v46  ;;  %4018 = vmatprep.subr.bf16.mxu1 %v6676_v63  ;;  %v6686_v46 = vld [vmem:[#allocation56_spill] sm:$0xff]  ;;  %v6687_v63 = vld [vmem:[#allocation57_spill] sm:$0xff] }
 0x409   :  { %3956 = vmatpush1.bf16.msra.mxu0 %v6677_v33  ;;  %4020 = vmatpush1.bf16.msra.mxu1 %v6678_v57  ;;  %v6688_v33 = vld [vmem:[#allocation58_spill] sm:$0xff]  ;;  %v6689_v57 = vld [vmem:[#allocation59_spill] sm:$0xff] }
 0x40a   :  { %3958 = vmatprep.subr.bf16.mxu0 %v6679_v1  ;;  %4022 = vmatprep.subr.bf16.mxu1 %v6680_v31  ;;  %v6690_v1 = vld [vmem:[#allocation60_spill] sm:$0xff]  ;;  %v6691_v31 = vld [vmem:[#allocation61_spill] sm:$0xff] }
 0x40d   :  { %3960 = vmatpush1.bf16.msra.mxu0 %v6681_v60  ;;  %4024 = vmatpush1.bf16.msra.mxu1 %v6682_v30  ;;  %v6692_v60 = vld [vmem:[#allocation62_spill] sm:$0xff]  ;;  %v6693_v30 = vld [vmem:[#allocation63_spill] sm:$0xff] }
 0x40e   :  { %3962 = vmatprep.subr.bf16.mxu0 %v6683_v16  ;;  %4026 = vmatprep.subr.bf16.mxu1 %v6684_v5  ;;  %v6694_v16 = vld [vmem:[#allocation64_spill] sm:$0xff]  ;;  %v6695_v5 = vld [vmem:[#allocation10_spill] sm:$0xff] }
 0x411   :  { %3964 = vmatpush1.bf16.msra.mxu0 %v6685_v9  ;;  %4028 = vmatpush1.bf16.msra.mxu1 %v6686_v46  ;;  %v6696_v9 = vld [vmem:[#allocation11_spill] sm:$0xff] }
 0x412   :  { %3966 = vmatprep.subr.bf16.mxu0 %v6687_v63  ;;  %4030 = vmatprep.subr.bf16.mxu1 %v6688_v33 }
 0x415   :  { %3968 = vmatpush1.bf16.msra.mxu0 %v6689_v57  ;;  %4032 = vmatpush1.bf16.msra.mxu1 %v6690_v1 }
 0x416   :  { %3970 = vmatprep.subr.bf16.mxu0 %v6691_v31  ;;  %4034 = vmatprep.subr.bf16.mxu1 %v6692_v60  ;;  %v6699_v60 = vld [vmem:[#allocation67_spill] sm:$0xff] }
 0x419   :  { %3972 = vmatpush1.bf16.msra.mxu0 %v6693_v30  ;;  %4036 = vmatpush1.bf16.msra.mxu1 %v6694_v16  ;;  %v6700_v16 = vld [vmem:[#allocation68_spill] sm:$0xff] }
 0x41a   :  { %4038 = vmatprep.subr.bf16.mxu0 %v6695_v5  ;;  %4070 = vmatprep.subr.bf16.mxu1 %v6696_v9 }
 0x48f   :  { %v1271_v46 = vpop.f32.mrb[10].mxu0  ;;  %v1342_v63 = vpop.f32.mrb[10].mxu1 }
 0x490   :  { %v1272_v33 = vadd.f32 %v1271_v46, %v6697_v43  ;;  %v1273_v59 = vpop.f32.mrb[11].mxu0  ;;  %v1344_v57 = vpop.f32.mrb[11].mxu1  ;;  %v1343_v22 = vadd.f32 %v1342_v63, %v6700_v16 }
 0x491   :  { %v1274_v1 = vadd.f32 %v1273_v59, %v6698_v4  ;;  %v1345_v30 = vadd.f32 %v1344_v57, %v6699_v60 }
 0x492   :  { %v3234_v49 = vmul.f32 -1.442695, %v1272_v33 }
 0x493   :  { %v3235_v31 = vmul.f32 -1.442695, %v1274_v1  ;;  %v3236_v48 = vmul.f32 -1.442695, %v1345_v30 }
 0x494   :  { %4894 = vpow2.f32 %v3234_v49 }
 0x495   :  { %4896 = vpow2.f32 %v3235_v31 }
 0x496   :  { %4898 = vpow2.f32 %v3236_v48 }
 0x497   :  { %4900 = vtanh.f32 %v1343_v22 }
 0x49e   :  { %v4895_v5 = vpop.eup %4894 }
 0x49f   :  { %v4897_v25 = vpop.eup %4896  ;;  %v1350_v9 = vadd.f32 1.0, %v4895_v5 }
 0x4a0   :  { %v1356_v7 = vadd.f32 1.0, %v4897_v25  ;;  %v4899_v46 = vpop.eup %4898 }
 0x4a1   :  { %4902 = vrcp.f32 %v1350_v9  ;;  %v4901_v43 = vpop.eup %4900  ;;  %v1363_v49 = vadd.f32 1.0, %v4899_v46  ;;  %v1372_v9 = vld [vmem:[#allocation3 + $0x18] sm:$0xff] }
 0x4a2   :  { %4904 = vrcp.f32 %v1356_v7 }
 0x4a3   :  { %4906 = vrcp.f32 %v1363_v49 }
 0x4ab   :  { %v4903_v59 = vpop.eup %4902 }
 0x4ac   :  { %v4905_v33 = vpop.eup %4904  ;;  %v1367_v1 = vmul.f32 %v4903_v59, %v4901_v43 }
 0x4ad   :  { %v1366_v31 = vmul.f32 %v4905_v33, %v5764_v15  ;;  %v4907_v33 = vpop.eup %4906 }
 0x4af   :  { %v1439_v57 = vpop.f32.mrb[12].mxu0  ;;  %v1510_v30 = vpop.f32.mrb[12].mxu1  ;;  %v5876_v60 = vadd.f32 %v1367_v1, %v1366_v31 }
 0x4b0   :  { %v1441_v63 = vpop.f32.mrb[13].mxu0  ;;  %v1512_v5 = vpop.f32.mrb[13].mxu1 }
 0x4b1   :  { %v1519_v48 = vcombine.low %v1439_v57, %v1441_v63  ;;  %v1520_v22 = vcombine.low %v1510_v30, %v1512_v5  ;;  %4908 = vtanh.f32 %v5876_v60 }
 0x4b3   :  { %v1527_v7 = vrot.slane %v1519_v48, %v5528_v29  ;;  %v1534_v25 = vrot.slane %v1520_v22, %v5528_v29 }
 0x4b5   :  { %v1535_v43 = vcombine.low %v1527_v7, %v1534_v25 }
 0x4b7   :  { %v1537_v46 = vadd.f32 %v1535_v43, %v1372_v9 }
 0x4b9   :  { %v3237_v59 = vmul.f32 -1.442695, %v1537_v46  ;;  %v1545_v15 = vrot.slane %v1537_v46, 2  ;;  %v1556_v31 = vrot.slane %v1537_v46, 6  ;;  %v1553_v63 = vrot.slane %v1537_v46, 4 }
 0x4bb   :  { %v4909_v16 = vpop.eup %4908  ;;  %4910 = vpow2.f32 %v3237_v59  ;;  %v3238_v1 = vmul.f32 -1.442695, %v1545_v15  ;;  %v3239_v57 = vmul.f32 -1.442695, %v1556_v31  ;;  %v6702_v31 = vld [vmem:[#allocation13_spill] sm:$0xff] }
 0x4bc   :  { %v1370_v49 = vmul.f32 %v4909_v16, %v4907_v33 }
 0x4bd   :  { %4912 = vpow2.f32 %v3238_v1 }
 0x4be   :  { %1633 = vmatprep.mubr.f32.mxu0 %v1370_v49  ;;  %1704 = vmatprep.mubr.f32.mxu1 %v1370_v49  ;;  %4914 = vpow2.f32 %v3239_v57  ;;  %v6703_v57 = vld [vmem:[#allocation14_spill] sm:$0xff] }
 0x4c5   :  { %v4911_v30 = vpop.eup %4910 }
 0x4c6   :  { %v1541_v5 = vadd.f32 1.0, %v4911_v30  ;;  %v6704_v30 = vld [vmem:[#allocation15_spill] sm:$0xff] }
 0x4c7   :  { %v4913_v48 = vpop.eup %4912 }
 0x4c8   :  { %4916 = vrcp.f32 %v1541_v5  ;;  %v1550_v22 = vadd.f32 1.0, %v4913_v48  ;;  %v4915_v7 = vpop.eup %4914  ;;  %v6706_v5 = vld [vmem:[#allocation17_spill] sm:$0xff]  ;;  %v6707_v48 = vld [vmem:[#allocation18_spill] sm:$0xff] }
 0x4c9   :  { %4918 = vtanh.f32 %v1553_v63  ;;  %v1561_v59 = vadd.f32 1.0, %v4915_v7  ;;  %v6705_v63 = vld [vmem:[#allocation16_spill] sm:$0xff] }
 0x4ca   :  { %4920 = vrcp.f32 %v1550_v22  ;;  %v6708_v22 = vld [vmem:[#allocation19_spill] sm:$0xff]  ;;  %v6709_v7 = vld [vmem:[#allocation20_spill] sm:$0xff] }
 0x4cb   :  { %4922 = vrcp.f32 %v1561_v59  ;;  %v6713_v59 = vld [vmem:[#allocation24_spill] sm:$0xff] }
 0x4d2   :  { %v4917_v25 = vpop.eup %4916 }
 0x4d3   :  { %v4919_v9 = vpop.eup %4918 }
 0x4d4   :  { %v4921_v43 = vpop.eup %4920  ;;  %v1565_v15 = vmul.f32 %v4919_v9, %v4917_v25  ;;  %v6710_v25 = vld [vmem:[#allocation21_spill] sm:$0xff]  ;;  %v6711_v9 = vld [vmem:[#allocation22_spill] sm:$0xff] }
 0x4d5   :  { %v1564_v16 = vmul.f32 %v4921_v43, %v5770_v62  ;;  %v4923_v46 = vpop.eup %4922  ;;  %v6701_v62 = vld [vmem:[#allocation12_spill] sm:$0xff]  ;;  %v6712_v43 = vld [vmem:[#allocation23_spill] sm:$0xff] }
 0x4d7   :  { %v5882_v33 = vadd.f32 %v1565_v15, %v1564_v16  ;;  %v6714_v16 = vld [vmem:[#allocation25_spill] sm:$0xff]  ;;  %v6715_v15 = vld [vmem:[#allocation26_spill] sm:$0xff] }
 0x4d9   :  { %4924 = vtanh.f32 %v5882_v33 }
 0x4e3   :  { %v4925_v1 = vpop.eup %4924 }
 0x4e4   :  { %v1568_v49 = vmul.f32 %v4925_v1, %v4923_v46  ;;  %v6716_v46 = vld [vmem:[#allocation27_spill] sm:$0xff]  ;;  %v6717_v1 = vld [vmem:[#allocation28_spill] sm:$0xff] }
 0x4e6   :  { %1634 = vmatmul.mubr.f32.vlgmr.msra.gmra.mrb[14].mxu0 %v1568_v49  ;;  %1705 = vmatmul.mubr.f32.vlgmr.msra.gmra.mrb[14].mxu1 %v1568_v49 }
 0x4e7   :  { %4040 = vmatpush1.bf16.msra.mxu0 %v5235_v10  ;;  %4072 = vmatpush1.bf16.msra.mxu1 %v5238_v14 }
 0x4e8   :  { %4042 = vmatprep.subr.bf16.mxu0 %v5242_v18  ;;  %4074 = vmatprep.subr.bf16.mxu1 %v5244_v19 }
 0x4e9   :  { %1801 = vmatprep.mubr.f32.mxu0 %v6526_v6  ;;  %1872 = vmatprep.mubr.f32.mxu1 %v6526_v6 }
 0x4eb   :  { %4044 = vmatpush1.bf16.msra.mxu0 %v5247_v23  ;;  %4076 = vmatpush1.bf16.msra.mxu1 %v5251_v27 }
 0x4ec   :  { %4046 = vmatprep.subr.bf16.mxu0 %v5253_v28  ;;  %4078 = vmatprep.subr.bf16.mxu1 %v5255_v32 }
 0x4ef   :  { %4048 = vmatpush1.bf16.msra.mxu0 %v5258_v36  ;;  %4080 = vmatpush1.bf16.msra.mxu1 %v5262_v40 }
 0x4f0   :  { %4050 = vmatprep.subr.bf16.mxu0 %v5264_v41  ;;  %4082 = vmatprep.subr.bf16.mxu1 %v5267_v45 }
 0x4f3   :  { %4052 = vmatpush1.bf16.msra.mxu0 %v5270_v52  ;;  %4084 = vmatpush1.bf16.msra.mxu1 %v5274_v53 }
 0x4f4   :  { %4054 = vmatprep.subr.bf16.mxu0 %v5276_v54  ;;  %4086 = vmatprep.subr.bf16.mxu1 %v5279_v58 }
 0x4f7   :  { %4056 = vmatpush1.bf16.msra.mxu0 %v5282_v0  ;;  %4088 = vmatpush1.bf16.msra.mxu1 %v5286_v2 }
 0x4f8   :  { %4058 = vmatprep.subr.bf16.mxu0 %v5288_v3  ;;  %4090 = vmatprep.subr.bf16.mxu1 %v5291_v8 }
 0x4fb   :  { %4060 = vmatpush1.bf16.msra.mxu0 %v5294_v17  ;;  %4092 = vmatpush1.bf16.msra.mxu1 %v5298_v20 }
 0x4fc   :  { %4062 = vmatprep.subr.bf16.mxu0 %v5300_v21  ;;  %4094 = vmatprep.subr.bf16.mxu1 %v5303_v26 }
 0x4ff   :  { %4064 = vmatpush1.bf16.msra.mxu0 %v5306_v35  ;;  %4096 = vmatpush1.bf16.msra.mxu1 %v5310_v37 }
 0x500   :  { %4066 = vmatprep.subr.bf16.mxu0 %v5312_v38  ;;  %4098 = vmatprep.subr.bf16.mxu1 %v5315_v44 }
 0x503   :  { %4068 = vmatpush1.bf16.msra.mxu0 %v5318_v51  ;;  %4100 = vmatpush1.bf16.msra.mxu1 %v5322_v55 }
 0x504   :  { %4102 = vmatprep.subr.bf16.mxu0 %v5324_v56  ;;  %4166 = vmatprep.subr.bf16.mxu1 %v5327_v61 }
 0x506   :  { %1802 = vmatmul.mubr.f32.vlgmr.msra.gmra.mrb[16].mxu0 %v1568_v49  ;;  %1873 = vmatmul.mubr.f32.vlgmr.msra.gmra.mrb[16].mxu1 %v1568_v49  ;;  %v6718_v49 = vld [vmem:[#allocation29_spill] sm:$0xff] }
 0x507   :  { %4104 = vmatpush1.bf16.msra.mxu0 %v5330_v11  ;;  %4168 = vmatpush1.bf16.msra.mxu1 %v5334_v12 }
 0x508   :  { %4106 = vmatprep.subr.bf16.mxu0 %v5336_v13  ;;  %4170 = vmatprep.subr.bf16.mxu1 %v5339_v24 }
 0x50b   :  { %4108 = vmatpush1.bf16.msra.mxu0 %v5344_v34  ;;  %4172 = vmatpush1.bf16.msra.mxu1 %v5348_v39 }
 0x50c   :  { %4110 = vmatprep.subr.bf16.mxu0 %v5350_v42  ;;  %4174 = vmatprep.subr.bf16.mxu1 %v5353_v47 }
 0x50f   :  { %4112 = vmatpush1.bf16.msra.mxu0 %v5358_v50  ;;  %4176 = vmatpush1.bf16.msra.mxu1 %v6701_v62 }
 0x510   :  { %4114 = vmatprep.subr.bf16.mxu0 %v6702_v31  ;;  %4178 = vmatprep.subr.bf16.mxu1 %v6703_v57 }
 0x513   :  { %4116 = vmatpush1.bf16.msra.mxu0 %v6704_v30  ;;  %4180 = vmatpush1.bf16.msra.mxu1 %v6705_v63 }
 0x514   :  { %4118 = vmatprep.subr.bf16.mxu0 %v6706_v5  ;;  %4182 = vmatprep.subr.bf16.mxu1 %v6707_v48  ;;  %v6756_v48 = vld [vmem:[#allocation65_spill] sm:$0xff] }
 0x517   :  { %4120 = vmatpush1.bf16.msra.mxu0 %v6708_v22  ;;  %4184 = vmatpush1.bf16.msra.mxu1 %v6709_v7  ;;  %v6719_v22 = vld [vmem:[#allocation30_spill] sm:$0xff]  ;;  %v6720_v7 = vld [vmem:[#allocation31_spill] sm:$0xff] }
 0x518   :  { %4122 = vmatprep.subr.bf16.mxu0 %v6710_v25  ;;  %4186 = vmatprep.subr.bf16.mxu1 %v6711_v9  ;;  %v6721_v25 = vld [vmem:[#allocation32_spill] sm:$0xff]  ;;  %v6722_v9 = vld [vmem:[#allocation33_spill] sm:$0xff] }
 0x51b   :  { %4124 = vmatpush1.bf16.msra.mxu0 %v6712_v43  ;;  %4188 = vmatpush1.bf16.msra.mxu1 %v6713_v59  ;;  %v6723_v43 = vld [vmem:[#allocation34_spill] sm:$0xff]  ;;  %v6724_v59 = vld [vmem:[#allocation35_spill] sm:$0xff] }
 0x51c   :  { %4126 = vmatprep.subr.bf16.mxu0 %v6714_v16  ;;  %4190 = vmatprep.subr.bf16.mxu1 %v6715_v15  ;;  %v6725_v16 = vld [vmem:[#allocation36_spill] sm:$0xff]  ;;  %v6726_v15 = vld [vmem:[#allocation37_spill] sm:$0xff] }
 0x51f   :  { %4128 = vmatpush1.bf16.msra.mxu0 %v6716_v46  ;;  %4192 = vmatpush1.bf16.msra.mxu1 %v6717_v1  ;;  %v6727_v46 = vld [vmem:[#allocation38_spill] sm:$0xff]  ;;  %v6728_v1 = vld [vmem:[#allocation39_spill] sm:$0xff] }
 0x520   :  { %4130 = vmatprep.subr.bf16.mxu0 %v6718_v49  ;;  %4194 = vmatprep.subr.bf16.mxu1 %v6719_v22  ;;  %v6729_v49 = vld [vmem:[#allocation40_spill] sm:$0xff]  ;;  %v6730_v22 = vld [vmem:[#allocation41_spill] sm:$0xff] }
 0x523   :  { %4132 = vmatpush1.bf16.msra.mxu0 %v6720_v7  ;;  %4196 = vmatpush1.bf16.msra.mxu1 %v6721_v25  ;;  %v6731_v7 = vld [vmem:[#allocation42_spill] sm:$0xff]  ;;  %v6732_v25 = vld [vmem:[#allocation43_spill] sm:$0xff] }
 0x524   :  { %4134 = vmatprep.subr.bf16.mxu0 %v6722_v9  ;;  %4198 = vmatprep.subr.bf16.mxu1 %v6723_v43  ;;  %v6733_v9 = vld [vmem:[#allocation44_spill] sm:$0xff]  ;;  %v6734_v43 = vld [vmem:[#allocation45_spill] sm:$0xff] }
 0x527   :  { %4136 = vmatpush1.bf16.msra.mxu0 %v6724_v59  ;;  %4200 = vmatpush1.bf16.msra.mxu1 %v6725_v16  ;;  %v6735_v59 = vld [vmem:[#allocation46_spill] sm:$0xff]  ;;  %v6736_v16 = vld [vmem:[#allocation47_spill] sm:$0xff] }
 0x528   :  { %4138 = vmatprep.subr.bf16.mxu0 %v6726_v15  ;;  %4202 = vmatprep.subr.bf16.mxu1 %v6727_v46  ;;  %v6737_v15 = vld [vmem:[#allocation48_spill] sm:$0xff]  ;;  %v6738_v46 = vld [vmem:[#allocation49_spill] sm:$0xff] }
 0x52b   :  { %4140 = vmatpush1.bf16.msra.mxu0 %v6728_v1  ;;  %4204 = vmatpush1.bf16.msra.mxu1 %v6729_v49  ;;  %v6739_v1 = vld [vmem:[#allocation50_spill] sm:$0xff]  ;;  %v6740_v49 = vld [vmem:[#allocation51_spill] sm:$0xff] }
 0x52c   :  { %4142 = vmatprep.subr.bf16.mxu0 %v6730_v22  ;;  %4206 = vmatprep.subr.bf16.mxu1 %v6731_v7  ;;  %v6741_v22 = vld [vmem:[#allocation52_spill] sm:$0xff]  ;;  %v6742_v7 = vld [vmem:[#allocation53_spill] sm:$0xff] }
 0x52f   :  { %4144 = vmatpush1.bf16.msra.mxu0 %v6732_v25  ;;  %4208 = vmatpush1.bf16.msra.mxu1 %v6733_v9  ;;  %v6743_v25 = vld [vmem:[#allocation54_spill] sm:$0xff]  ;;  %v6744_v9 = vld [vmem:[#allocation55_spill] sm:$0xff] }
 0x530   :  { %4146 = vmatprep.subr.bf16.mxu0 %v6734_v43  ;;  %4210 = vmatprep.subr.bf16.mxu1 %v6735_v59  ;;  %v6745_v43 = vld [vmem:[#allocation56_spill] sm:$0xff]  ;;  %v6746_v59 = vld [vmem:[#allocation57_spill] sm:$0xff] }
 0x533   :  { %4148 = vmatpush1.bf16.msra.mxu0 %v6736_v16  ;;  %4212 = vmatpush1.bf16.msra.mxu1 %v6737_v15  ;;  %v6747_v16 = vld [vmem:[#allocation58_spill] sm:$0xff]  ;;  %v6748_v15 = vld [vmem:[#allocation59_spill] sm:$0xff] }
 0x534   :  { %4150 = vmatprep.subr.bf16.mxu0 %v6738_v46  ;;  %4214 = vmatprep.subr.bf16.mxu1 %v6739_v1  ;;  %v6749_v46 = vld [vmem:[#allocation60_spill] sm:$0xff]  ;;  %v6750_v1 = vld [vmem:[#allocation61_spill] sm:$0xff] }
 0x537   :  { %4152 = vmatpush1.bf16.msra.mxu0 %v6740_v49  ;;  %4216 = vmatpush1.bf16.msra.mxu1 %v6741_v22  ;;  %v6751_v49 = vld [vmem:[#allocation62_spill] sm:$0xff]  ;;  %v6752_v22 = vld [vmem:[#allocation63_spill] sm:$0xff] }
 0x538   :  { %4154 = vmatprep.subr.bf16.mxu0 %v6742_v7  ;;  %4218 = vmatprep.subr.bf16.mxu1 %v6743_v25  ;;  %v6753_v7 = vld [vmem:[#allocation64_spill] sm:$0xff]  ;;  %v6754_v25 = vld [vmem:[#allocation10_spill] sm:$0xff] }
 0x53b   :  { %4156 = vmatpush1.bf16.msra.mxu0 %v6744_v9  ;;  %4220 = vmatpush1.bf16.msra.mxu1 %v6745_v43  ;;  %v6755_v9 = vld [vmem:[#allocation11_spill] sm:$0xff] }
 0x53c   :  { %4158 = vmatprep.subr.bf16.mxu0 %v6746_v59  ;;  %4222 = vmatprep.subr.bf16.mxu1 %v6747_v16 }
 0x53f   :  { %4160 = vmatpush1.bf16.msra.mxu0 %v6748_v15  ;;  %4224 = vmatpush1.bf16.msra.mxu1 %v6749_v46 }
 0x540   :  { %4162 = vmatprep.subr.bf16.mxu0 %v6750_v1  ;;  %4226 = vmatprep.subr.bf16.mxu1 %v6751_v49  ;;  %v6757_v49 = vld [vmem:[#allocation67_spill] sm:$0xff] }
 0x543   :  { %4164 = vmatpush1.bf16.msra.mxu0 %v6752_v22  ;;  %4228 = vmatpush1.bf16.msra.mxu1 %v6753_v7  ;;  %v6758_v7 = vld [vmem:[#allocation68_spill] sm:$0xff] }
 0x544   :  { %4230 = vmatprep.subr.bf16.mxu0 %v6754_v25  ;;  %4262 = vmatprep.subr.bf16.mxu1 %v6755_v9 }
 0x5b9   :  { %v1635_v43 = vpop.f32.mrb[14].mxu0  ;;  %v1706_v59 = vpop.f32.mrb[14].mxu1 }
 0x5ba   :  { %v1636_v16 = vadd.f32 %v1635_v43, %v6756_v48  ;;  %v1637_v5 = vpop.f32.mrb[15].mxu0  ;;  %v1708_v15 = vpop.f32.mrb[15].mxu1  ;;  %v1707_v57 = vadd.f32 %v1706_v59, %v6758_v7 }
 0x5bb   :  { %v1638_v46 = vadd.f32 %v1637_v5, %v6698_v4  ;;  %v1709_v22 = vadd.f32 %v1708_v15, %v6757_v49 }
 0x5bc   :  { %v3240_v63 = vmul.f32 -1.442695, %v1636_v16 }
 0x5bd   :  { %v3241_v1 = vmul.f32 -1.442695, %v1638_v46  ;;  %v3242_v30 = vmul.f32 -1.442695, %v1709_v22 }
 0x5be   :  { %4926 = vpow2.f32 %v3240_v63 }
 0x5bf   :  { %4928 = vpow2.f32 %v3241_v1 }
 0x5c0   :  { %4930 = vpow2.f32 %v3242_v30 }
 0x5c1   :  { %4932 = vtanh.f32 %v1707_v57 }
 0x5c8   :  { %v4927_v25 = vpop.eup %4926 }
 0x5c9   :  { %v4929_v31 = vpop.eup %4928  ;;  %v1714_v9 = vadd.f32 1.0, %v4927_v25 }
 0x5ca   :  { %v1720_v62 = vadd.f32 1.0, %v4929_v31  ;;  %v4931_v43 = vpop.eup %4930 }
 0x5cb   :  { %4934 = vrcp.f32 %v1714_v9  ;;  %v4933_v48 = vpop.eup %4932  ;;  %v1727_v63 = vadd.f32 1.0, %v4931_v43  ;;  %v1736_v9 = vld [vmem:[#allocation3 + $0x20] sm:$0xff] }
 0x5cc   :  { %4936 = vrcp.f32 %v1720_v62 }
 0x5cd   :  { %4938 = vrcp.f32 %v1727_v63 }
 0x5d5   :  { %v4935_v5 = vpop.eup %4934 }
 0x5d6   :  { %v4937_v16 = vpop.eup %4936  ;;  %v1731_v46 = vmul.f32 %v4935_v5, %v4933_v48 }
 0x5d7   :  { %v1730_v1 = vmul.f32 %v4937_v16, %v5876_v60  ;;  %v4939_v16 = vpop.eup %4938 }
 0x5d9   :  { %v1803_v15 = vpop.f32.mrb[16].mxu0  ;;  %v1874_v22 = vpop.f32.mrb[16].mxu1  ;;  %v5988_v49 = vadd.f32 %v1731_v46, %v1730_v1 }
 0x5da   :  { %v1805_v59 = vpop.f32.mrb[17].mxu0  ;;  %v1876_v25 = vpop.f32.mrb[17].mxu1 }
 0x5db   :  { %v1883_v30 = vcombine.low %v1803_v15, %v1805_v59  ;;  %v1884_v57 = vcombine.low %v1874_v22, %v1876_v25  ;;  %4940 = vtanh.f32 %v5988_v49 }
 0x5dd   :  { %v1891_v62 = vrot.slane %v1883_v30, %v5528_v29  ;;  %v1898_v31 = vrot.slane %v1884_v57, %v5528_v29 }
 0x5df   :  { %v1899_v48 = vcombine.low %v1891_v62, %v1898_v31 }
 0x5e1   :  { %v1901_v43 = vadd.f32 %v1899_v48, %v1736_v9 }
 0x5e3   :  { %v3243_v5 = vmul.f32 -1.442695, %v1901_v43  ;;  %v1909_v60 = vrot.slane %v1901_v43, 2  ;;  %v1920_v1 = vrot.slane %v1901_v43, 6  ;;  %v1917_v59 = vrot.slane %v1901_v43, 4 }
 0x5e5   :  { %v4941_v7 = vpop.eup %4940  ;;  %4942 = vpow2.f32 %v3243_v5  ;;  %v3244_v46 = vmul.f32 -1.442695, %v1909_v60  ;;  %v3245_v15 = vmul.f32 -1.442695, %v1920_v1  ;;  %v6760_v1 = vld [vmem:[#allocation13_spill] sm:$0xff] }
 0x5e6   :  { %v1734_v63 = vmul.f32 %v4941_v7, %v4939_v16 }
 0x5e7   :  { %4944 = vpow2.f32 %v3244_v46 }
 0x5e8   :  { %1997 = vmatprep.mubr.f32.mxu0 %v1734_v63  ;;  %2068 = vmatprep.mubr.f32.mxu1 %v1734_v63  ;;  %4946 = vpow2.f32 %v3245_v15  ;;  %v6761_v15 = vld [vmem:[#allocation14_spill] sm:$0xff] }
 0x5ef   :  { %v4943_v22 = vpop.eup %4942 }
 0x5f0   :  { %v1905_v25 = vadd.f32 1.0, %v4943_v22  ;;  %v6762_v22 = vld [vmem:[#allocation15_spill] sm:$0xff] }
 0x5f1   :  { %v4945_v30 = vpop.eup %4944 }
 0x5f2   :  { %4948 = vrcp.f32 %v1905_v25  ;;  %v1914_v57 = vadd.f32 1.0, %v4945_v30  ;;  %v4947_v62 = vpop.eup %4946  ;;  %v6764_v25 = vld [vmem:[#allocation17_spill] sm:$0xff]  ;;  %v6765_v30 = vld [vmem:[#allocation18_spill] sm:$0xff] }
 0x5f3   :  { %4950 = vtanh.f32 %v1917_v59  ;;  %v1925_v5 = vadd.f32 1.0, %v4947_v62  ;;  %v6763_v59 = vld [vmem:[#allocation16_spill] sm:$0xff] }
 0x5f4   :  { %4952 = vrcp.f32 %v1914_v57  ;;  %v6766_v57 = vld [vmem:[#allocation19_spill] sm:$0xff]  ;;  %v6767_v62 = vld [vmem:[#allocation20_spill] sm:$0xff] }
 0x5f5   :  { %4954 = vrcp.f32 %v1925_v5  ;;  %v6771_v5 = vld [vmem:[#allocation24_spill] sm:$0xff] }
 0x5fc   :  { %v4949_v31 = vpop.eup %4948 }
 0x5fd   :  { %v4951_v9 = vpop.eup %4950 }
 0x5fe   :  { %v4953_v48 = vpop.eup %4952  ;;  %v1929_v60 = vmul.f32 %v4951_v9, %v4949_v31  ;;  %v6768_v31 = vld [vmem:[#allocation21_spill] sm:$0xff]  ;;  %v6769_v9 = vld [vmem:[#allocation22_spill] sm:$0xff] }
 0x5ff   :  { %v1928_v7 = vmul.f32 %v4953_v48, %v5882_v33  ;;  %v4955_v43 = vpop.eup %4954  ;;  %v6759_v33 = vld [vmem:[#allocation12_spill] sm:$0xff]  ;;  %v6770_v48 = vld [vmem:[#allocation23_spill] sm:$0xff] }
 0x601   :  { %v5994_v16 = vadd.f32 %v1929_v60, %v1928_v7  ;;  %v6772_v7 = vld [vmem:[#allocation25_spill] sm:$0xff]  ;;  %v6773_v60 = vld [vmem:[#allocation26_spill] sm:$0xff] }
 0x603   :  { %4956 = vtanh.f32 %v5994_v16 }
 0x60d   :  { %v4957_v46 = vpop.eup %4956 }
 0x60e   :  { %v1932_v63 = vmul.f32 %v4957_v46, %v4955_v43  ;;  %v6774_v43 = vld [vmem:[#allocation27_spill] sm:$0xff]  ;;  %v6775_v46 = vld [vmem:[#allocation28_spill] sm:$0xff] }
 0x610   :  { %1998 = vmatmul.mubr.f32.vlgmr.msra.gmra.mrb[18].mxu0 %v1932_v63  ;;  %2069 = vmatmul.mubr.f32.vlgmr.msra.gmra.mrb[18].mxu1 %v1932_v63 }
 0x611   :  { %4232 = vmatpush1.bf16.msra.mxu0 %v5235_v10  ;;  %4264 = vmatpush1.bf16.msra.mxu1 %v5238_v14 }
 0x612   :  { %4234 = vmatprep.subr.bf16.mxu0 %v5242_v18  ;;  %4266 = vmatprep.subr.bf16.mxu1 %v5244_v19 }
 0x613   :  { %2165 = vmatprep.mubr.f32.mxu0 %v6526_v6  ;;  %2236 = vmatprep.mubr.f32.mxu1 %v6526_v6 }
 0x615   :  { %4236 = vmatpush1.bf16.msra.mxu0 %v5247_v23  ;;  %4268 = vmatpush1.bf16.msra.mxu1 %v5251_v27 }
 0x616   :  { %4238 = vmatprep.subr.bf16.mxu0 %v5253_v28  ;;  %4270 = vmatprep.subr.bf16.mxu1 %v5255_v32 }
 0x619   :  { %4240 = vmatpush1.bf16.msra.mxu0 %v5258_v36  ;;  %4272 = vmatpush1.bf16.msra.mxu1 %v5262_v40 }
 0x61a   :  { %4242 = vmatprep.subr.bf16.mxu0 %v5264_v41  ;;  %4274 = vmatprep.subr.bf16.mxu1 %v5267_v45 }
 0x61d   :  { %4244 = vmatpush1.bf16.msra.mxu0 %v5270_v52  ;;  %4276 = vmatpush1.bf16.msra.mxu1 %v5274_v53 }
 0x61e   :  { %4246 = vmatprep.subr.bf16.mxu0 %v5276_v54  ;;  %4278 = vmatprep.subr.bf16.mxu1 %v5279_v58 }
 0x621   :  { %4248 = vmatpush1.bf16.msra.mxu0 %v5282_v0  ;;  %4280 = vmatpush1.bf16.msra.mxu1 %v5286_v2 }
 0x622   :  { %4250 = vmatprep.subr.bf16.mxu0 %v5288_v3  ;;  %4282 = vmatprep.subr.bf16.mxu1 %v5291_v8 }
 0x625   :  { %4252 = vmatpush1.bf16.msra.mxu0 %v5294_v17  ;;  %4284 = vmatpush1.bf16.msra.mxu1 %v5298_v20 }
 0x626   :  { %4254 = vmatprep.subr.bf16.mxu0 %v5300_v21  ;;  %4286 = vmatprep.subr.bf16.mxu1 %v5303_v26 }
 0x629   :  { %4256 = vmatpush1.bf16.msra.mxu0 %v5306_v35  ;;  %4288 = vmatpush1.bf16.msra.mxu1 %v5310_v37 }
 0x62a   :  { %4258 = vmatprep.subr.bf16.mxu0 %v5312_v38  ;;  %4290 = vmatprep.subr.bf16.mxu1 %v5315_v44 }
 0x62d   :  { %4260 = vmatpush1.bf16.msra.mxu0 %v5318_v51  ;;  %4292 = vmatpush1.bf16.msra.mxu1 %v5322_v55 }
 0x62e   :  { %4294 = vmatprep.subr.bf16.mxu0 %v5324_v56  ;;  %4358 = vmatprep.subr.bf16.mxu1 %v5327_v61 }
 0x630   :  { %2166 = vmatmul.mubr.f32.vlgmr.msra.gmra.mrb[20].mxu0 %v1932_v63  ;;  %2237 = vmatmul.mubr.f32.vlgmr.msra.gmra.mrb[20].mxu1 %v1932_v63  ;;  %v6776_v63 = vld [vmem:[#allocation29_spill] sm:$0xff] }
 0x631   :  { %4296 = vmatpush1.bf16.msra.mxu0 %v5330_v11  ;;  %4360 = vmatpush1.bf16.msra.mxu1 %v5334_v12 }
 0x632   :  { %4298 = vmatprep.subr.bf16.mxu0 %v5336_v13  ;;  %4362 = vmatprep.subr.bf16.mxu1 %v5339_v24 }
 0x635   :  { %4300 = vmatpush1.bf16.msra.mxu0 %v5344_v34  ;;  %4364 = vmatpush1.bf16.msra.mxu1 %v5348_v39 }
 0x636   :  { %4302 = vmatprep.subr.bf16.mxu0 %v5350_v42  ;;  %4366 = vmatprep.subr.bf16.mxu1 %v5353_v47 }
 0x639   :  { %4304 = vmatpush1.bf16.msra.mxu0 %v5358_v50  ;;  %4368 = vmatpush1.bf16.msra.mxu1 %v6759_v33 }
 0x63a   :  { %4306 = vmatprep.subr.bf16.mxu0 %v6760_v1  ;;  %4370 = vmatprep.subr.bf16.mxu1 %v6761_v15 }
 0x63d   :  { %4308 = vmatpush1.bf16.msra.mxu0 %v6762_v22  ;;  %4372 = vmatpush1.bf16.msra.mxu1 %v6763_v59 }
 0x63e   :  { %4310 = vmatprep.subr.bf16.mxu0 %v6764_v25  ;;  %4374 = vmatprep.subr.bf16.mxu1 %v6765_v30  ;;  %v6814_v30 = vld [vmem:[#allocation65_spill] sm:$0xff] }
 0x641   :  { %4312 = vmatpush1.bf16.msra.mxu0 %v6766_v57  ;;  %4376 = vmatpush1.bf16.msra.mxu1 %v6767_v62  ;;  %v6777_v57 = vld [vmem:[#allocation30_spill] sm:$0xff]  ;;  %v6778_v62 = vld [vmem:[#allocation31_spill] sm:$0xff] }
 0x642   :  { %4314 = vmatprep.subr.bf16.mxu0 %v6768_v31  ;;  %4378 = vmatprep.subr.bf16.mxu1 %v6769_v9  ;;  %v6779_v31 = vld [vmem:[#allocation32_spill] sm:$0xff]  ;;  %v6780_v9 = vld [vmem:[#allocation33_spill] sm:$0xff] }
 0x645   :  { %4316 = vmatpush1.bf16.msra.mxu0 %v6770_v48  ;;  %4380 = vmatpush1.bf16.msra.mxu1 %v6771_v5  ;;  %v6781_v48 = vld [vmem:[#allocation34_spill] sm:$0xff]  ;;  %v6782_v5 = vld [vmem:[#allocation35_spill] sm:$0xff] }
 0x646   :  { %4318 = vmatprep.subr.bf16.mxu0 %v6772_v7  ;;  %4382 = vmatprep.subr.bf16.mxu1 %v6773_v60  ;;  %v6783_v7 = vld [vmem:[#allocation36_spill] sm:$0xff]  ;;  %v6784_v60 = vld [vmem:[#allocation37_spill] sm:$0xff] }
 0x649   :  { %4320 = vmatpush1.bf16.msra.mxu0 %v6774_v43  ;;  %4384 = vmatpush1.bf16.msra.mxu1 %v6775_v46  ;;  %v6785_v43 = vld [vmem:[#allocation38_spill] sm:$0xff]  ;;  %v6786_v46 = vld [vmem:[#allocation39_spill] sm:$0xff] }
 0x64a   :  { %4322 = vmatprep.subr.bf16.mxu0 %v6776_v63  ;;  %4386 = vmatprep.subr.bf16.mxu1 %v6777_v57  ;;  %v6787_v63 = vld [vmem:[#allocation40_spill] sm:$0xff]  ;;  %v6788_v57 = vld [vmem:[#allocation41_spill] sm:$0xff] }
 0x64d   :  { %4324 = vmatpush1.bf16.msra.mxu0 %v6778_v62  ;;  %4388 = vmatpush1.bf16.msra.mxu1 %v6779_v31  ;;  %v6789_v62 = vld [vmem:[#allocation42_spill] sm:$0xff]  ;;  %v6790_v31 = vld [vmem:[#allocation43_spill] sm:$0xff] }
 0x64e   :  { %4326 = vmatprep.subr.bf16.mxu0 %v6780_v9  ;;  %4390 = vmatprep.subr.bf16.mxu1 %v6781_v48  ;;  %v6791_v9 = vld [vmem:[#allocation44_spill] sm:$0xff]  ;;  %v6792_v48 = vld [vmem:[#allocation45_spill] sm:$0xff] }
 0x651   :  { %4328 = vmatpush1.bf16.msra.mxu0 %v6782_v5  ;;  %4392 = vmatpush1.bf16.msra.mxu1 %v6783_v7  ;;  %v6793_v5 = vld [vmem:[#allocation46_spill] sm:$0xff]  ;;  %v6794_v7 = vld [vmem:[#allocation47_spill] sm:$0xff] }
 0x652   :  { %4330 = vmatprep.subr.bf16.mxu0 %v6784_v60  ;;  %4394 = vmatprep.subr.bf16.mxu1 %v6785_v43  ;;  %v6795_v60 = vld [vmem:[#allocation48_spill] sm:$0xff]  ;;  %v6796_v43 = vld [vmem:[#allocation49_spill] sm:$0xff] }
 0x655   :  { %4332 = vmatpush1.bf16.msra.mxu0 %v6786_v46  ;;  %4396 = vmatpush1.bf16.msra.mxu1 %v6787_v63  ;;  %v6797_v46 = vld [vmem:[#allocation50_spill] sm:$0xff]  ;;  %v6798_v63 = vld [vmem:[#allocation51_spill] sm:$0xff] }
 0x656   :  { %4334 = vmatprep.subr.bf16.mxu0 %v6788_v57  ;;  %4398 = vmatprep.subr.bf16.mxu1 %v6789_v62  ;;  %v6799_v57 = vld [vmem:[#allocation52_spill] sm:$0xff]  ;;  %v6800_v62 = vld [vmem:[#allocation53_spill] sm:$0xff] }
 0x659   :  { %4336 = vmatpush1.bf16.msra.mxu0 %v6790_v31  ;;  %4400 = vmatpush1.bf16.msra.mxu1 %v6791_v9  ;;  %v6801_v31 = vld [vmem:[#allocation54_spill] sm:$0xff]  ;;  %v6802_v9 = vld [vmem:[#allocation55_spill] sm:$0xff] }
 0x65a   :  { %4338 = vmatprep.subr.bf16.mxu0 %v6792_v48  ;;  %4402 = vmatprep.subr.bf16.mxu1 %v6793_v5  ;;  %v6803_v48 = vld [vmem:[#allocation56_spill] sm:$0xff]  ;;  %v6804_v5 = vld [vmem:[#allocation57_spill] sm:$0xff] }
 0x65d   :  { %4340 = vmatpush1.bf16.msra.mxu0 %v6794_v7  ;;  %4404 = vmatpush1.bf16.msra.mxu1 %v6795_v60  ;;  %v6805_v7 = vld [vmem:[#allocation58_spill] sm:$0xff]  ;;  %v6806_v60 = vld [vmem:[#allocation59_spill] sm:$0xff] }
 0x65e   :  { %4342 = vmatprep.subr.bf16.mxu0 %v6796_v43  ;;  %4406 = vmatprep.subr.bf16.mxu1 %v6797_v46  ;;  %v6807_v43 = vld [vmem:[#allocation60_spill] sm:$0xff]  ;;  %v6808_v46 = vld [vmem:[#allocation61_spill] sm:$0xff] }
 0x661   :  { %4344 = vmatpush1.bf16.msra.mxu0 %v6798_v63  ;;  %4408 = vmatpush1.bf16.msra.mxu1 %v6799_v57  ;;  %v6809_v63 = vld [vmem:[#allocation62_spill] sm:$0xff]  ;;  %v6810_v57 = vld [vmem:[#allocation63_spill] sm:$0xff] }
 0x662   :  { %4346 = vmatprep.subr.bf16.mxu0 %v6800_v62  ;;  %4410 = vmatprep.subr.bf16.mxu1 %v6801_v31  ;;  %v6811_v62 = vld [vmem:[#allocation64_spill] sm:$0xff]  ;;  %v6812_v31 = vld [vmem:[#allocation10_spill] sm:$0xff] }
 0x665   :  { %4348 = vmatpush1.bf16.msra.mxu0 %v6802_v9  ;;  %4412 = vmatpush1.bf16.msra.mxu1 %v6803_v48  ;;  %v6813_v9 = vld [vmem:[#allocation11_spill] sm:$0xff] }
 0x666   :  { %4350 = vmatprep.subr.bf16.mxu0 %v6804_v5  ;;  %4414 = vmatprep.subr.bf16.mxu1 %v6805_v7 }
 0x669   :  { %4352 = vmatpush1.bf16.msra.mxu0 %v6806_v60  ;;  %4416 = vmatpush1.bf16.msra.mxu1 %v6807_v43 }
 0x66a   :  { %4354 = vmatprep.subr.bf16.mxu0 %v6808_v46  ;;  %4418 = vmatprep.subr.bf16.mxu1 %v6809_v63  ;;  %v6815_v63 = vld [vmem:[#allocation67_spill] sm:$0xff] }
 0x66d   :  { %4356 = vmatpush1.bf16.msra.mxu0 %v6810_v57  ;;  %4420 = vmatpush1.bf16.msra.mxu1 %v6811_v62  ;;  %v6816_v62 = vld [vmem:[#allocation68_spill] sm:$0xff] }
 0x66e   :  { %4422 = vmatprep.subr.bf16.mxu0 %v6812_v31  ;;  %4454 = vmatprep.subr.bf16.mxu1 %v6813_v9 }
 0x6e3   :  { %v1999_v48 = vpop.f32.mrb[18].mxu0  ;;  %v2070_v5 = vpop.f32.mrb[18].mxu1 }
 0x6e4   :  { %v2000_v7 = vadd.f32 %v1999_v48, %v6814_v30  ;;  %v2001_v25 = vpop.f32.mrb[19].mxu0  ;;  %v2072_v60 = vpop.f32.mrb[19].mxu1  ;;  %v2071_v15 = vadd.f32 %v2070_v5, %v6816_v62 }
 0x6e5   :  { %v2002_v43 = vadd.f32 %v2001_v25, %v6698_v4  ;;  %v2073_v57 = vadd.f32 %v2072_v60, %v6815_v63 }
 0x6e6   :  { %v3246_v59 = vmul.f32 -1.442695, %v2000_v7 }
 0x6e7   :  { %v3247_v46 = vmul.f32 -1.442695, %v2002_v43  ;;  %v3248_v22 = vmul.f32 -1.442695, %v2073_v57 }
 0x6e8   :  { %4958 = vpow2.f32 %v3246_v59 }
 0x6e9   :  { %4960 = vpow2.f32 %v3247_v46 }
 0x6ea   :  { %4962 = vpow2.f32 %v3248_v22 }
 0x6eb   :  { %4964 = vtanh.f32 %v2071_v15 }
 0x6f2   :  { %v4959_v31 = vpop.eup %4958 }
 0x6f3   :  { %v4961_v1 = vpop.eup %4960  ;;  %v2078_v9 = vadd.f32 1.0, %v4959_v31 }
 0x6f4   :  { %v2084_v33 = vadd.f32 1.0, %v4961_v1  ;;  %v4963_v48 = vpop.eup %4962 }
 0x6f5   :  { %4966 = vrcp.f32 %v2078_v9  ;;  %v4965_v30 = vpop.eup %4964  ;;  %v2091_v59 = vadd.f32 1.0, %v4963_v48  ;;  %v2100_v9 = vld [vmem:[#allocation3 + $0x28] sm:$0xff] }
 0x6f6   :  { %4968 = vrcp.f32 %v2084_v33 }
 0x6f7   :  { %4970 = vrcp.f32 %v2091_v59 }
 0x6ff   :  { %v4967_v25 = vpop.eup %4966 }
 0x700   :  { %v4969_v7 = vpop.eup %4968  ;;  %v2095_v43 = vmul.f32 %v4967_v25, %v4965_v30 }
 0x701   :  { %v2094_v46 = vmul.f32 %v4969_v7, %v5988_v49  ;;  %v4971_v7 = vpop.eup %4970 }
 0x703   :  { %v2167_v60 = vpop.f32.mrb[20].mxu0  ;;  %v2238_v57 = vpop.f32.mrb[20].mxu1  ;;  %v6100_v63 = vadd.f32 %v2095_v43, %v2094_v46 }
 0x704   :  { %v2169_v5 = vpop.f32.mrb[21].mxu0  ;;  %v2240_v31 = vpop.f32.mrb[21].mxu1 }
 0x705   :  { %v2247_v22 = vcombine.low %v2167_v60, %v2169_v5  ;;  %v2248_v15 = vcombine.low %v2238_v57, %v2240_v31  ;;  %4972 = vtanh.f32 %v6100_v63 }
 0x707   :  { %v2255_v33 = vrot.slane %v2247_v22, %v5528_v29  ;;  %v2262_v1 = vrot.slane %v2248_v15, %v5528_v29 }
 0x709   :  { %v2263_v30 = vcombine.low %v2255_v33, %v2262_v1 }
 0x70b   :  { %v2265_v48 = vadd.f32 %v2263_v30, %v2100_v9 }
 0x70d   :  { %v3249_v25 = vmul.f32 -1.442695, %v2265_v48  ;;  %v2273_v49 = vrot.slane %v2265_v48, 2  ;;  %v2284_v46 = vrot.slane %v2265_v48, 6  ;;  %v2281_v5 = vrot.slane %v2265_v48, 4 }
 0x70f   :  { %v4973_v62 = vpop.eup %4972  ;;  %4974 = vpow2.f32 %v3249_v25  ;;  %v3250_v43 = vmul.f32 -1.442695, %v2273_v49  ;;  %v3251_v60 = vmul.f32 -1.442695, %v2284_v46  ;;  %v6818_v46 = vld [vmem:[#allocation13_spill] sm:$0xff] }
 0x710   :  { %v2098_v59 = vmul.f32 %v4973_v62, %v4971_v7 }
 0x711   :  { %4976 = vpow2.f32 %v3250_v43 }
 0x712   :  { %2361 = vmatprep.mubr.f32.mxu0 %v2098_v59  ;;  %2432 = vmatprep.mubr.f32.mxu1 %v2098_v59  ;;  %4978 = vpow2.f32 %v3251_v60  ;;  %v6819_v60 = vld [vmem:[#allocation14_spill] sm:$0xff] }
 0x719   :  { %v4975_v57 = vpop.eup %4974 }
 0x71a   :  { %v2269_v31 = vadd.f32 1.0, %v4975_v57  ;;  %v6820_v57 = vld [vmem:[#allocation15_spill] sm:$0xff] }
 0x71b   :  { %v4977_v22 = vpop.eup %4976 }
 0x71c   :  { %4980 = vrcp.f32 %v2269_v31  ;;  %v2278_v15 = vadd.f32 1.0, %v4977_v22  ;;  %v4979_v33 = vpop.eup %4978  ;;  %v6822_v31 = vld [vmem:[#allocation17_spill] sm:$0xff]  ;;  %v6823_v22 = vld [vmem:[#allocation18_spill] sm:$0xff] }
 0x71d   :  { %4982 = vtanh.f32 %v2281_v5  ;;  %v2289_v25 = vadd.f32 1.0, %v4979_v33  ;;  %v6821_v5 = vld [vmem:[#allocation16_spill] sm:$0xff] }
 0x71e   :  { %4984 = vrcp.f32 %v2278_v15  ;;  %v6824_v15 = vld [vmem:[#allocation19_spill] sm:$0xff]  ;;  %v6825_v33 = vld [vmem:[#allocation20_spill] sm:$0xff] }
 0x71f   :  { %4986 = vrcp.f32 %v2289_v25  ;;  %v6829_v25 = vld [vmem:[#allocation24_spill] sm:$0xff] }
 0x726   :  { %v4981_v1 = vpop.eup %4980 }
 0x727   :  { %v4983_v9 = vpop.eup %4982 }
 0x728   :  { %v4985_v30 = vpop.eup %4984  ;;  %v2293_v49 = vmul.f32 %v4983_v9, %v4981_v1  ;;  %v6826_v1 = vld [vmem:[#allocation21_spill] sm:$0xff]  ;;  %v6827_v9 = vld [vmem:[#allocation22_spill] sm:$0xff] }
 0x729   :  { %v2292_v62 = vmul.f32 %v4985_v30, %v5994_v16  ;;  %v4987_v48 = vpop.eup %4986  ;;  %v6817_v16 = vld [vmem:[#allocation12_spill] sm:$0xff]  ;;  %v6828_v30 = vld [vmem:[#allocation23_spill] sm:$0xff] }
 0x72b   :  { %v6106_v7 = vadd.f32 %v2293_v49, %v2292_v62  ;;  %v6830_v62 = vld [vmem:[#allocation25_spill] sm:$0xff]  ;;  %v6831_v49 = vld [vmem:[#allocation26_spill] sm:$0xff] }
 0x72d   :  { %4988 = vtanh.f32 %v6106_v7 }
 0x737   :  { %v4989_v43 = vpop.eup %4988 }
 0x738   :  { %v2296_v59 = vmul.f32 %v4989_v43, %v4987_v48  ;;  %v6832_v48 = vld [vmem:[#allocation27_spill] sm:$0xff]  ;;  %v6833_v43 = vld [vmem:[#allocation28_spill] sm:$0xff] }
 0x73a   :  { %2362 = vmatmul.mubr.f32.vlgmr.msra.gmra.mrb[22].mxu0 %v2296_v59  ;;  %2433 = vmatmul.mubr.f32.vlgmr.msra.gmra.mrb[22].mxu1 %v2296_v59 }
 0x73b   :  { %4424 = vmatpush1.bf16.msra.mxu0 %v5235_v10  ;;  %4456 = vmatpush1.bf16.msra.mxu1 %v5238_v14 }
 0x73c   :  { %4426 = vmatprep.subr.bf16.mxu0 %v5242_v18  ;;  %4458 = vmatprep.subr.bf16.mxu1 %v5244_v19 }
 0x73d   :  { %2529 = vmatprep.mubr.f32.mxu0 %v6526_v6  ;;  %2600 = vmatprep.mubr.f32.mxu1 %v6526_v6 }
 0x73f   :  { %4428 = vmatpush1.bf16.msra.mxu0 %v5247_v23  ;;  %4460 = vmatpush1.bf16.msra.mxu1 %v5251_v27 }
 0x740   :  { %4430 = vmatprep.subr.bf16.mxu0 %v5253_v28  ;;  %4462 = vmatprep.subr.bf16.mxu1 %v5255_v32 }
 0x743   :  { %4432 = vmatpush1.bf16.msra.mxu0 %v5258_v36  ;;  %4464 = vmatpush1.bf16.msra.mxu1 %v5262_v40 }
 0x744   :  { %4434 = vmatprep.subr.bf16.mxu0 %v5264_v41  ;;  %4466 = vmatprep.subr.bf16.mxu1 %v5267_v45 }
 0x747   :  { %4436 = vmatpush1.bf16.msra.mxu0 %v5270_v52  ;;  %4468 = vmatpush1.bf16.msra.mxu1 %v5274_v53 }
 0x748   :  { %4438 = vmatprep.subr.bf16.mxu0 %v5276_v54  ;;  %4470 = vmatprep.subr.bf16.mxu1 %v5279_v58 }
 0x74b   :  { %4440 = vmatpush1.bf16.msra.mxu0 %v5282_v0  ;;  %4472 = vmatpush1.bf16.msra.mxu1 %v5286_v2 }
 0x74c   :  { %4442 = vmatprep.subr.bf16.mxu0 %v5288_v3  ;;  %4474 = vmatprep.subr.bf16.mxu1 %v5291_v8 }
 0x74f   :  { %4444 = vmatpush1.bf16.msra.mxu0 %v5294_v17  ;;  %4476 = vmatpush1.bf16.msra.mxu1 %v5298_v20 }
 0x750   :  { %4446 = vmatprep.subr.bf16.mxu0 %v5300_v21  ;;  %4478 = vmatprep.subr.bf16.mxu1 %v5303_v26 }
 0x753   :  { %4448 = vmatpush1.bf16.msra.mxu0 %v5306_v35  ;;  %4480 = vmatpush1.bf16.msra.mxu1 %v5310_v37 }
 0x754   :  { %4450 = vmatprep.subr.bf16.mxu0 %v5312_v38  ;;  %4482 = vmatprep.subr.bf16.mxu1 %v5315_v44 }
 0x757   :  { %4452 = vmatpush1.bf16.msra.mxu0 %v5318_v51  ;;  %4484 = vmatpush1.bf16.msra.mxu1 %v5322_v55 }
 0x758   :  { %4486 = vmatprep.subr.bf16.mxu0 %v5324_v56  ;;  %4550 = vmatprep.subr.bf16.mxu1 %v5327_v61 }
 0x75a   :  { %2530 = vmatmul.mubr.f32.vlgmr.msra.gmra.mrb[24].mxu0 %v2296_v59  ;;  %2601 = vmatmul.mubr.f32.vlgmr.msra.gmra.mrb[24].mxu1 %v2296_v59  ;;  %v6834_v59 = vld [vmem:[#allocation29_spill] sm:$0xff] }
 0x75b   :  { %4488 = vmatpush1.bf16.msra.mxu0 %v5330_v11  ;;  %4552 = vmatpush1.bf16.msra.mxu1 %v5334_v12 }
 0x75c   :  { %4490 = vmatprep.subr.bf16.mxu0 %v5336_v13  ;;  %4554 = vmatprep.subr.bf16.mxu1 %v5339_v24 }
 0x75f   :  { %4492 = vmatpush1.bf16.msra.mxu0 %v5344_v34  ;;  %4556 = vmatpush1.bf16.msra.mxu1 %v5348_v39 }
 0x760   :  { %4494 = vmatprep.subr.bf16.mxu0 %v5350_v42  ;;  %4558 = vmatprep.subr.bf16.mxu1 %v5353_v47 }
 0x763   :  { %4496 = vmatpush1.bf16.msra.mxu0 %v5358_v50  ;;  %4560 = vmatpush1.bf16.msra.mxu1 %v6817_v16 }
 0x764   :  { %4498 = vmatprep.subr.bf16.mxu0 %v6818_v46  ;;  %4562 = vmatprep.subr.bf16.mxu1 %v6819_v60 }
 0x767   :  { %4500 = vmatpush1.bf16.msra.mxu0 %v6820_v57  ;;  %4564 = vmatpush1.bf16.msra.mxu1 %v6821_v5 }
 0x768   :  { %4502 = vmatprep.subr.bf16.mxu0 %v6822_v31  ;;  %4566 = vmatprep.subr.bf16.mxu1 %v6823_v22  ;;  %v6872_v22 = vld [vmem:[#allocation65_spill] sm:$0xff] }
 0x76b   :  { %4504 = vmatpush1.bf16.msra.mxu0 %v6824_v15  ;;  %4568 = vmatpush1.bf16.msra.mxu1 %v6825_v33  ;;  %v6835_v15 = vld [vmem:[#allocation30_spill] sm:$0xff]  ;;  %v6836_v33 = vld [vmem:[#allocation31_spill] sm:$0xff] }
 0x76c   :  { %4506 = vmatprep.subr.bf16.mxu0 %v6826_v1  ;;  %4570 = vmatprep.subr.bf16.mxu1 %v6827_v9  ;;  %v6837_v1 = vld [vmem:[#allocation32_spill] sm:$0xff]  ;;  %v6838_v9 = vld [vmem:[#allocation33_spill] sm:$0xff] }
 0x76f   :  { %4508 = vmatpush1.bf16.msra.mxu0 %v6828_v30  ;;  %4572 = vmatpush1.bf16.msra.mxu1 %v6829_v25  ;;  %v6839_v30 = vld [vmem:[#allocation34_spill] sm:$0xff]  ;;  %v6840_v25 = vld [vmem:[#allocation35_spill] sm:$0xff] }
 0x770   :  { %4510 = vmatprep.subr.bf16.mxu0 %v6830_v62  ;;  %4574 = vmatprep.subr.bf16.mxu1 %v6831_v49  ;;  %v6841_v62 = vld [vmem:[#allocation36_spill] sm:$0xff]  ;;  %v6842_v49 = vld [vmem:[#allocation37_spill] sm:$0xff] }
 0x773   :  { %4512 = vmatpush1.bf16.msra.mxu0 %v6832_v48  ;;  %4576 = vmatpush1.bf16.msra.mxu1 %v6833_v43  ;;  %v6843_v48 = vld [vmem:[#allocation38_spill] sm:$0xff]  ;;  %v6844_v43 = vld [vmem:[#allocation39_spill] sm:$0xff] }
 0x774   :  { %4514 = vmatprep.subr.bf16.mxu0 %v6834_v59  ;;  %4578 = vmatprep.subr.bf16.mxu1 %v6835_v15  ;;  %v6845_v59 = vld [vmem:[#allocation40_spill] sm:$0xff]  ;;  %v6846_v15 = vld [vmem:[#allocation41_spill] sm:$0xff] }
 0x777   :  { %4516 = vmatpush1.bf16.msra.mxu0 %v6836_v33  ;;  %4580 = vmatpush1.bf16.msra.mxu1 %v6837_v1  ;;  %v6847_v33 = vld [vmem:[#allocation42_spill] sm:$0xff]  ;;  %v6848_v1 = vld [vmem:[#allocation43_spill] sm:$0xff] }
 0x778   :  { %4518 = vmatprep.subr.bf16.mxu0 %v6838_v9  ;;  %4582 = vmatprep.subr.bf16.mxu1 %v6839_v30  ;;  %v6849_v9 = vld [vmem:[#allocation44_spill] sm:$0xff]  ;;  %v6850_v30 = vld [vmem:[#allocation45_spill] sm:$0xff] }
 0x77b   :  { %4520 = vmatpush1.bf16.msra.mxu0 %v6840_v25  ;;  %4584 = vmatpush1.bf16.msra.mxu1 %v6841_v62  ;;  %v6851_v25 = vld [vmem:[#allocation46_spill] sm:$0xff]  ;;  %v6852_v62 = vld [vmem:[#allocation47_spill] sm:$0xff] }
 0x77c   :  { %4522 = vmatprep.subr.bf16.mxu0 %v6842_v49  ;;  %4586 = vmatprep.subr.bf16.mxu1 %v6843_v48  ;;  %v6853_v49 = vld [vmem:[#allocation48_spill] sm:$0xff]  ;;  %v6854_v48 = vld [vmem:[#allocation49_spill] sm:$0xff] }
 0x77f   :  { %4524 = vmatpush1.bf16.msra.mxu0 %v6844_v43  ;;  %4588 = vmatpush1.bf16.msra.mxu1 %v6845_v59  ;;  %v6855_v43 = vld [vmem:[#allocation50_spill] sm:$0xff]  ;;  %v6856_v59 = vld [vmem:[#allocation51_spill] sm:$0xff] }
 0x780   :  { %4526 = vmatprep.subr.bf16.mxu0 %v6846_v15  ;;  %4590 = vmatprep.subr.bf16.mxu1 %v6847_v33  ;;  %v6857_v15 = vld [vmem:[#allocation52_spill] sm:$0xff]  ;;  %v6858_v33 = vld [vmem:[#allocation53_spill] sm:$0xff] }
 0x783   :  { %4528 = vmatpush1.bf16.msra.mxu0 %v6848_v1  ;;  %4592 = vmatpush1.bf16.msra.mxu1 %v6849_v9  ;;  %v6859_v1 = vld [vmem:[#allocation54_spill] sm:$0xff]  ;;  %v6860_v9 = vld [vmem:[#allocation55_spill] sm:$0xff] }
 0x784   :  { %4530 = vmatprep.subr.bf16.mxu0 %v6850_v30  ;;  %4594 = vmatprep.subr.bf16.mxu1 %v6851_v25  ;;  %v6861_v30 = vld [vmem:[#allocation56_spill] sm:$0xff]  ;;  %v6862_v25 = vld [vmem:[#allocation57_spill] sm:$0xff] }
 0x787   :  { %4532 = vmatpush1.bf16.msra.mxu0 %v6852_v62  ;;  %4596 = vmatpush1.bf16.msra.mxu1 %v6853_v49  ;;  %v6863_v62 = vld [vmem:[#allocation58_spill] sm:$0xff]  ;;  %v6864_v49 = vld [vmem:[#allocation59_spill] sm:$0xff] }
 0x788   :  { %4534 = vmatprep.subr.bf16.mxu0 %v6854_v48  ;;  %4598 = vmatprep.subr.bf16.mxu1 %v6855_v43  ;;  %v6865_v48 = vld [vmem:[#allocation60_spill] sm:$0xff]  ;;  %v6866_v43 = vld [vmem:[#allocation61_spill] sm:$0xff] }
 0x78b   :  { %4536 = vmatpush1.bf16.msra.mxu0 %v6856_v59  ;;  %4600 = vmatpush1.bf16.msra.mxu1 %v6857_v15  ;;  %v6867_v59 = vld [vmem:[#allocation62_spill] sm:$0xff]  ;;  %v6868_v15 = vld [vmem:[#allocation63_spill] sm:$0xff] }
 0x78c   :  { %4538 = vmatprep.subr.bf16.mxu0 %v6858_v33  ;;  %4602 = vmatprep.subr.bf16.mxu1 %v6859_v1  ;;  %v6869_v33 = vld [vmem:[#allocation64_spill] sm:$0xff]  ;;  %v6870_v1 = vld [vmem:[#allocation10_spill] sm:$0xff] }
 0x78f   :  { %4540 = vmatpush1.bf16.msra.mxu0 %v6860_v9  ;;  %4604 = vmatpush1.bf16.msra.mxu1 %v6861_v30  ;;  %v6871_v9 = vld [vmem:[#allocation11_spill] sm:$0xff] }
 0x790   :  { %4542 = vmatprep.subr.bf16.mxu0 %v6862_v25  ;;  %4606 = vmatprep.subr.bf16.mxu1 %v6863_v62 }
 0x793   :  { %4544 = vmatpush1.bf16.msra.mxu0 %v6864_v49  ;;  %4608 = vmatpush1.bf16.msra.mxu1 %v6865_v48 }
 0x794   :  { %4546 = vmatprep.subr.bf16.mxu0 %v6866_v43  ;;  %4610 = vmatprep.subr.bf16.mxu1 %v6867_v59  ;;  %v6873_v59 = vld [vmem:[#allocation67_spill] sm:$0xff] }
 0x797   :  { %4548 = vmatpush1.bf16.msra.mxu0 %v6868_v15  ;;  %4612 = vmatpush1.bf16.msra.mxu1 %v6869_v33  ;;  %v6874_v33 = vld [vmem:[#allocation68_spill] sm:$0xff] }
 0x798   :  { %4614 = vmatprep.subr.bf16.mxu0 %v6870_v1  ;;  %4646 = vmatprep.subr.bf16.mxu1 %v6871_v9 }
 0x80d   :  { %v2363_v30 = vpop.f32.mrb[22].mxu0  ;;  %v2434_v25 = vpop.f32.mrb[22].mxu1 }
 0x80e   :  { %v2364_v62 = vadd.f32 %v2363_v30, %v6872_v22  ;;  %v2365_v31 = vpop.f32.mrb[23].mxu0  ;;  %v2436_v49 = vpop.f32.mrb[23].mxu1  ;;  %v2435_v60 = vadd.f32 %v2434_v25, %v6874_v33 }
 0x80f   :  { %v2366_v48 = vadd.f32 %v2365_v31, %v6698_v4  ;;  %v2437_v15 = vadd.f32 %v2436_v49, %v6873_v59 }
 0x810   :  { %v3252_v5 = vmul.f32 -1.442695, %v2364_v62 }
 0x811   :  { %v3253_v43 = vmul.f32 -1.442695, %v2366_v48  ;;  %v3254_v57 = vmul.f32 -1.442695, %v2437_v15 }
 0x812   :  { %4990 = vpow2.f32 %v3252_v5 }
 0x813   :  { %4992 = vpow2.f32 %v3253_v43 }
 0x814   :  { %4994 = vpow2.f32 %v3254_v57 }
 0x815   :  { %4996 = vtanh.f32 %v2435_v60 }
 0x81c   :  { %v4991_v1 = vpop.eup %4990 }
 0x81d   :  { %v4993_v46 = vpop.eup %4992  ;;  %v2442_v9 = vadd.f32 1.0, %v4991_v1 }
 0x81e   :  { %v2448_v16 = vadd.f32 1.0, %v4993_v46  ;;  %v4995_v30 = vpop.eup %4994 }
 0x81f   :  { %4998 = vrcp.f32 %v2442_v9  ;;  %v4997_v22 = vpop.eup %4996  ;;  %v2455_v5 = vadd.f32 1.0, %v4995_v30  ;;  %v2464_v9 = vld [vmem:[#allocation3 + $0x30] sm:$0xff] }
 0x820   :  { %5000 = vrcp.f32 %v2448_v16 }
 0x821   :  { %5002 = vrcp.f32 %v2455_v5 }
 0x829   :  { %v4999_v31 = vpop.eup %4998 }
 0x82a   :  { %v5001_v62 = vpop.eup %5000  ;;  %v2459_v48 = vmul.f32 %v4999_v31, %v4997_v22 }
 0x82b   :  { %v2458_v43 = vmul.f32 %v5001_v62, %v6100_v63  ;;  %v5003_v62 = vpop.eup %5002 }
 0x82d   :  { %v2531_v49 = vpop.f32.mrb[24].mxu0  ;;  %v2602_v15 = vpop.f32.mrb[24].mxu1  ;;  %v6212_v59 = vadd.f32 %v2459_v48, %v2458_v43 }
 0x82e   :  { %v2533_v25 = vpop.f32.mrb[25].mxu0  ;;  %v2604_v1 = vpop.f32.mrb[25].mxu1 }
 0x82f   :  { %v2611_v57 = vcombine.low %v2531_v49, %v2533_v25  ;;  %v2612_v60 = vcombine.low %v2602_v15, %v2604_v1  ;;  %5004 = vtanh.f32 %v6212_v59 }
 0x831   :  { %v2619_v16 = vrot.slane %v2611_v57, %v5528_v29  ;;  %v2626_v46 = vrot.slane %v2612_v60, %v5528_v29 }
 0x833   :  { %v2627_v22 = vcombine.low %v2619_v16, %v2626_v46 }
 0x835   :  { %v2629_v30 = vadd.f32 %v2627_v22, %v2464_v9 }
 0x837   :  { %v3255_v31 = vmul.f32 -1.442695, %v2629_v30  ;;  %v2637_v63 = vrot.slane %v2629_v30, 2  ;;  %v2648_v43 = vrot.slane %v2629_v30, 6  ;;  %v2645_v25 = vrot.slane %v2629_v30, 4 }
 0x839   :  { %v5005_v33 = vpop.eup %5004  ;;  %5006 = vpow2.f32 %v3255_v31  ;;  %v3256_v48 = vmul.f32 -1.442695, %v2637_v63  ;;  %v3257_v49 = vmul.f32 -1.442695, %v2648_v43  ;;  %v6918_v43 = vld [vmem:[#allocation55_spill] sm:$0xff] }
 0x83a   :  { %v2462_v5 = vmul.f32 %v5005_v33, %v5003_v62 }
 0x83b   :  { %5008 = vpow2.f32 %v3256_v48 }
 0x83c   :  { %2725 = vmatprep.mubr.f32.mxu0 %v2462_v5  ;;  %2796 = vmatprep.mubr.f32.mxu1 %v2462_v5  ;;  %5010 = vpow2.f32 %v3257_v49  ;;  %v6919_v49 = vld [vmem:[#allocation56_spill] sm:$0xff] }
 0x843   :  { %v5007_v15 = vpop.eup %5006 }
 0x844   :  { %v2633_v1 = vadd.f32 1.0, %v5007_v15  ;;  %v6920_v15 = vld [vmem:[#allocation57_spill] sm:$0xff] }
 0x845   :  { %v5009_v57 = vpop.eup %5008 }
 0x846   :  { %5012 = vrcp.f32 %v2633_v1  ;;  %v2642_v60 = vadd.f32 1.0, %v5009_v57  ;;  %v5011_v16 = vpop.eup %5010  ;;  %v6922_v1 = vld [vmem:[#allocation59_spill] sm:$0xff]  ;;  %v6923_v57 = vld [vmem:[#allocation60_spill] sm:$0xff] }
 0x847   :  { %5014 = vtanh.f32 %v2645_v25  ;;  %v2653_v31 = vadd.f32 1.0, %v5011_v16  ;;  %v6921_v25 = vld [vmem:[#allocation58_spill] sm:$0xff] }
 0x848   :  { %5016 = vrcp.f32 %v2642_v60  ;;  %v6924_v60 = vld [vmem:[#allocation61_spill] sm:$0xff]  ;;  %v6925_v16 = vld [vmem:[#allocation62_spill] sm:$0xff] }
 0x849   :  { %5018 = vrcp.f32 %v2653_v31 }
 0x850   :  { %v5013_v46 = vpop.eup %5012 }
 0x851   :  { %v5015_v9 = vpop.eup %5014 }
 0x852   :  { %v5017_v22 = vpop.eup %5016  ;;  %v2657_v63 = vmul.f32 %v5015_v9, %v5013_v46  ;;  %v6926_v46 = vld [vmem:[#allocation63_spill] sm:$0xff]  ;;  %v6927_v9 = vld [vmem:[#allocation64_spill] sm:$0xff] }
 0x853   :  { %v2656_v33 = vmul.f32 %v5017_v22, %v6106_v7  ;;  %v5019_v30 = vpop.eup %5018  ;;  %v6917_v7 = vld [vmem:[#allocation54_spill] sm:$0xff] }
 0x855   :  { %v6218_v62 = vadd.f32 %v2657_v63, %v2656_v33  ;;  %v6928_v33 = vld [vmem:[#allocation65_spill] sm:$0xff] }
 0x857   :  { %5020 = vtanh.f32 %v6218_v62 }
 0x861   :  { %v5021_v48 = vpop.eup %5020 }
 0x862   :  { %v2660_v5 = vmul.f32 %v5021_v48, %v5019_v30 }
 0x864   :  { %2726 = vmatmul.mubr.f32.vlgmr.msra.gmra.mrb[26].mxu0 %v2660_v5  ;;  %2797 = vmatmul.mubr.f32.vlgmr.msra.gmra.mrb[26].mxu1 %v2660_v5 }
 0x865   :  { %4616 = vmatpush1.bf16.msra.mxu0 %v5235_v10  ;;  %4648 = vmatpush1.bf16.msra.mxu1 %v5238_v14  ;;  %v6875_v10 = vld [vmem:[#allocation12_spill] sm:$0xff]  ;;  %v6876_v14 = vld [vmem:[#allocation13_spill] sm:$0xff] }
 0x866   :  { %4618 = vmatprep.subr.bf16.mxu0 %v5242_v18  ;;  %4650 = vmatprep.subr.bf16.mxu1 %v5244_v19  ;;  %v6877_v18 = vld [vmem:[#allocation14_spill] sm:$0xff]  ;;  %v6878_v19 = vld [vmem:[#allocation15_spill] sm:$0xff] }
 0x867   :  { %2893 = vmatprep.mubr.f32.mxu0 %v6526_v6  ;;  %2964 = vmatprep.mubr.f32.mxu1 %v6526_v6  ;;  %v6916_v6 = vld [vmem:[#allocation53_spill] sm:$0xff] }
 0x869   :  { %4620 = vmatpush1.bf16.msra.mxu0 %v5247_v23  ;;  %4652 = vmatpush1.bf16.msra.mxu1 %v5251_v27  ;;  %v6879_v23 = vld [vmem:[#allocation16_spill] sm:$0xff]  ;;  %v6880_v27 = vld [vmem:[#allocation17_spill] sm:$0xff] }
 0x86a   :  { %4622 = vmatprep.subr.bf16.mxu0 %v5253_v28  ;;  %4654 = vmatprep.subr.bf16.mxu1 %v5255_v32  ;;  %v6881_v28 = vld [vmem:[#allocation18_spill] sm:$0xff]  ;;  %v6882_v32 = vld [vmem:[#allocation19_spill] sm:$0xff] }
 0x86d   :  { %4624 = vmatpush1.bf16.msra.mxu0 %v5258_v36  ;;  %4656 = vmatpush1.bf16.msra.mxu1 %v5262_v40  ;;  %v6883_v36 = vld [vmem:[#allocation20_spill] sm:$0xff]  ;;  %v6884_v40 = vld [vmem:[#allocation21_spill] sm:$0xff] }
 0x86e   :  { %4626 = vmatprep.subr.bf16.mxu0 %v5264_v41  ;;  %4658 = vmatprep.subr.bf16.mxu1 %v5267_v45  ;;  %v6885_v41 = vld [vmem:[#allocation22_spill] sm:$0xff]  ;;  %v6886_v45 = vld [vmem:[#allocation23_spill] sm:$0xff] }
 0x871   :  { %4628 = vmatpush1.bf16.msra.mxu0 %v5270_v52  ;;  %4660 = vmatpush1.bf16.msra.mxu1 %v5274_v53  ;;  %v6887_v52 = vld [vmem:[#allocation24_spill] sm:$0xff]  ;;  %v6888_v53 = vld [vmem:[#allocation25_spill] sm:$0xff] }
 0x872   :  { %4630 = vmatprep.subr.bf16.mxu0 %v5276_v54  ;;  %4662 = vmatprep.subr.bf16.mxu1 %v5279_v58  ;;  %v6889_v54 = vld [vmem:[#allocation26_spill] sm:$0xff]  ;;  %v6890_v58 = vld [vmem:[#allocation27_spill] sm:$0xff] }
 0x875   :  { %4632 = vmatpush1.bf16.msra.mxu0 %v5282_v0  ;;  %4664 = vmatpush1.bf16.msra.mxu1 %v5286_v2  ;;  %v6891_v0 = vld [vmem:[#allocation28_spill] sm:$0xff]  ;;  %v6892_v2 = vld [vmem:[#allocation29_spill] sm:$0xff] }
 0x876   :  { %4634 = vmatprep.subr.bf16.mxu0 %v5288_v3  ;;  %4666 = vmatprep.subr.bf16.mxu1 %v5291_v8  ;;  %v6893_v3 = vld [vmem:[#allocation30_spill] sm:$0xff]  ;;  %v6894_v8 = vld [vmem:[#allocation31_spill] sm:$0xff] }
 0x879   :  { %4636 = vmatpush1.bf16.msra.mxu0 %v5294_v17  ;;  %4668 = vmatpush1.bf16.msra.mxu1 %v5298_v20  ;;  %v6895_v17 = vld [vmem:[#allocation32_spill] sm:$0xff]  ;;  %v6896_v20 = vld [vmem:[#allocation33_spill] sm:$0xff] }
 0x87a   :  { %4638 = vmatprep.subr.bf16.mxu0 %v5300_v21  ;;  %4670 = vmatprep.subr.bf16.mxu1 %v5303_v26  ;;  %v6897_v21 = vld [vmem:[#allocation34_spill] sm:$0xff]  ;;  %v6898_v26 = vld [vmem:[#allocation35_spill] sm:$0xff] }
 0x87d   :  { %4640 = vmatpush1.bf16.msra.mxu0 %v5306_v35  ;;  %4672 = vmatpush1.bf16.msra.mxu1 %v5310_v37  ;;  %v6899_v35 = vld [vmem:[#allocation36_spill] sm:$0xff]  ;;  %v6900_v37 = vld [vmem:[#allocation37_spill] sm:$0xff] }
 0x87e   :  { %4642 = vmatprep.subr.bf16.mxu0 %v5312_v38  ;;  %4674 = vmatprep.subr.bf16.mxu1 %v5315_v44  ;;  %v6901_v38 = vld [vmem:[#allocation38_spill] sm:$0xff]  ;;  %v6902_v44 = vld [vmem:[#allocation39_spill] sm:$0xff] }
 0x881   :  { %4644 = vmatpush1.bf16.msra.mxu0 %v5318_v51  ;;  %4676 = vmatpush1.bf16.msra.mxu1 %v5322_v55  ;;  %v6903_v51 = vld [vmem:[#allocation40_spill] sm:$0xff]  ;;  %v6904_v55 = vld [vmem:[#allocation41_spill] sm:$0xff] }
 0x882   :  { %4678 = vmatprep.subr.bf16.mxu0 %v5324_v56  ;;  %4742 = vmatprep.subr.bf16.mxu1 %v5327_v61  ;;  %v6905_v56 = vld [vmem:[#allocation42_spill] sm:$0xff]  ;;  %v6906_v61 = vld [vmem:[#allocation43_spill] sm:$0xff] }
 0x884   :  { %2894 = vmatmul.mubr.f32.vlgmr.msra.gmra.mrb[28].mxu0 %v2660_v5  ;;  %2965 = vmatmul.mubr.f32.vlgmr.msra.gmra.mrb[28].mxu1 %v2660_v5 }
 0x885   :  { %4680 = vmatpush1.bf16.msra.mxu0 %v5330_v11  ;;  %4744 = vmatpush1.bf16.msra.mxu1 %v5334_v12  ;;  %v6907_v11 = vld [vmem:[#allocation44_spill] sm:$0xff]  ;;  %v6908_v12 = vld [vmem:[#allocation45_spill] sm:$0xff] }
 0x886   :  { %4682 = vmatprep.subr.bf16.mxu0 %v5336_v13  ;;  %4746 = vmatprep.subr.bf16.mxu1 %v5339_v24  ;;  %v6909_v13 = vld [vmem:[#allocation46_spill] sm:$0xff]  ;;  %v6910_v24 = vld [vmem:[#allocation47_spill] sm:$0xff] }
 0x889   :  { %4684 = vmatpush1.bf16.msra.mxu0 %v5344_v34  ;;  %4748 = vmatpush1.bf16.msra.mxu1 %v5348_v39  ;;  %v6911_v34 = vld [vmem:[#allocation48_spill] sm:$0xff]  ;;  %v6912_v39 = vld [vmem:[#allocation49_spill] sm:$0xff] }
 0x88a   :  { %4686 = vmatprep.subr.bf16.mxu0 %v5350_v42  ;;  %4750 = vmatprep.subr.bf16.mxu1 %v5353_v47  ;;  %v6913_v42 = vld [vmem:[#allocation50_spill] sm:$0xff]  ;;  %v6914_v47 = vld [vmem:[#allocation51_spill] sm:$0xff] }
 0x88d   :  { %4688 = vmatpush1.bf16.msra.mxu0 %v5358_v50  ;;  %4752 = vmatpush1.bf16.msra.mxu1 %v6875_v10  ;;  %v6915_v50 = vld [vmem:[#allocation52_spill] sm:$0xff] }
 0x88e   :  { %4690 = vmatprep.subr.bf16.mxu0 %v6876_v14  ;;  %4754 = vmatprep.subr.bf16.mxu1 %v6877_v18  ;;  %v6929_v18 = vld [vmem:[#allocation67_spill] sm:$0xff] }
 0x891   :  { %4692 = vmatpush1.bf16.msra.mxu0 %v6878_v19  ;;  %4756 = vmatpush1.bf16.msra.mxu1 %v6879_v23 }
 0x892   :  { %4694 = vmatprep.subr.bf16.mxu0 %v6880_v27  ;;  %4758 = vmatprep.subr.bf16.mxu1 %v6881_v28  ;;  %v6930_v27 = vld [vmem:[#allocation68_spill] sm:$0xff] }
 0x895   :  { %4696 = vmatpush1.bf16.msra.mxu0 %v6882_v32  ;;  %4760 = vmatpush1.bf16.msra.mxu1 %v6883_v36 }
 0x896   :  { %4698 = vmatprep.subr.bf16.mxu0 %v6884_v40  ;;  %4762 = vmatprep.subr.bf16.mxu1 %v6885_v41 }
 0x899   :  { %4700 = vmatpush1.bf16.msra.mxu0 %v6886_v45  ;;  %4764 = vmatpush1.bf16.msra.mxu1 %v6887_v52 }
 0x89a   :  { %4702 = vmatprep.subr.bf16.mxu0 %v6888_v53  ;;  %4766 = vmatprep.subr.bf16.mxu1 %v6889_v54 }
 0x89d   :  { %4704 = vmatpush1.bf16.msra.mxu0 %v6890_v58  ;;  %4768 = vmatpush1.bf16.msra.mxu1 %v6891_v0 }
 0x89e   :  { %4706 = vmatprep.subr.bf16.mxu0 %v6892_v2  ;;  %4770 = vmatprep.subr.bf16.mxu1 %v6893_v3 }
 0x8a1   :  { %4708 = vmatpush1.bf16.msra.mxu0 %v6894_v8  ;;  %4772 = vmatpush1.bf16.msra.mxu1 %v6895_v17 }
 0x8a2   :  { %4710 = vmatprep.subr.bf16.mxu0 %v6896_v20  ;;  %4774 = vmatprep.subr.bf16.mxu1 %v6897_v21 }
 0x8a5   :  { %4712 = vmatpush1.bf16.msra.mxu0 %v6898_v26  ;;  %4776 = vmatpush1.bf16.msra.mxu1 %v6899_v35 }
 0x8a6   :  { %4714 = vmatprep.subr.bf16.mxu0 %v6900_v37  ;;  %4778 = vmatprep.subr.bf16.mxu1 %v6901_v38 }
 0x8a9   :  { %4716 = vmatpush1.bf16.msra.mxu0 %v6902_v44  ;;  %4780 = vmatpush1.bf16.msra.mxu1 %v6903_v51  ;;  %v2828_v44 = vld [vmem:[#allocation3 + $0x38] sm:$0xff] }
 0x8aa   :  { %4718 = vmatprep.subr.bf16.mxu0 %v6904_v55  ;;  %4782 = vmatprep.subr.bf16.mxu1 %v6905_v56 }
 0x8ad   :  { %4720 = vmatpush1.bf16.msra.mxu0 %v6906_v61  ;;  %4784 = vmatpush1.bf16.msra.mxu1 %v6907_v11 }
 0x8ae   :  { %4722 = vmatprep.subr.bf16.mxu0 %v6908_v12  ;;  %4786 = vmatprep.subr.bf16.mxu1 %v6909_v13 }
 0x8b1   :  { %4724 = vmatpush1.bf16.msra.mxu0 %v6910_v24  ;;  %4788 = vmatpush1.bf16.msra.mxu1 %v6911_v34 }
 0x8b2   :  { %4726 = vmatprep.subr.bf16.mxu0 %v6912_v39  ;;  %4790 = vmatprep.subr.bf16.mxu1 %v6913_v42 }
 0x8b5   :  { %4728 = vmatpush1.bf16.msra.mxu0 %v6914_v47  ;;  %4792 = vmatpush1.bf16.msra.mxu1 %v6915_v50 }
 0x8b6   :  { %4730 = vmatprep.subr.bf16.mxu0 %v6916_v6  ;;  %4794 = vmatprep.subr.bf16.mxu1 %v6917_v7 }
 0x8b9   :  { %4732 = vmatpush1.bf16.msra.mxu0 %v6918_v43  ;;  %4796 = vmatpush1.bf16.msra.mxu1 %v6919_v49 }
 0x8ba   :  { %4734 = vmatprep.subr.bf16.mxu0 %v6920_v15  ;;  %4798 = vmatprep.subr.bf16.mxu1 %v6921_v25 }
 0x8bd   :  { %4736 = vmatpush1.bf16.msra.mxu0 %v6922_v1  ;;  %4800 = vmatpush1.bf16.msra.mxu1 %v6923_v57 }
 0x8be   :  { %4738 = vmatprep.subr.bf16.mxu0 %v6924_v60  ;;  %4802 = vmatprep.subr.bf16.mxu1 %v6925_v16 }
 0x8c1   :  { %4740 = vmatpush1.bf16.msra.mxu0 %v6926_v46  ;;  %4804 = vmatpush1.bf16.msra.mxu1 %v6927_v9 }
 0x937   :  { %v2727_v22 = vpop.f32.mrb[26].mxu0  ;;  %v2798_v31 = vpop.f32.mrb[26].mxu1 }
 0x938   :  { %v2728_v63 = vadd.f32 %v2727_v22, %v6928_v33  ;;  %v2729_v30 = vpop.f32.mrb[27].mxu0  ;;  %v2800_v48 = vpop.f32.mrb[27].mxu1  ;;  %v2799_v28 = vadd.f32 %v2798_v31, %v6930_v27 }
 0x939   :  { %v2730_v5 = vadd.f32 %v2729_v30, %v6698_v4  ;;  %v2801_v19 = vadd.f32 %v2800_v48, %v6929_v18 }
 0x93a   :  { %v3258_v10 = vmul.f32 -1.442695, %v2728_v63 }
 0x93b   :  { %v3259_v14 = vmul.f32 -1.442695, %v2730_v5  ;;  %v3260_v23 = vmul.f32 -1.442695, %v2801_v19 }
 0x93c   :  { %5022 = vpow2.f32 %v3258_v10 }
 0x93d   :  { %5024 = vpow2.f32 %v3259_v14 }
 0x93e   :  { %5026 = vpow2.f32 %v3260_v23 }
 0x93f   :  { %5028 = vtanh.f32 %v2799_v28 }
 0x946   :  { %v5023_v32 = vpop.eup %5022 }
 0x947   :  { %v5025_v36 = vpop.eup %5024  ;;  %v2806_v40 = vadd.f32 1.0, %v5023_v32 }
 0x948   :  { %v2812_v41 = vadd.f32 1.0, %v5025_v36  ;;  %v5027_v45 = vpop.eup %5026 }
 0x949   :  { %5030 = vrcp.f32 %v2806_v40  ;;  %v5029_v52 = vpop.eup %5028  ;;  %v2819_v0 = vadd.f32 1.0, %v5027_v45 }
 0x94a   :  { %5032 = vrcp.f32 %v2812_v41 }
 0x94b   :  { %5034 = vrcp.f32 %v2819_v0 }
 0x953   :  { %v5031_v53 = vpop.eup %5030 }
 0x954   :  { %v5033_v54 = vpop.eup %5032  ;;  %v2823_v58 = vmul.f32 %v5031_v53, %v5029_v52 }
 0x955   :  { %v2822_v2 = vmul.f32 %v5033_v54, %v6212_v59  ;;  %v5035_v61 = vpop.eup %5034 }
 0x957   :  { %v2895_v3 = vpop.f32.mrb[28].mxu0  ;;  %v2966_v8 = vpop.f32.mrb[28].mxu1  ;;  %v6322_v17 = vadd.f32 %v2823_v58, %v2822_v2  ;;  %v3267_v58 = vld [vmem:[%s6343_s4] ss:$0 sm:$0xff] }
 0x958   :  { %v2897_v20 = vpop.f32.mrb[29].mxu0  ;;  %v2968_v21 = vpop.f32.mrb[29].mxu1 }
 0x959   :  { %v2975_v26 = vcombine.low %v2895_v3, %v2897_v20  ;;  %v2976_v35 = vcombine.low %v2966_v8, %v2968_v21  ;;  %5036 = vtanh.f32 %v6322_v17  ;;  %v3268_v8 = vld [vmem:[#allocation2] ss:$0 sm:$0xff] }
 0x95b   :  { %v2983_v37 = vrot.slane %v2975_v26, %v5528_v29  ;;  %v2990_v38 = vrot.slane %v2976_v35, %v5528_v29 }
 0x95d   :  { %v2991_v51 = vcombine.low %v2983_v37, %v2990_v38 }
 0x95f   :  { %v2993_v55 = vadd.f32 %v2991_v51, %v2828_v44 }
 0x961   :  { %v3261_v56 = vmul.f32 -1.442695, %v2993_v55  ;;  %v3001_v59 = vrot.slane %v2993_v55, 2  ;;  %v3012_v24 = vrot.slane %v2993_v55, 6  ;;  %v3009_v42 = vrot.slane %v2993_v55, 4 }
 0x963   :  { %v5037_v11 = vpop.eup %5036  ;;  %5038 = vpow2.f32 %v3261_v56  ;;  %v3262_v12 = vmul.f32 -1.442695, %v3001_v59  ;;  %v3263_v34 = vmul.f32 -1.442695, %v3012_v24 }
 0x964   :  { %v2826_v13 = vmul.f32 %v5037_v11, %v5035_v61 }
 0x965   :  { %5040 = vpow2.f32 %v3262_v12 }
 0x966   :  { %3089 = vmatprep.mubr.f32.mxu0 %v2826_v13  ;;  %3160 = vmatprep.mubr.f32.mxu1 %v2826_v13  ;;  %5042 = vpow2.f32 %v3263_v34 }
 0x96d   :  { %v5039_v39 = vpop.eup %5038 }
 0x96e   :  { %v2997_v47 = vadd.f32 1.0, %v5039_v39 }
 0x96f   :  { %v5041_v50 = vpop.eup %5040 }
 0x970   :  { %5044 = vrcp.f32 %v2997_v47  ;;  %v3006_v29 = vadd.f32 1.0, %v5041_v50  ;;  %v5043_v6 = vpop.eup %5042 }
 0x971   :  { %5046 = vtanh.f32 %v3009_v42  ;;  %v3017_v15 = vadd.f32 1.0, %v5043_v6 }
 0x972   :  { %5048 = vrcp.f32 %v3006_v29 }
 0x973   :  { %5050 = vrcp.f32 %v3017_v15 }
 0x97a   :  { %v5045_v7 = vpop.eup %5044 }
 0x97b   :  { %v5047_v43 = vpop.eup %5046 }
 0x97c   :  { %v5049_v49 = vpop.eup %5048  ;;  %v3021_v1 = vmul.f32 %v5047_v43, %v5045_v7 }
 0x97d   :  { %v3020_v25 = vmul.f32 %v5049_v49, %v6218_v62  ;;  %v5051_v60 = vpop.eup %5050 }
 0x97f   :  { %v3022_v57 = vadd.f32 %v3021_v1, %v3020_v25 }
 0x981   :  { %5052 = vtanh.f32 %v3022_v57 }
 0x98b   :  { %v5053_v16 = vpop.eup %5052 }
 0x98c   :  { %v3024_v46 = vmul.f32 %v5053_v16, %v5051_v60 }
 0x98e   :  { %3090 = vmatmul.mubr.f32.vlgmr.msra.gmra.mrb[30].mxu0 %v3024_v46  ;;  %3161 = vmatmul.mubr.f32.vlgmr.msra.gmra.mrb[30].mxu1 %v3024_v46 }
 0xa61   :  { %v3091_v9 = vpop.f32.mrb[30].mxu0  ;;  %v3162_v22 = vpop.f32.mrb[30].mxu1 }
 0xa62   :  { %v3092_v31 = vadd.f32 %v3091_v9, %v6928_v33  ;;  %v3093_v63 = vpop.f32.mrb[31].mxu0  ;;  %v3164_v30 = vpop.f32.mrb[31].mxu1  ;;  %v3163_v19 = vadd.f32 %v3162_v22, %v6930_v27 }
 0xa63   :  { %v3094_v48 = vadd.f32 %v3093_v63, %v6698_v4  ;;  %v3165_v62 = vadd.f32 %v3164_v30, %v6929_v18 }
 0xa64   :  { %v3264_v5 = vmul.f32 -1.442695, %v3092_v31 }
 0xa65   :  { %v3265_v10 = vmul.f32 -1.442695, %v3094_v48  ;;  %v3266_v14 = vmul.f32 -1.442695, %v3165_v62 }
 0xa66   :  { %5054 = vpow2.f32 %v3264_v5 }
 0xa67   :  { %5056 = vpow2.f32 %v3265_v10 }
 0xa68   :  { %5058 = vpow2.f32 %v3266_v14 }
 0xa69   :  { %5060 = vtanh.f32 %v3163_v19 }
 0xa70   :  { %v5055_v23 = vpop.eup %5054 }
 0xa71   :  { %v5057_v28 = vpop.eup %5056  ;;  %v3170_v32 = vadd.f32 1.0, %v5055_v23 }
 0xa72   :  { %v3176_v36 = vadd.f32 1.0, %v5057_v28  ;;  %v5059_v33 = vpop.eup %5058 }
 0xa73   :  { %5062 = vrcp.f32 %v3170_v32  ;;  %v5061_v40 = vpop.eup %5060  ;;  %v3183_v52 = vadd.f32 1.0, %v5059_v33 }
 0xa74   :  { %5064 = vrcp.f32 %v3176_v36 }
 0xa75   :  { %5066 = vrcp.f32 %v3183_v52 }
 0xa7d   :  { %v5063_v4 = vpop.eup %5062 }
 0xa7e   :  { %v5065_v41 = vpop.eup %5064  ;;  %v3187_v45 = vmul.f32 %v5063_v4, %v5061_v40 }
 0xa7f   :  { %v3186_v53 = vmul.f32 %v5065_v41, %v6322_v17  ;;  %v5067_v27 = vpop.eup %5066 }
 0xa81   :  { %v3188_v18 = vadd.f32 %v3187_v45, %v3186_v53 }
 0xa83   :  { %5068 = vtanh.f32 %v3188_v18 }
 0xa8d   :  { %v5069_v54 = vpop.eup %5068 }
 0xa8e   :  { %v3190_v0 = vmul.f32 %v5069_v54, %v5067_v27 }
 0xa90   :  { %v3198_v2 = vmul.f32 %v3267_v58, %v3190_v0 }
 0xa92   :  { %v3200_v3 = vsel %vm3199_vm0, %v3198_v2, 0.0 }
 0xa93   :  { %3201 = vadd.xlane.f32.xlu0 %v3200_v3 }
 0xb20   :  { %v3202_v20 = vpop.xlane.xlu0 %3201 }
 0xb21   :  { %v3210_v21 = vadd.f32 %v3268_v8, %v3202_v20 }
 0xb23   :  { %3212 = vst.msk [vmem:[%s6345_s6] sm:$0x3] %vm3211_vm1, %v3210_v21 }
 0xb24   :  { %3217 = vsyncpa [#allocation4], 1 }
 0xb25   :  { %3218 = vsyncpa [#allocation6], 1 }

</bundles_post_ra>
